<compile_context>
chip_gen: v6e
topology: v6e:2x2x1
jax: 0.10.0
libtpu: 0.0.40
codegen_flags: <defaults>
</compile_context>

<pallas_src>
import functools

import jax
import jax.numpy as jnp
from jax.experimental import pallas as pl
from jax.experimental.pallas import tpu as pltpu

# ----------------------------- config ---------------------------------------
BATCH = 304        # number of molecules (16-aligned -> zero host pad/slice cost)
D_IN = 256         # cfg.model.encoder.input_dim
HIDDEN = 128       # cfg.model.encoder.number_hidden_neurons
N_HIDDEN = 2       # cfg.model.encoder.number_hidden_layers
ASSOC = 128        # cfg.model.associationSpace_dim

# activation = 'selu' (MHNfs default; AlphaDropout in the module implies SELU)
_SELU_ALPHA = 1.6732632423543772848170429916717
_SELU_SCALE = 1.0507009873554804934193349852946


def _selu(x):
    # Clamp the exp argument so the discarded positive branch never makes inf.
    neg = _SELU_ALPHA * (jnp.exp(jnp.minimum(x, 0.0)) - 1.0)
    return _SELU_SCALE * jnp.where(x > 0, x, neg)


# ------------------------------- kernel -------------------------------------
def encoder_block_kernel(x_ref, w0_ref, b0_ref, wh_ref, bh_ref, wo_ref, bo_ref,
                         o_ref, *, n_hidden):
    # Input layer: Linear + SELU (dropout is identity at inference).
    # x / weights arrive as bf16; accumulate in f32 on the MXU.
    h = jnp.dot(x_ref[...], w0_ref[...], preferred_element_type=jnp.float32)
    h = _selu(h + b0_ref[...])                       # f32 elementwise path

    # Hidden layers: Linear + SELU, stacked weights (L, H, H) / biases (L, 1, H).
    for l in range(n_hidden):
        h = jnp.dot(h.astype(jnp.bfloat16), wh_ref[l],
                    preferred_element_type=jnp.float32)
        h = _selu(h + bh_ref[l])

    # Output layer: Linear + SELU.
    y = jnp.dot(h.astype(jnp.bfloat16), wo_ref[...],
                preferred_element_type=jnp.float32)
    o_ref[...] = _selu(y + bo_ref[...]).astype(o_ref.dtype)


def encoder_block(x, w0, b0, wh, bh, wo, bo):
    """x: (B, D_in) bf16 -> (B, A) f32. Weights bf16, biases f32.

    Single-grid-step kernel: everything (x, weights, activations, out) is
    resident in VMEM for the whole call, so there is no per-step pipelining
    overhead and no repeated weight DMA.
    """
    B, d_in = x.shape
    hidden = w0.shape[1]
    n_hidden = wh.shape[0]
    assoc = wo.shape[1]

    # Minimal sublane alignment only (bf16 rows pack 16 per sublane group).
    # For an already-aligned batch both the pad and the trailing slice are
    # skipped -> no extra host-side HBM round trips.
    b_pad = ((B + 15) // 16) * 16
    padded = b_pad != B
    if padded:
        x = jnp.pad(x, ((0, b_pad - B), (0, 0)))

    # Advisory cost model so XLA can schedule/overlap this tiny custom call.
    flops = 2 * b_pad * (d_in * hidden + n_hidden * hidden * hidden
                         + hidden * assoc)
    transcendentals = b_pad * (hidden * (1 + n_hidden) + assoc)   # SELU exp
    bytes_accessed = (x.size * x.dtype.itemsize
                      + w0.size * w0.dtype.itemsize
                      + b0.size * b0.dtype.itemsize
                      + wh.size * wh.dtype.itemsize
                      + bh.size * bh.dtype.itemsize
                      + wo.size * wo.dtype.itemsize
                      + bo.size * bo.dtype.itemsize
                      + b_pad * assoc * 4)

    kernel = functools.partial(encoder_block_kernel, n_hidden=n_hidden)
    out = pl.pallas_call(
        kernel,
        out_shape=jax.ShapeDtypeStruct((b_pad, assoc), jnp.float32),
        grid_spec=pltpu.PrefetchScalarGridSpec(
            num_scalar_prefetch=0,
            grid=(1,),                                             # one step
            in_specs=[
                pl.BlockSpec((b_pad, d_in), lambda i: (0, 0)),            # x
                pl.BlockSpec((d_in, hidden), lambda i: (0, 0)),           # W0
                pl.BlockSpec((1, hidden), lambda i: (0, 0)),              # b0
                pl.BlockSpec((n_hidden, hidden, hidden),
                             lambda i: (0, 0, 0)),                        # Wh
                pl.BlockSpec((n_hidden, 1, hidden), lambda i: (0, 0, 0)), # bh
                pl.BlockSpec((hidden, assoc), lambda i: (0, 0)),          # Wo
                pl.BlockSpec((1, assoc), lambda i: (0, 0)),               # bo
            ],
            out_specs=pl.BlockSpec((b_pad, assoc), lambda i: (0, 0)),
        ),
        cost_estimate=pl.CostEstimate(
            flops=flops,
            transcendentals=transcendentals,
            bytes_accessed=bytes_accessed),
    )(x, w0, b0, wh, bh, wo, bo)
    return out[:B] if padded else out


# --------------------------- reference (pure JAX) ----------------------------
def encoder_block_ref(x, w0, b0, wh, bh, wo, bo):
    # Mirrors the kernel's bf16-matmul / f32-accumulate / f32-SELU arithmetic.
    h = _selu(jnp.dot(x, w0, preferred_element_type=jnp.float32) + b0)
    for l in range(wh.shape[0]):
        h = _selu(jnp.dot(h.astype(jnp.bfloat16), wh[l],
                          preferred_element_type=jnp.float32) + bh[l])
    return _selu(jnp.dot(h.astype(jnp.bfloat16), wo,
                         preferred_element_type=jnp.float32) + bo)


# ------------------------------ param init ----------------------------------
def init_params(key):
    # LeCun-normal-ish deterministic init (mirrors the SELU init_weights intent).
    ks = jax.random.split(key, 3)
    w0 = (jax.random.normal(ks[0], (D_IN, HIDDEN), jnp.float32)
          / jnp.sqrt(D_IN)).astype(jnp.bfloat16)
    b0 = jnp.zeros((1, HIDDEN), jnp.float32)
    wh = (jax.random.normal(ks[1], (N_HIDDEN, HIDDEN, HIDDEN), jnp.float32)
          / jnp.sqrt(HIDDEN)).astype(jnp.bfloat16)
    bh = jnp.zeros((N_HIDDEN, 1, HIDDEN), jnp.float32)
    wo = (jax.random.normal(ks[2], (HIDDEN, ASSOC), jnp.float32)
          / jnp.sqrt(HIDDEN)).astype(jnp.bfloat16)
    bo = jnp.zeros((1, ASSOC), jnp.float32)
    return w0, b0, wh, bh, wo, bo


if __name__ == "__main__":
    key = jax.random.PRNGKey(0)
    kx, kp = jax.random.split(key)
    x = jax.random.normal(kx, (BATCH, D_IN), jnp.float32).astype(jnp.bfloat16)
    params = init_params(kp)

    out = encoder_block(x, *params)
    out = jax.block_until_ready(out)

    ref = encoder_block_ref(x, *params)
    assert out.shape == (BATCH, ASSOC)
    assert jnp.allclose(out, ref, atol=1e-2, rtol=1e-2), "mismatch vs reference"
    assert bool(jnp.all(jnp.isfinite(out))), "non-finite output"
    # TODO(synk): training-mode Dropout/AlphaDropout omitted (inference = identity).
    print("KERNEL_OK")
</pallas_src>

<mosaic_0001>
module attributes {stable_mosaic.version = 11 : i64} {
  func.func @encoder_block_kernel(%arg0: i32, %arg1: memref<304x256xbf16, #tpu.memory_space<vmem>>, %arg2: memref<256x128xbf16, #tpu.memory_space<vmem>>, %arg3: memref<1x128xf32, #tpu.memory_space<vmem>>, %arg4: memref<2x128x128xbf16, #tpu.memory_space<vmem>>, %arg5: memref<2x1x128xf32, #tpu.memory_space<vmem>>, %arg6: memref<128x128xbf16, #tpu.memory_space<vmem>>, %arg7: memref<1x128xf32, #tpu.memory_space<vmem>>, %arg8: memref<304x128xf32, #tpu.memory_space<vmem>>) attributes {dimension_semantics = [#tpu.dimension_semantics<arbitrary>], iteration_bounds = array<i64: 1>, scalar_prefetch = 0 : i64, scratch_operands = 0 : i64, tpu.core_type = #tpu.core_type<tc>, window_params = [{pipeline_mode = #tpu.pipeline_mode<synchronous>, transform_indices = @transform_0, window_bounds = array<i64: 304, 256>}, {pipeline_mode = #tpu.pipeline_mode<synchronous>, transform_indices = @transform_1, window_bounds = array<i64: 256, 128>}, {pipeline_mode = #tpu.pipeline_mode<synchronous>, transform_indices = @transform_2, window_bounds = array<i64: 1, 128>}, {pipeline_mode = #tpu.pipeline_mode<synchronous>, transform_indices = @transform_3, window_bounds = array<i64: 2, 128, 128>}, {pipeline_mode = #tpu.pipeline_mode<synchronous>, transform_indices = @transform_4, window_bounds = array<i64: 2, 1, 128>}, {pipeline_mode = #tpu.pipeline_mode<synchronous>, transform_indices = @transform_5, window_bounds = array<i64: 128, 128>}, {pipeline_mode = #tpu.pipeline_mode<synchronous>, transform_indices = @transform_6, window_bounds = array<i64: 1, 128>}, {pipeline_mode = #tpu.pipeline_mode<synchronous>, transform_indices = @transform_7, window_bounds = array<i64: 304, 128>}]} {
    %c0 = arith.constant 0 : index
    %c0_0 = arith.constant 0 : index
    %0 = vector.load %arg1[%c0, %c0_0] : memref<304x256xbf16, #tpu.memory_space<vmem>>, vector<304x256xbf16>
    %c0_1 = arith.constant 0 : index
    %c0_2 = arith.constant 0 : index
    %1 = vector.load %arg2[%c0_1, %c0_2] : memref<256x128xbf16, #tpu.memory_space<vmem>>, vector<256x128xbf16>
    %cst = arith.constant dense<0.000000e+00> : vector<304x128xf32>
    %2 = tpu.matmul %0, %1, %cst {dimension_numbers = #tpu.dot_dimension_numbers<[1], [0], [0], [1], [0, 0, 1, 1], [], []>} : vector<304x256xbf16>, vector<256x128xbf16>, vector<304x128xf32> -> vector<304x128xf32>
    %c0_3 = arith.constant 0 : index
    %c0_4 = arith.constant 0 : index
    %3 = vector.load %arg3[%c0_3, %c0_4] : memref<1x128xf32, #tpu.memory_space<vmem>>, vector<1x128xf32>
    %4 = vector.broadcast %3 : vector<1x128xf32> to vector<304x128xf32>
    %5 = arith.addf %2, %4 : vector<304x128xf32>
    %cst_5 = arith.constant 0.000000e+00 : f32
    %6 = vector.broadcast %cst_5 : f32 to vector<304x128xf32>
    %7 = arith.minimumf %5, %6 : vector<304x128xf32>
    %8 = math.exp %7 : vector<304x128xf32>
    %cst_6 = arith.constant 1.000000e+00 : f32
    %9 = vector.broadcast %cst_6 : f32 to vector<304x128xf32>
    %10 = arith.subf %8, %9 : vector<304x128xf32>
    %cst_7 = arith.constant 1.67326319 : f32
    %11 = vector.broadcast %cst_7 : f32 to vector<304x128xf32>
    %12 = arith.mulf %11, %10 : vector<304x128xf32>
    %cst_8 = arith.constant 0.000000e+00 : f32
    %13 = vector.broadcast %cst_8 : f32 to vector<304x128xf32>
    %14 = arith.cmpf ogt, %5, %13 : vector<304x128xf32>
    %15 = arith.select %14, %5, %12 : vector<304x128xi1>, vector<304x128xf32>
    %cst_9 = arith.constant 1.05070102 : f32
    %16 = vector.broadcast %cst_9 : f32 to vector<304x128xf32>
    %17 = arith.mulf %16, %15 : vector<304x128xf32>
    %18 = arith.truncf %17 : vector<304x128xf32> to vector<304x128xbf16>
    %c0_10 = arith.constant 0 : index
    %c0_11 = arith.constant 0 : index
    %c0_12 = arith.constant 0 : index
    %19 = vector.load %arg4[%c0_10, %c0_11, %c0_12] : memref<2x128x128xbf16, #tpu.memory_space<vmem>>, vector<1x128x128xbf16>
    %20 = vector.shape_cast %19 : vector<1x128x128xbf16> to vector<128x128xbf16>
    %cst_13 = arith.constant dense<0.000000e+00> : vector<304x128xf32>
    %21 = tpu.matmul %18, %20, %cst_13 {dimension_numbers = #tpu.dot_dimension_numbers<[1], [0], [0], [1], [0, 0, 1, 1], [], []>} : vector<304x128xbf16>, vector<128x128xbf16>, vector<304x128xf32> -> vector<304x128xf32>
    %c0_14 = arith.constant 0 : index
    %c0_15 = arith.constant 0 : index
    %c0_16 = arith.constant 0 : index
    %22 = vector.load %arg5[%c0_14, %c0_15, %c0_16] : memref<2x1x128xf32, #tpu.memory_space<vmem>>, vector<1x1x128xf32>
    %23 = vector.shape_cast %22 : vector<1x1x128xf32> to vector<1x128xf32>
    %24 = vector.broadcast %23 : vector<1x128xf32> to vector<304x128xf32>
    %25 = arith.addf %21, %24 : vector<304x128xf32>
    %cst_17 = arith.constant 0.000000e+00 : f32
    %26 = vector.broadcast %cst_17 : f32 to vector<304x128xf32>
    %27 = arith.minimumf %25, %26 : vector<304x128xf32>
    %28 = math.exp %27 : vector<304x128xf32>
    %cst_18 = arith.constant 1.000000e+00 : f32
    %29 = vector.broadcast %cst_18 : f32 to vector<304x128xf32>
    %30 = arith.subf %28, %29 : vector<304x128xf32>
    %cst_19 = arith.constant 1.67326319 : f32
    %31 = vector.broadcast %cst_19 : f32 to vector<304x128xf32>
    %32 = arith.mulf %31, %30 : vector<304x128xf32>
    %cst_20 = arith.constant 0.000000e+00 : f32
    %33 = vector.broadcast %cst_20 : f32 to vector<304x128xf32>
    %34 = arith.cmpf ogt, %25, %33 : vector<304x128xf32>
    %35 = arith.select %34, %25, %32 : vector<304x128xi1>, vector<304x128xf32>
    %cst_21 = arith.constant 1.05070102 : f32
    %36 = vector.broadcast %cst_21 : f32 to vector<304x128xf32>
    %37 = arith.mulf %36, %35 : vector<304x128xf32>
    %38 = arith.truncf %37 : vector<304x128xf32> to vector<304x128xbf16>
    %c1 = arith.constant 1 : index
    %c0_22 = arith.constant 0 : index
    %c0_23 = arith.constant 0 : index
    %39 = vector.load %arg4[%c1, %c0_22, %c0_23] : memref<2x128x128xbf16, #tpu.memory_space<vmem>>, vector<1x128x128xbf16>
    %40 = vector.shape_cast %39 : vector<1x128x128xbf16> to vector<128x128xbf16>
    %cst_24 = arith.constant dense<0.000000e+00> : vector<304x128xf32>
    %41 = tpu.matmul %38, %40, %cst_24 {dimension_numbers = #tpu.dot_dimension_numbers<[1], [0], [0], [1], [0, 0, 1, 1], [], []>} : vector<304x128xbf16>, vector<128x128xbf16>, vector<304x128xf32> -> vector<304x128xf32>
    %c1_25 = arith.constant 1 : index
    %c0_26 = arith.constant 0 : index
    %c0_27 = arith.constant 0 : index
    %42 = vector.load %arg5[%c1_25, %c0_26, %c0_27] : memref<2x1x128xf32, #tpu.memory_space<vmem>>, vector<1x1x128xf32>
    %43 = vector.shape_cast %42 : vector<1x1x128xf32> to vector<1x128xf32>
    %44 = vector.broadcast %43 : vector<1x128xf32> to vector<304x128xf32>
    %45 = arith.addf %41, %44 : vector<304x128xf32>
    %cst_28 = arith.constant 0.000000e+00 : f32
    %46 = vector.broadcast %cst_28 : f32 to vector<304x128xf32>
    %47 = arith.minimumf %45, %46 : vector<304x128xf32>
    %48 = math.exp %47 : vector<304x128xf32>
    %cst_29 = arith.constant 1.000000e+00 : f32
    %49 = vector.broadcast %cst_29 : f32 to vector<304x128xf32>
    %50 = arith.subf %48, %49 : vector<304x128xf32>
    %cst_30 = arith.constant 1.67326319 : f32
    %51 = vector.broadcast %cst_30 : f32 to vector<304x128xf32>
    %52 = arith.mulf %51, %50 : vector<304x128xf32>
    %cst_31 = arith.constant 0.000000e+00 : f32
    %53 = vector.broadcast %cst_31 : f32 to vector<304x128xf32>
    %54 = arith.cmpf ogt, %45, %53 : vector<304x128xf32>
    %55 = arith.select %54, %45, %52 : vector<304x128xi1>, vector<304x128xf32>
    %cst_32 = arith.constant 1.05070102 : f32
    %56 = vector.broadcast %cst_32 : f32 to vector<304x128xf32>
    %57 = arith.mulf %56, %55 : vector<304x128xf32>
    %58 = arith.truncf %57 : vector<304x128xf32> to vector<304x128xbf16>
    %c0_33 = arith.constant 0 : index
    %c0_34 = arith.constant 0 : index
    %59 = vector.load %arg6[%c0_33, %c0_34] : memref<128x128xbf16, #tpu.memory_space<vmem>>, vector<128x128xbf16>
    %cst_35 = arith.constant dense<0.000000e+00> : vector<304x128xf32>
    %60 = tpu.matmul %58, %59, %cst_35 {dimension_numbers = #tpu.dot_dimension_numbers<[1], [0], [0], [1], [0, 0, 1, 1], [], []>} : vector<304x128xbf16>, vector<128x128xbf16>, vector<304x128xf32> -> vector<304x128xf32>
    %c0_36 = arith.constant 0 : index
    %c0_37 = arith.constant 0 : index
    %61 = vector.load %arg7[%c0_36, %c0_37] : memref<1x128xf32, #tpu.memory_space<vmem>>, vector<1x128xf32>
    %62 = vector.broadcast %61 : vector<1x128xf32> to vector<304x128xf32>
    %63 = arith.addf %60, %62 : vector<304x128xf32>
    %cst_38 = arith.constant 0.000000e+00 : f32
    %64 = vector.broadcast %cst_38 : f32 to vector<304x128xf32>
    %65 = arith.minimumf %63, %64 : vector<304x128xf32>
    %66 = math.exp %65 : vector<304x128xf32>
    %cst_39 = arith.constant 1.000000e+00 : f32
    %67 = vector.broadcast %cst_39 : f32 to vector<304x128xf32>
    %68 = arith.subf %66, %67 : vector<304x128xf32>
    %cst_40 = arith.constant 1.67326319 : f32
    %69 = vector.broadcast %cst_40 : f32 to vector<304x128xf32>
    %70 = arith.mulf %69, %68 : vector<304x128xf32>
    %cst_41 = arith.constant 0.000000e+00 : f32
    %71 = vector.broadcast %cst_41 : f32 to vector<304x128xf32>
    %72 = arith.cmpf ogt, %63, %71 : vector<304x128xf32>
    %73 = arith.select %72, %63, %70 : vector<304x128xi1>, vector<304x128xf32>
    %cst_42 = arith.constant 1.05070102 : f32
    %74 = vector.broadcast %cst_42 : f32 to vector<304x128xf32>
    %75 = arith.mulf %74, %73 : vector<304x128xf32>
    %c0_43 = arith.constant 0 : index
    %c0_44 = arith.constant 0 : index
    %76 = vector.load %arg8[%c0_43, %c0_44] : memref<304x128xf32, #tpu.memory_space<vmem>>, vector<304x128xf32>
    tpu.vector_store %arg8[%c0_43, %c0_44], %75 {strides = array<i32>} : memref<304x128xf32, #tpu.memory_space<vmem>>, vector<304x128xf32>,
    return
  }
  func.func @transform_0(%arg0: i32) -> (i32, i32) {
    %c0_i32 = arith.constant 0 : i32
    %c0_i32_0 = arith.constant 0 : i32
    %c0_i32_1 = arith.constant 0 : i32
    return %c0_i32, %c0_i32_0 : i32, i32
  }
  func.func @transform_1(%arg0: i32) -> (i32, i32) {
    %c0_i32 = arith.constant 0 : i32
    %c0_i32_0 = arith.constant 0 : i32
    %c0_i32_1 = arith.constant 0 : i32
    return %c0_i32, %c0_i32_0 : i32, i32
  }
  func.func @transform_2(%arg0: i32) -> (i32, i32) {
    %c0_i32 = arith.constant 0 : i32
    %c0_i32_0 = arith.constant 0 : i32
    %c0_i32_1 = arith.constant 0 : i32
    return %c0_i32, %c0_i32_0 : i32, i32
  }
  func.func @transform_3(%arg0: i32) -> (i32, i32, i32) {
    %c0_i32 = arith.constant 0 : i32
    %c0_i32_0 = arith.constant 0 : i32
    %c0_i32_1 = arith.constant 0 : i32
    %c0_i32_2 = arith.constant 0 : i32
    return %c0_i32, %c0_i32_0, %c0_i32_1 : i32, i32, i32
  }
  func.func @transform_4(%arg0: i32) -> (i32, i32, i32) {
    %c0_i32 = arith.constant 0 : i32
    %c0_i32_0 = arith.constant 0 : i32
    %c0_i32_1 = arith.constant 0 : i32
    %c0_i32_2 = arith.constant 0 : i32
    return %c0_i32, %c0_i32_0, %c0_i32_1 : i32, i32, i32
  }
  func.func @transform_5(%arg0: i32) -> (i32, i32) {
    %c0_i32 = arith.constant 0 : i32
    %c0_i32_0 = arith.constant 0 : i32
    %c0_i32_1 = arith.constant 0 : i32
    return %c0_i32, %c0_i32_0 : i32, i32
  }
  func.func @transform_6(%arg0: i32) -> (i32, i32) {
    %c0_i32 = arith.constant 0 : i32
    %c0_i32_0 = arith.constant 0 : i32
    %c0_i32_1 = arith.constant 0 : i32
    return %c0_i32, %c0_i32_0 : i32, i32
  }
  func.func @transform_7(%arg0: i32) -> (i32, i32) {
    %c0_i32 = arith.constant 0 : i32
    %c0_i32_0 = arith.constant 0 : i32
    %c0_i32_1 = arith.constant 0 : i32
    return %c0_i32, %c0_i32_0 : i32, i32
  }
}

</mosaic_0001>

<bundles_post_ra>
// kernel: tpu_custom_call.1
= control target key start
LH: loop header
LB: loop body
LE: loop exit
PB: predicated region body
PF: predicated region fallthrough
CT: control target
= control target key end

     0   :  { %12 = vsyncpa [#allocation3], 0  ;;  %s4890_s0 = inlined_call_operand.hbm [shape: bf16[304,256], index: 0, kind: input, shape index: {}]   ;;  %s4891_s1 = inlined_call_operand.hbm [shape: bf16[256,128], index: 1, kind: input, shape index: {}]   ;;  %s4892_s2 = inlined_call_operand.vmem [shape: f32[1,128], index: 2, kind: input, shape index: {}]   ;;  %s4893_s3 = inlined_call_operand.hbm [shape: bf16[2,128,128], index: 3, kind: input, shape index: {}]   ;;  %s4894_s4 = inlined_call_operand.vmem [shape: f32[2,1,128], index: 4, kind: input, shape index: {}]   ;;  %s4895_s5 = inlined_call_operand.hbm [shape: bf16[128,128], index: 5, kind: input, shape index: {}]   ;;  %s4896_s6 = inlined_call_operand.vmem [shape: f32[1,128], index: 6, kind: input, shape index: {}]   ;;  %s4897_s7 = inlined_call_operand.hbm [shape: f32[304,128], index: 7, kind: output, shape index: {}]  }
   0x1   :  { %13 = vsyncpa [#allocation6], 0 }
   0x2   :  { %14 = vsyncpa [#allocation9], 0 }
   0x3   :  { %15 = vsyncpa [#allocation4], 0  ;;  %s3860_s24 = smov [#allocation5]  }
   0x4   :  { %s33_s25 = sshll.u32 %s3860_s24, 4  ;;  %s34_s25 = int_to_ptr.vmem [resolvable:$true] %s33_s25 }
   0x5   :  { %s3760_s26 = scalar_lea.vmem %s34_s25, 2048  ;;  %p3765_p1 = scmp.lt.s32.totalorder %s34_s25, %s34_s25 }
   0x6   :  { %p3761_p0 = scmp.ne.s32.totalorder %s34_s25, %s3760_s26  ;;  %p3766_p2 = scmp.lt.s32.totalorder %s3760_s26, %s3760_s26 }
   0x8   :  { %p3767_p3 = por %p3766_p2, %p3765_p1 }
   0xa   :  { %p3768_p4 = pnand %p3767_p3, %p3761_p0 }
   0xc   :  { %3771 = shalt.err (!%p3768_p4)
}
   0xd   :  { %s3861_s27 = smov 64   ;;  %s3862_s28 = smov 4  }
   0xe   :  { %39 = dma.hbm_to_vmem [thread:$0]  %s4891_s1, 2048, %s34_s25, [#allocation6], %s3861_s27, %s3861_s27, %s3862_s28  }
   0xf   :  { %s3863_s8 = smov [#allocation2]  }
  0x10   :  { %s21_s9 = sshll.u32 %s3863_s8, 4  ;;  %s22_s9 = int_to_ptr.vmem [resolvable:$true] %s21_s9 }
  0x11   :  { %s3780_s10 = scalar_lea.vmem %s22_s9, 4864  ;;  %p3785_p6 = scmp.lt.s32.totalorder %s22_s9, %s22_s9 }
  0x12   :  { %p3781_p5 = scmp.ne.s32.totalorder %s22_s9, %s3780_s10  ;;  %p3786_p7 = scmp.lt.s32.totalorder %s3780_s10, %s3780_s10 }
  0x14   :  { %p3787_p8 = por %p3786_p7, %p3785_p6 }
  0x16   :  { %p3788_p9 = pnand %p3787_p8, %p3781_p5 }
  0x18   :  { %3791 = shalt.err (!%p3788_p9)
}
  0x19   :  { %s3864_s11 = smov 128   ;;  %s3865_s12 = smov 8  }
  0x1a   :  { %27 = dma.hbm_to_vmem [thread:$0]  %s4890_s0, 4864, %s22_s9, [#allocation3], %s3864_s11, %s3864_s11, %s3865_s12  }
  0x1b   :  { %s3866_s1 = smov [#allocation7]   ;;  %s3867_s16 = smov [#allocation8]  }
  0x1c   :  { %s47_s15 = sshll.u32 %s3866_s1, 4  ;;  %s61_s17 = sshll.u32 %s3867_s16, 4  ;;  %s48_s15 = int_to_ptr.vmem [resolvable:$true] %s47_s15  ;;  %s62_s17 = int_to_ptr.vmem [resolvable:$true] %s61_s17 }
  0x1d   :  { %s3800_s18 = scalar_lea.vmem %s48_s15, 2048  ;;  %p3805_p11 = scmp.lt.s32.totalorder %s48_s15, %s48_s15 }
  0x1e   :  { %p3801_p10 = scmp.ne.s32.totalorder %s48_s15, %s3800_s18  ;;  %p3806_p12 = scmp.lt.s32.totalorder %s3800_s18, %s3800_s18 }
  0x20   :  { %p3807_p13 = por %p3806_p12, %p3805_p11 }
  0x22   :  { %p3808_p0 = pnand %p3807_p13, %p3801_p10 }
  0x24   :  { %3811 = shalt.err (!%p3808_p0)
}
  0x25   :  { %53 = dma.hbm_to_vmem [thread:$0]  %s4893_s3, 2048, %s48_s15, [#allocation6], %s3861_s27, %s3861_s27, %s3862_s28  }
  0x26   :  { %s3820_s0 = scalar_lea.vmem %s62_s17, 1024  ;;  %p3825_p2 = scmp.lt.s32.totalorder %s62_s17, %s62_s17 }
  0x27   :  { %p3821_p1 = scmp.ne.s32.totalorder %s62_s17, %s3820_s0  ;;  %p3826_p3 = scmp.lt.s32.totalorder %s3820_s0, %s3820_s0 }
  0x29   :  { %p3827_p4 = por %p3826_p3, %p3825_p2 }
  0x2b   :  { %p3828_p5 = pnand %p3827_p4, %p3821_p1 }
  0x2d   :  { %3831 = shalt.err (!%p3828_p5)
}
  0x2e   :  { %67 = dma.hbm_to_vmem [thread:$0]  %s4895_s5, 1024, %s62_s17, [#allocation9], %s3861_s27, %s3861_s27, %s3862_s28  }
  0x2f   :  { %3852 = dma.done.wait [#allocation3], 4864  }
  0x30   :  { %3853 = vsyncadd [#allocation3], 4294962432 }
  0x31   :  { %3854 = dma.done.wait [#allocation6], 4096  }
  0x32   :  { %3855 = vsyncadd [#allocation6], 4294963200 }
  0x33   :  { %3856 = dma.done.wait [#allocation9], 1024  }
  0x34   :  { %3857 = vsyncadd [#allocation9], 4294966272  ;;  %v3868_v0 = vmov 0   ;;  %v3351_v1 = vld [vmem:[#allocation5 + $0x38] sm:$0xff]   ;;  %v3352_v2 = vld [vmem:[#allocation5 + $0x30] sm:$0xff]   ;;  %v3869_v37 = vmov 0.0  }
  0x35   :  { %446 = vmatprep.subr.bf16.mxu0 %v3868_v0  ;;  %v3353_v3 = vld [vmem:[#allocation5 + $0x28] sm:$0xff]   ;;  %v3354_v4 = vld [vmem:[#allocation5 + $0x20] sm:$0xff]   ;;  %v3355_v5 = vld [vmem:[#allocation5 + $0x18] sm:$0xff]   ;;  %3047 = vmatprep.subr.bf16.mxu1 %v3869_v37  ;;  %vm3870_vm0 = vmmov 0  }
  0x36   :  { %447 = vmatpush1.bf16.msra.mxu0 %v3351_v1  ;;  %v3369_v6 = vld [vmem:[#allocation2 + $0x4] ss:$8 sps:$4 sm:$0xff]   ;;  %v3357_v8 = vld [vmem:[#allocation5 + $0x8] sm:$0xff]   ;;  %v3358_v9 = vld [vmem:[#allocation5] sm:$0xff]   ;;  %3063 = vmatprep.mubr.msk.bf16.mxu1 %vm3870_vm0, %v3869_v37 }
  0x37   :  { %448 = vmatprep.subr.bf16.mxu0 %v3868_v0  ;;  %v3356_v7 = vld [vmem:[#allocation5 + $0x10] sm:$0xff]   ;;  %478 = vmatprep.mubr.bf16.mxu0 %v3369_v6  ;;  %v3359_v10 = vld [vmem:[#allocation5 + $0x78] sm:$0xff]   ;;  %v3361_v12 = vld [vmem:[#allocation5 + $0x68] sm:$0xff]  }
  0x38   :  { %v3360_v11 = vld [vmem:[#allocation5 + $0x70] sm:$0xff]   ;;  %v3362_v13 = vld [vmem:[#allocation5 + $0x60] sm:$0xff]   ;;  %v3363_v14 = vld [vmem:[#allocation5 + $0x58] sm:$0xff]  }
  0x39   :  { %v3364_v15 = vld [vmem:[#allocation5 + $0x50] sm:$0xff]   ;;  %v3365_v16 = vld [vmem:[#allocation5 + $0x48] sm:$0xff]   ;;  %v3366_v17 = vld [vmem:[#allocation5 + $0x40] sm:$0xff]  }
  0x3a   :  { %449 = vmatpush1.bf16.msra.mxu0 %v3352_v2  ;;  %v3367_v18 = vld [vmem:[#allocation2] ss:$8 sps:$4 sm:$0xff]   ;;  %v3370_v19 = vld [vmem:[#allocation2 + $0x14] ss:$8 sps:$4 sm:$0xff]   ;;  %v3372_v20 = vld [vmem:[#allocation2 + $0x10] ss:$8 sps:$4 sm:$0xff]  }
  0x3b   :  { %450 = vmatprep.subr.bf16.mxu0 %v3868_v0  ;;  %v3373_v21 = vld [vmem:[#allocation2 + $0x24] ss:$8 sps:$4 sm:$0xff]   ;;  %v3375_v22 = vld [vmem:[#allocation2 + $0x20] ss:$8 sps:$4 sm:$0xff]   ;;  %v3376_v23 = vld [vmem:[#allocation2 + $0x34] ss:$8 sps:$4 sm:$0xff]  }
  0x3c   :  { %v3378_v24 = vld [vmem:[#allocation2 + $0x30] ss:$8 sps:$4 sm:$0xff]   ;;  %v3379_v25 = vld [vmem:[#allocation2 + $0x44] ss:$8 sps:$4 sm:$0xff]   ;;  %v3381_v26 = vld [vmem:[#allocation2 + $0x40] ss:$8 sps:$4 sm:$0xff]  }
  0x3d   :  { %v3382_v27 = vld [vmem:[#allocation2 + $0x54] ss:$8 sps:$4 sm:$0xff]   ;;  %v3384_v28 = vld [vmem:[#allocation2 + $0x50] ss:$8 sps:$4 sm:$0xff]   ;;  %v3385_v29 = vld [vmem:[#allocation2 + $0x64] ss:$8 sps:$4 sm:$0xff]  }
  0x3e   :  { %451 = vmatpush1.bf16.msra.mxu0 %v3353_v3  ;;  %v3387_v30 = vld [vmem:[#allocation2 + $0x60] ss:$8 sps:$4 sm:$0xff]   ;;  %v3388_v31 = vld [vmem:[#allocation2 + $0x74] ss:$8 sps:$4 sm:$0xff]   ;;  %v3390_v32 = vld [vmem:[#allocation2 + $0x70] ss:$8 sps:$4 sm:$0xff]  }
  0x3f   :  { %452 = vmatprep.subr.bf16.mxu0 %v3868_v0  ;;  %v3391_v33 = vld [vmem:[#allocation2 + $0x84] ss:$8 sps:$4 sm:$0xff]   ;;  %v3393_v34 = vld [vmem:[#allocation2 + $0x80] ss:$8 sps:$4 sm:$0xff]   ;;  %v3394_v35 = vld [vmem:[#allocation2 + $0x94] ss:$8 sps:$4 sm:$0xff]  }
  0x40   :  { %v3424_v36 = vld [vmem:[#allocation7 + $0x38] sm:$0xff]   ;;  %v3396_v38 = vld [vmem:[#allocation2 + $0x90] ss:$8 sps:$4 sm:$0xff]   ;;  %v3425_v40 = vld [vmem:[#allocation7 + $0x30] sm:$0xff]  }
  0x41   :  { %3048 = vmatpush3.bf16.msra.mxu1 %v3424_v36  ;;  %v3397_v39 = vld [vmem:[#allocation2 + $0xa4] ss:$8 sps:$4 sm:$0xff]   ;;  %v3426_v41 = vld [vmem:[#allocation7 + $0x28] sm:$0xff]   ;;  %v3399_v42 = vld [vmem:[#allocation2 + $0xa0] ss:$8 sps:$4 sm:$0xff]  }
  0x42   :  { %453 = vmatpush1.bf16.msra.mxu0 %v3354_v4  ;;  %3049 = vmatprep.subr.bf16.mxu1 %v3869_v37  ;;  %v3400_v43 = vld [vmem:[#allocation2 + $0xb4] ss:$8 sps:$4 sm:$0xff]   ;;  %v3428_v45 = vld [vmem:[#allocation7 + $0x18] sm:$0xff]   ;;  %v3402_v46 = vld [vmem:[#allocation2 + $0xb0] ss:$8 sps:$4 sm:$0xff]  }
  0x43   :  { %454 = vmatprep.subr.bf16.mxu0 %v3868_v0  ;;  %v3427_v44 = vld [vmem:[#allocation7 + $0x20] sm:$0xff]   ;;  %v3403_v47 = vld [vmem:[#allocation2 + $0xc4] ss:$8 sps:$4 sm:$0xff]   ;;  %v3430_v49 = vld [vmem:[#allocation7 + $0x8] sm:$0xff]  }
  0x44   :  { %v3429_v48 = vld [vmem:[#allocation7 + $0x10] sm:$0xff]   ;;  %v3406_v51 = vld [vmem:[#allocation2 + $0xd4] ss:$8 sps:$4 sm:$0xff]   ;;  %v3408_v53 = vld [vmem:[#allocation2 + $0xd0] ss:$8 sps:$4 sm:$0xff]  }
  0x45   :  { %3050 = vmatpush3.bf16.msra.mxu1 %v3425_v40  ;;  %v3405_v50 = vld [vmem:[#allocation2 + $0xc0] ss:$8 sps:$4 sm:$0xff]   ;;  %v3431_v52 = vld [vmem:[#allocation7] sm:$0xff]   ;;  %v3409_v54 = vld [vmem:[#allocation2 + $0xe4] ss:$8 sps:$4 sm:$0xff]  }
  0x46   :  { %455 = vmatpush1.bf16.msra.mxu0 %v3355_v5  ;;  %3051 = vmatprep.subr.bf16.mxu1 %v3869_v37  ;;  %v3411_v55 = vld [vmem:[#allocation2 + $0xe0] ss:$8 sps:$4 sm:$0xff]   ;;  %v3412_v56 = vld [vmem:[#allocation2 + $0xf4] ss:$8 sps:$4 sm:$0xff]   ;;  %v3414_v57 = vld [vmem:[#allocation2 + $0xf0] ss:$8 sps:$4 sm:$0xff]  }
  0x47   :  { %456 = vmatprep.subr.bf16.mxu0 %v3868_v0  ;;  %v3415_v58 = vld [vmem:[#allocation2 + $0x104] ss:$8 sps:$4 sm:$0xff]   ;;  %v3417_v59 = vld [vmem:[#allocation2 + $0x100] ss:$8 sps:$4 sm:$0xff]   ;;  %v3418_v60 = vld [vmem:[#allocation2 + $0x114] ss:$8 sps:$4 sm:$0xff]  }
  0x48   :  { %v3420_v61 = vld [vmem:[#allocation2 + $0x110] ss:$8 sps:$4 sm:$0xff]   ;;  %v3421_v62 = vld [vmem:[#allocation2 + $0x124] ss:$8 sps:$4 sm:$0xff]   ;;  %v3423_v63 = vld [vmem:[#allocation2 + $0x120] ss:$8 sps:$4 sm:$0xff]  }
  0x49   :  { %3052 = vmatpush3.bf16.msra.mxu1 %v3426_v41 }
  0x4a   :  { %457 = vmatpush1.bf16.msra.mxu0 %v3356_v7  ;;  %3053 = vmatprep.subr.bf16.mxu1 %v3869_v37 }
  0x4b   :  { %458 = vmatprep.subr.bf16.mxu0 %v3868_v0 }
  0x4d   :  { %3054 = vmatpush3.bf16.msra.mxu1 %v3427_v44 }
  0x4e   :  { %459 = vmatpush1.bf16.msra.mxu0 %v3357_v8  ;;  %3055 = vmatprep.subr.bf16.mxu1 %v3869_v37 }
  0x4f   :  { %460 = vmatprep.subr.bf16.mxu0 %v3868_v0 }
  0x51   :  { %3056 = vmatpush3.bf16.msra.mxu1 %v3428_v45 }
  0x52   :  { %461 = vmatpush1.bf16.msra.mxu0 %v3358_v9  ;;  %3057 = vmatprep.subr.bf16.mxu1 %v3869_v37 }
  0x53   :  { %462 = vmatprep.subr.bf16.mxu0 %v3868_v0 }
  0x55   :  { %3058 = vmatpush3.bf16.msra.mxu1 %v3429_v48 }
  0x56   :  { %463 = vmatpush2.bf16.msra.mxu0 %v3359_v10  ;;  %3059 = vmatprep.subr.bf16.mxu1 %v3869_v37 }
  0x57   :  { %464 = vmatprep.subr.bf16.mxu0 %v3868_v0 }
  0x59   :  { %3060 = vmatpush3.bf16.msra.mxu1 %v3430_v49 }
  0x5a   :  { %465 = vmatpush2.bf16.msra.mxu0 %v3360_v11  ;;  %3061 = vmatprep.subr.bf16.mxu1 %v3869_v37 }
  0x5b   :  { %466 = vmatprep.subr.bf16.mxu0 %v3868_v0 }
  0x5d   :  { %3062 = vmatpush3.bf16.msra.mxu1 %v3431_v52 }
  0x5e   :  { %467 = vmatpush2.bf16.msra.mxu0 %v3361_v12  ;;  %3139 = vmatprep.subr.bf16.mxu1 %v3869_v37 }
  0x5f   :  { %468 = vmatprep.subr.bf16.mxu0 %v3868_v0 }
  0x62   :  { %469 = vmatpush2.bf16.msra.mxu0 %v3362_v13 }
  0x63   :  { %470 = vmatprep.subr.bf16.mxu0 %v3868_v0 }
  0x66   :  { %471 = vmatpush2.bf16.msra.mxu0 %v3363_v14 }
  0x67   :  { %472 = vmatprep.subr.bf16.mxu0 %v3868_v0 }
  0x6a   :  { %473 = vmatpush2.bf16.msra.mxu0 %v3364_v15 }
  0x6b   :  { %474 = vmatprep.subr.bf16.mxu0 %v3868_v0 }
  0x6e   :  { %475 = vmatpush2.bf16.msra.mxu0 %v3365_v16 }
  0x6f   :  { %476 = vmatprep.subr.bf16.mxu0 %v3868_v0  ;;  %v3953_v0 = vld [vmem:[%s4892_s2] ss:$0 sm:$0xff] }
  0x72   :  { %477 = vmatpush2.bf16.msra.mxu0 %v3366_v17 }
  0x73   :  { %3231 = vmatprep.subr.bf16.mxu0 %v3869_v37 }
  0x75   :  { %479 = vmatmul.mubr.bf16.vlgmr.msra.gmra.mxu0 %v3367_v18 }
  0x76   :  { %486 = vmatprep.mubr.bf16.mxu0 %v3370_v19 }
  0x7d   :  { %487 = vmatmul.mubr.bf16.gmra.mxu0 %v3372_v20 }
  0x7e   :  { %494 = vmatprep.mubr.bf16.mxu0 %v3373_v21 }
  0x85   :  { %495 = vmatmul.mubr.bf16.gmra.mxu0 %v3375_v22 }
  0x86   :  { %502 = vmatprep.mubr.bf16.mxu0 %v3376_v23 }
  0x8d   :  { %503 = vmatmul.mubr.bf16.gmra.mxu0 %v3378_v24 }
  0x8e   :  { %510 = vmatprep.mubr.bf16.mxu0 %v3379_v25 }
  0x95   :  { %511 = vmatmul.mubr.bf16.gmra.mxu0 %v3381_v26 }
  0x96   :  { %518 = vmatprep.mubr.bf16.mxu0 %v3382_v27 }
  0x9d   :  { %519 = vmatmul.mubr.bf16.gmra.mxu0 %v3384_v28 }
  0x9e   :  { %526 = vmatprep.mubr.bf16.mxu0 %v3385_v29 }
  0xa5   :  { %527 = vmatmul.mubr.bf16.gmra.mxu0 %v3387_v30 }
  0xa6   :  { %534 = vmatprep.mubr.bf16.mxu0 %v3388_v31 }
  0xad   :  { %535 = vmatmul.mubr.bf16.gmra.mxu0 %v3390_v32 }
  0xae   :  { %542 = vmatprep.mubr.bf16.mxu0 %v3391_v33 }
  0xb5   :  { %543 = vmatmul.mubr.bf16.gmra.mxu0 %v3393_v34 }
  0xb6   :  { %550 = vmatprep.mubr.bf16.mxu0 %v3394_v35 }
  0xbd   :  { %551 = vmatmul.mubr.bf16.gmra.mxu0 %v3396_v38 }
  0xbe   :  { %558 = vmatprep.mubr.bf16.mxu0 %v3397_v39 }
  0xc5   :  { %559 = vmatmul.mubr.bf16.gmra.mxu0 %v3399_v42 }
  0xc6   :  { %566 = vmatprep.mubr.bf16.mxu0 %v3400_v43 }
  0xcd   :  { %567 = vmatmul.mubr.bf16.gmra.mxu0 %v3402_v46 }
  0xce   :  { %574 = vmatprep.mubr.bf16.mxu0 %v3403_v47 }
  0xd5   :  { %575 = vmatmul.mubr.bf16.gmra.mxu0 %v3405_v50 }
  0xd6   :  { %582 = vmatprep.mubr.bf16.mxu0 %v3406_v51 }
  0xdd   :  { %583 = vmatmul.mubr.bf16.gmra.mxu0 %v3408_v53 }
  0xde   :  { %590 = vmatprep.mubr.bf16.mxu0 %v3409_v54  ;;  %v3432_v54 = vld [vmem:[#allocation7 + $0x78] sm:$0xff]  }
  0xe5   :  { %591 = vmatmul.mubr.bf16.gmra.mxu0 %v3411_v55 }
  0xe6   :  { %598 = vmatprep.mubr.bf16.mxu0 %v3412_v56 }
  0xed   :  { %599 = vmatmul.mubr.bf16.gmra.mxu0 %v3414_v57 }
  0xee   :  { %606 = vmatprep.mubr.bf16.mxu0 %v3415_v58 }
  0xf5   :  { %607 = vmatmul.mubr.bf16.gmra.mxu0 %v3417_v59 }
  0xf6   :  { %614 = vmatprep.mubr.bf16.mxu0 %v3418_v60 }
  0xfd   :  { %615 = vmatmul.mubr.bf16.gmra.mxu0 %v3420_v61 }
  0xfe   :  { %622 = vmatprep.mubr.bf16.mxu0 %v3421_v62 }
 0x105   :  { %623 = vmatmul.mubr.bf16.gmra.mxu0 %v3423_v63 }
 0x106   :  { %3247 = vmatprep.mubr.msk.bf16.mxu0 %vm3870_vm0, %v3869_v37 }
 0x135   :  { %v480_v1 = vpop.f32.mrf.mxu0 }
 0x136   :  { %v481_v2 = vadd.f32 %v3953_v0, %v480_v1 }
 0x137   :  { %v482_v3 = vpop.f32.mrf.mxu0 }
 0x138   :  { %v631_v4 = vmin.f32 %v481_v2, 0.0  ;;  %vm821_vm1 = vcmp.gt.f32.partialorder %v481_v2, 0.0 }
 0x139   :  { %v483_v5 = vpop.f32.mrf.mxu0 }
 0x13a   :  { %v669_v6 = vmul.f32 1.442695, %v631_v4  ;;  %v484_v7 = vadd.f32 %v3953_v0, %v483_v5 }
 0x13b   :  { %v485_v8 = vpop.f32.mrf.mxu0 }
 0x13c   :  { %3448 = vpow2.f32 %v669_v6  ;;  %v632_v9 = vmin.f32 %v484_v7, 0.0  ;;  %vm822_vm2 = vcmp.gt.f32.partialorder %v484_v7, 0.0 }
 0x13d   :  { %v488_v10 = vpop.f32.mrf.mxu0 }
 0x13e   :  { %v671_v11 = vmul.f32 1.442695, %v632_v9  ;;  %v489_v12 = vadd.f32 %v3953_v0, %v488_v10 }
 0x13f   :  { %v490_v13 = vpop.f32.mrf.mxu0 }
 0x140   :  { %3450 = vpow2.f32 %v671_v11  ;;  %v633_v14 = vmin.f32 %v489_v12, 0.0  ;;  %vm823_vm3 = vcmp.gt.f32.partialorder %v489_v12, 0.0 }
 0x141   :  { %v491_v15 = vpop.f32.mrf.mxu0 }
 0x142   :  { %v673_v16 = vmul.f32 1.442695, %v633_v14  ;;  %v3959_v17 = vadd.f32 %v3953_v0, %v491_v15 }
 0x143   :  { %v493_v18 = vpop.f32.mrf.mxu0 }
 0x144   :  { %3452 = vpow2.f32 %v673_v16  ;;  %v634_v19 = vmin.f32 %v3959_v17, 0.0  ;;  %vm824_vm4 = vcmp.gt.f32.partialorder %v3959_v17, 0.0 }
 0x145   :  { %v496_v20 = vpop.f32.mrf.mxu0 }
 0x146   :  { %v675_v21 = vmul.f32 1.442695, %v634_v19  ;;  %v3963_v22 = vadd.f32 %v3953_v0, %v496_v20 }
 0x147   :  { %v498_v23 = vpop.f32.mrf.mxu0 }
 0x148   :  { %3454 = vpow2.f32 %v675_v21  ;;  %v635_v24 = vmin.f32 %v3963_v22, 0.0  ;;  %vm825_vm5 = vcmp.gt.f32.partialorder %v3963_v22, 0.0  ;;  %v3434_v21 = vld [vmem:[#allocation7 + $0x68] sm:$0xff]  }
 0x149   :  { %v3449_v25 = vpop.eup %3448  ;;  %v499_v26 = vpop.f32.mrf.mxu0 }
 0x14a   :  { %v2786_v27 = vadd.f32 -1.0, %v3449_v25  ;;  %v677_v28 = vmul.f32 1.442695, %v635_v24  ;;  %v3967_v29 = vadd.f32 %v3953_v0, %v499_v26 }
 0x14b   :  { %v501_v30 = vpop.f32.mrf.mxu0 }
 0x14c   :  { %v783_v31 = vmul.f32 1.6732632, %v2786_v27  ;;  %3456 = vpow2.f32 %v677_v28  ;;  %v636_v32 = vmin.f32 %v3967_v29, 0.0  ;;  %vm826_vm6 = vcmp.gt.f32.partialorder %v3967_v29, 0.0 }
 0x14d   :  { %v3451_v33 = vpop.eup %3450  ;;  %v504_v34 = vpop.f32.mrf.mxu0 }
 0x14e   :  { %v2787_v35 = vadd.f32 -1.0, %v3451_v33  ;;  %v679_v36 = vmul.f32 1.442695, %v636_v32  ;;  %v3971_v38 = vadd.f32 %v3953_v0, %v504_v34  ;;  %v859_v40 = vsel %vm821_vm1, %v481_v2, %v783_v31  ;;  %v3433_v2 = vld [vmem:[#allocation7 + $0x70] sm:$0xff]  }
 0x14f   :  { %v506_v39 = vpop.f32.mrf.mxu0  ;;  %v897_v49 = vmul.f32 1.050701, %v859_v40 }
 0x150   :  { %v784_v41 = vmul.f32 1.6732632, %v2787_v35  ;;  %3458 = vpow2.f32 %v679_v36  ;;  %v637_v42 = vmin.f32 %v3971_v38, 0.0  ;;  %v3435_v35 = vld [vmem:[#allocation7 + $0x60] sm:$0xff]   ;;  %vm827_vm7 = vcmp.gt.f32.partialorder %v3971_v38, 0.0 }
 0x151   :  { %v3453_v43 = vpop.eup %3452  ;;  %v507_v44 = vpop.f32.mrf.mxu0 }
 0x152   :  { %v860_v45 = vsel %vm822_vm2, %v484_v7, %v784_v41  ;;  %v2788_v46 = vadd.f32 -1.0, %v3453_v43  ;;  %v681_v47 = vmul.f32 1.442695, %v637_v42  ;;  %v3975_v48 = vadd.f32 %v3953_v0, %v507_v44 }
 0x153   :  { %v898_v50 = vmul.f32 1.050701, %v860_v45  ;;  %v509_v51 = vpop.f32.mrf.mxu0 }
 0x154   :  { %v785_v52 = vmul.f32 1.6732632, %v2788_v46  ;;  %3460 = vpow2.f32 %v681_v47  ;;  %v638_v53 = vmin.f32 %v3975_v48, 0.0  ;;  %v3436_v46 = vld [vmem:[#allocation7 + $0x58] sm:$0xff]   ;;  %vm828_vm8 = vcmp.gt.f32.partialorder %v3975_v48, 0.0 }
 0x155   :  { %v3455_v55 = vpop.eup %3454  ;;  %v512_v56 = vpop.f32.mrf.mxu0  ;;  %v935_v57 = vpack.c.bf16 %v898_v50, %v897_v49 }
 0x156   :  { %v2789_v58 = vadd.f32 -1.0, %v3455_v55  ;;  %v683_v59 = vmul.f32 1.442695, %v638_v53  ;;  %v3979_v60 = vadd.f32 %v3953_v0, %v512_v56  ;;  %v861_v62 = vsel %vm823_vm3, %v489_v12, %v785_v52  ;;  %v3437_v53 = vld [vmem:[#allocation7 + $0x50] sm:$0xff]  }
 0x157   :  { %v514_v61 = vpop.f32.mrf.mxu0  ;;  %3064 = vmatmul.mubr.bf16.vlgmr.msra.gmra.mxu1 %v935_v57  ;;  %v899_v9 = vmul.f32 1.050701, %v861_v62 }
 0x158   :  { %v786_v63 = vmul.f32 1.6732632, %v2789_v58  ;;  %3462 = vpow2.f32 %v683_v59  ;;  %v639_v1 = vmin.f32 %v3979_v60, 0.0  ;;  %3067 = vmatprep.mubr.msk.bf16.mxu1 %vm3870_vm0, %v3869_v37  ;;  %3140 = vmatpush3.bf16.msra.mxu1 %v3432_v54  ;;  %vm829_vm9 = vcmp.gt.f32.partialorder %v3979_v60, 0.0 }
 0x159   :  { %v3457_v3 = vpop.eup %3456  ;;  %v515_v4 = vpop.f32.mrf.mxu0  ;;  %3141 = vmatprep.subr.bf16.mxu1 %v3869_v37 }
 0x15a   :  { %v862_v5 = vsel %vm824_vm4, %v3959_v17, %v786_v63  ;;  %v2790_v6 = vadd.f32 -1.0, %v3457_v3  ;;  %v685_v7 = vmul.f32 1.442695, %v639_v1  ;;  %v3988_v8 = vadd.f32 %v3953_v0, %v515_v4  ;;  %v3438_v3 = vld [vmem:[#allocation7 + $0x48] sm:$0xff]  }
 0x15b   :  { %v900_v10 = vmul.f32 1.050701, %v862_v5  ;;  %v517_v11 = vpop.f32.mrf.mxu0 }
 0x15c   :  { %v787_v12 = vmul.f32 1.6732632, %v2790_v6  ;;  %3464 = vpow2.f32 %v685_v7  ;;  %v640_v13 = vmin.f32 %v3988_v8, 0.0  ;;  %3142 = vmatpush3.bf16.msra.mxu1 %v3433_v2  ;;  %vm830_vm10 = vcmp.gt.f32.partialorder %v3988_v8, 0.0 }
 0x15d   :  { %v3459_v14 = vpop.eup %3458  ;;  %v520_v15 = vpop.f32.mrf.mxu0  ;;  %v936_v16 = vpack.c.bf16 %v900_v10, %v899_v9  ;;  %3143 = vmatprep.subr.bf16.mxu1 %v3869_v37 }
 0x15e   :  { %v2791_v18 = vadd.f32 -1.0, %v3459_v14  ;;  %v687_v17 = vmul.f32 1.442695, %v640_v13  ;;  %v3993_v19 = vadd.f32 %v3953_v0, %v520_v15  ;;  %v863_v23 = vsel %vm825_vm5, %v3963_v22, %v787_v12 }
 0x15f   :  { %v522_v20 = vpop.f32.mrf.mxu0  ;;  %3068 = vmatmul.mubr.bf16.gmra.mxu1 %v936_v16  ;;  %v901_v22 = vmul.f32 1.050701, %v863_v23 }
 0x160   :  { %v788_v24 = vmul.f32 1.6732632, %v2791_v18  ;;  %3466 = vpow2.f32 %v687_v17  ;;  %v641_v25 = vmin.f32 %v3993_v19, 0.0  ;;  %3071 = vmatprep.mubr.msk.bf16.mxu1 %vm3870_vm0, %v3869_v37  ;;  %3144 = vmatpush3.bf16.msra.mxu1 %v3434_v21  ;;  %vm831_vm11 = vcmp.gt.f32.partialorder %v3993_v19, 0.0 }
 0x161   :  { %v3461_v26 = vpop.eup %3460  ;;  %v523_v27 = vpop.f32.mrf.mxu0  ;;  %3145 = vmatprep.subr.bf16.mxu1 %v3869_v37 }
 0x162   :  { %v864_v28 = vsel %vm826_vm6, %v3967_v29, %v788_v24  ;;  %v2792_v30 = vadd.f32 -1.0, %v3461_v26  ;;  %v689_v31 = vmul.f32 1.442695, %v641_v25  ;;  %v4003_v32 = vadd.f32 %v3953_v0, %v523_v27 }
 0x163   :  { %v902_v33 = vmul.f32 1.050701, %v864_v28  ;;  %v525_v34 = vpop.f32.mrf.mxu0 }
 0x164   :  { %v789_v36 = vmul.f32 1.6732632, %v2792_v30  ;;  %3468 = vpow2.f32 %v689_v31  ;;  %v642_v39 = vmin.f32 %v4003_v32, 0.0  ;;  %3146 = vmatpush3.bf16.msra.mxu1 %v3435_v35  ;;  %vm832_vm12 = vcmp.gt.f32.partialorder %v4003_v32, 0.0 }
 0x165   :  { %v3463_v40 = vpop.eup %3462  ;;  %v528_v41 = vpop.f32.mrf.mxu0  ;;  %v937_v42 = vpack.c.bf16 %v902_v33, %v901_v22  ;;  %3147 = vmatprep.subr.bf16.mxu1 %v3869_v37 }
 0x166   :  { %v2793_v29 = vadd.f32 -1.0, %v3463_v40  ;;  %v691_v43 = vmul.f32 1.442695, %v642_v39  ;;  %v4008_v44 = vadd.f32 %v3953_v0, %v528_v41  ;;  %v865_v47 = vsel %vm827_vm7, %v3971_v38, %v789_v36 }
 0x167   :  { %v530_v45 = vpop.f32.mrf.mxu0  ;;  %3072 = vmatmul.mubr.bf16.gmra.mxu1 %v937_v42  ;;  %v903_v38 = vmul.f32 1.050701, %v865_v47 }
 0x168   :  { %v790_v49 = vmul.f32 1.6732632, %v2793_v29  ;;  %3470 = vpow2.f32 %v691_v43  ;;  %v643_v50 = vmin.f32 %v4008_v44, 0.0  ;;  %3075 = vmatprep.mubr.msk.bf16.mxu1 %vm3870_vm0, %v3869_v37  ;;  %3148 = vmatpush3.bf16.msra.mxu1 %v3436_v46  ;;  %vm833_vm13 = vcmp.gt.f32.partialorder %v4008_v44, 0.0 }
 0x169   :  { %v3465_v51 = vpop.eup %3464  ;;  %v531_v52 = vpop.f32.mrf.mxu0  ;;  %3149 = vmatprep.subr.bf16.mxu1 %v3869_v37 }
 0x16a   :  { %v866_v54 = vsel %vm828_vm8, %v3975_v48, %v790_v49  ;;  %v2794_v55 = vadd.f32 -1.0, %v3465_v51  ;;  %v693_v56 = vmul.f32 1.442695, %v643_v50  ;;  %v4019_v57 = vadd.f32 %v3953_v0, %v531_v52 }
 0x16b   :  { %v904_v58 = vmul.f32 1.050701, %v866_v54  ;;  %v533_v59 = vpop.f32.mrf.mxu0 }
 0x16c   :  { %v791_v61 = vmul.f32 1.6732632, %v2794_v55  ;;  %3472 = vpow2.f32 %v693_v56  ;;  %v644_v62 = vmin.f32 %v4019_v57, 0.0  ;;  %3150 = vmatpush3.bf16.msra.mxu1 %v3437_v53  ;;  %vm834_vm14 = vcmp.gt.f32.partialorder %v4019_v57, 0.0 }
 0x16d   :  { %v3467_v63 = vpop.eup %3466  ;;  %v536_v1 = vpop.f32.mrf.mxu0  ;;  %v938_v2 = vpack.c.bf16 %v904_v58, %v903_v38  ;;  %3151 = vmatprep.subr.bf16.mxu1 %v3869_v37 }
 0x16e   :  { %v2795_v48 = vadd.f32 -1.0, %v3467_v63  ;;  %v695_v4 = vmul.f32 1.442695, %v644_v62  ;;  %v4024_v5 = vadd.f32 %v3953_v0, %v536_v1  ;;  %v867_v7 = vsel %vm829_vm9, %v3979_v60, %v791_v61 }
 0x16f   :  { %v538_v6 = vpop.f32.mrf.mxu0  ;;  %3076 = vmatmul.mubr.bf16.gmra.mxu1 %v938_v2  ;;  %v905_v60 = vmul.f32 1.050701, %v867_v7 }
 0x170   :  { %v792_v9 = vmul.f32 1.6732632, %v2795_v48  ;;  %3474 = vpow2.f32 %v695_v4  ;;  %v645_v10 = vmin.f32 %v4024_v5, 0.0  ;;  %3079 = vmatprep.mubr.msk.bf16.mxu1 %vm3870_vm0, %v3869_v37  ;;  %3152 = vmatpush3.bf16.msra.mxu1 %v3438_v3  ;;  %vm835_vm15 = vcmp.gt.f32.partialorder %v4024_v5, 0.0 }
 0x171   :  { %v3469_v11 = vpop.eup %3468  ;;  %v539_v12 = vpop.f32.mrf.mxu0  ;;  %3153 = vmatprep.subr.bf16.mxu1 %v3869_v37 }
 0x172   :  { %v868_v13 = vsel %vm830_vm10, %v3988_v8, %v792_v9  ;;  %v2796_v14 = vadd.f32 -1.0, %v3469_v11  ;;  %v697_v15 = vmul.f32 1.442695, %v645_v10  ;;  %v4035_v16 = vadd.f32 %v3953_v0, %v539_v12 }
 0x173   :  { %v906_v18 = vmul.f32 1.050701, %v868_v13  ;;  %v541_v17 = vpop.f32.mrf.mxu0 }
 0x174   :  { %v793_v20 = vmul.f32 1.6732632, %v2796_v14  ;;  %3476 = vpow2.f32 %v697_v15  ;;  %v646_v21 = vmin.f32 %v4035_v16, 0.0  ;;  %vm836_vm1 = vcmp.gt.f32.partialorder %v4035_v16, 0.0 }
 0x175   :  { %v3471_v23 = vpop.eup %3470  ;;  %v544_v24 = vpop.f32.mrf.mxu0  ;;  %v939_v25 = vpack.c.bf16 %v906_v18, %v905_v60 }
 0x176   :  { %v2797_v26 = vadd.f32 -1.0, %v3471_v23  ;;  %v699_v27 = vmul.f32 1.442695, %v646_v21  ;;  %v4040_v8 = vadd.f32 %v3953_v0, %v544_v24  ;;  %v869_v30 = vsel %vm831_vm11, %v3993_v19, %v793_v20 }
 0x177   :  { %v546_v28 = vpop.f32.mrf.mxu0  ;;  %3080 = vmatmul.mubr.bf16.gmra.mxu1 %v939_v25  ;;  %v907_v41 = vmul.f32 1.050701, %v869_v30 }
 0x178   :  { %v794_v31 = vmul.f32 1.6732632, %v2797_v26  ;;  %3478 = vpow2.f32 %v699_v27  ;;  %v647_v22 = vmin.f32 %v4040_v8, 0.0  ;;  %3083 = vmatprep.mubr.msk.bf16.mxu1 %vm3870_vm0, %v3869_v37  ;;  %vm837_vm2 = vcmp.gt.f32.partialorder %v4040_v8, 0.0 }
 0x179   :  { %v3473_v33 = vpop.eup %3472  ;;  %v547_v34 = vpop.f32.mrf.mxu0 }
 0x17a   :  { %v870_v35 = vsel %vm832_vm12, %v4003_v32, %v794_v31  ;;  %v2798_v36 = vadd.f32 -1.0, %v3473_v33  ;;  %v701_v39 = vmul.f32 1.442695, %v647_v22  ;;  %v4050_v40 = vadd.f32 %v3953_v0, %v547_v34 }
 0x17b   :  { %v908_v19 = vmul.f32 1.050701, %v870_v35  ;;  %v549_v42 = vpop.f32.mrf.mxu0 }
 0x17c   :  { %v795_v29 = vmul.f32 1.6732632, %v2798_v36  ;;  %3480 = vpow2.f32 %v701_v39  ;;  %v648_v43 = vmin.f32 %v4050_v40, 0.0  ;;  %vm838_vm3 = vcmp.gt.f32.partialorder %v4050_v40, 0.0 }
 0x17d   :  { %v3475_v45 = vpop.eup %3474  ;;  %v552_v46 = vpop.f32.mrf.mxu0  ;;  %v940_v47 = vpack.c.bf16 %v908_v19, %v907_v41 }
 0x17e   :  { %v2799_v49 = vadd.f32 -1.0, %v3475_v45  ;;  %v703_v50 = vmul.f32 1.442695, %v648_v43  ;;  %v4054_v51 = vadd.f32 %v3953_v0, %v552_v46  ;;  %v871_v52 = vsel %vm833_vm13, %v4008_v44, %v795_v29 }
 0x17f   :  { %v554_v32 = vpop.f32.mrf.mxu0  ;;  %3084 = vmatmul.mubr.bf16.gmra.mxu1 %v940_v47  ;;  %v909_v62 = vmul.f32 1.050701, %v871_v52 }
 0x180   :  { %v796_v53 = vmul.f32 1.6732632, %v2799_v49  ;;  %3482 = vpow2.f32 %v703_v50  ;;  %v649_v54 = vmin.f32 %v4054_v51, 0.0  ;;  %3087 = vmatprep.mubr.msk.bf16.mxu1 %vm3870_vm0, %v3869_v37  ;;  %vm839_vm4 = vcmp.gt.f32.partialorder %v4054_v51, 0.0 }
 0x181   :  { %v3477_v55 = vpop.eup %3476  ;;  %v555_v56 = vpop.f32.mrf.mxu0 }
 0x182   :  { %v872_v38 = vsel %vm834_vm14, %v4019_v57, %v796_v53  ;;  %v2800_v58 = vadd.f32 -1.0, %v3477_v55  ;;  %v705_v59 = vmul.f32 1.442695, %v649_v54  ;;  %v4064_v61 = vadd.f32 %v3953_v0, %v555_v56 }
 0x183   :  { %v910_v44 = vmul.f32 1.050701, %v872_v38  ;;  %v557_v63 = vpop.f32.mrf.mxu0 }
 0x184   :  { %v797_v1 = vmul.f32 1.6732632, %v2800_v58  ;;  %3484 = vpow2.f32 %v705_v59  ;;  %v650_v2 = vmin.f32 %v4064_v61, 0.0  ;;  %vm840_vm5 = vcmp.gt.f32.partialorder %v4064_v61, 0.0 }
 0x185   :  { %v3479_v3 = vpop.eup %3478  ;;  %v560_v48 = vpop.f32.mrf.mxu0  ;;  %v941_v4 = vpack.c.bf16 %v910_v44, %v909_v62 }
 0x186   :  { %v2801_v6 = vadd.f32 -1.0, %v3479_v3  ;;  %v707_v7 = vmul.f32 1.442695, %v650_v2  ;;  %v4068_v9 = vadd.f32 %v3953_v0, %v560_v48  ;;  %v873_v10 = vsel %vm835_vm15, %v4024_v5, %v797_v1 }
 0x187   :  { %v562_v57 = vpop.f32.mrf.mxu0  ;;  %3088 = vmatmul.mubr.bf16.gmra.mxu1 %v941_v4  ;;  %v911_v20 = vmul.f32 1.050701, %v873_v10 }
 0x188   :  { %v798_v11 = vmul.f32 1.6732632, %v2801_v6  ;;  %3486 = vpow2.f32 %v707_v7  ;;  %v651_v12 = vmin.f32 %v4068_v9, 0.0  ;;  %3091 = vmatprep.mubr.msk.bf16.mxu1 %vm3870_vm0, %v3869_v37  ;;  %vm841_vm6 = vcmp.gt.f32.partialorder %v4068_v9, 0.0 }
 0x189   :  { %v3481_v13 = vpop.eup %3480  ;;  %v563_v14 = vpop.f32.mrf.mxu0 }
 0x18a   :  { %v874_v15 = vsel %vm836_vm1, %v4035_v16, %v798_v11  ;;  %v2802_v60 = vadd.f32 -1.0, %v3481_v13  ;;  %v709_v18 = vmul.f32 1.442695, %v651_v12  ;;  %v4078_v17 = vadd.f32 %v3953_v0, %v563_v14 }
 0x18b   :  { %v912_v5 = vmul.f32 1.050701, %v874_v15  ;;  %v565_v21 = vpop.f32.mrf.mxu0 }
 0x18c   :  { %v799_v23 = vmul.f32 1.6732632, %v2802_v60  ;;  %3488 = vpow2.f32 %v709_v18  ;;  %v652_v24 = vmin.f32 %v4078_v17, 0.0  ;;  %vm842_vm7 = vcmp.gt.f32.partialorder %v4078_v17, 0.0 }
 0x18d   :  { %v3483_v25 = vpop.eup %3482  ;;  %v568_v26 = vpop.f32.mrf.mxu0  ;;  %v942_v27 = vpack.c.bf16 %v912_v5, %v911_v20 }
 0x18e   :  { %v2803_v28 = vadd.f32 -1.0, %v3483_v25  ;;  %v711_v30 = vmul.f32 1.442695, %v652_v24  ;;  %v4082_v31 = vadd.f32 %v3953_v0, %v568_v26  ;;  %v875_v22 = vsel %vm837_vm2, %v4040_v8, %v799_v23 }
 0x18f   :  { %v570_v16 = vpop.f32.mrf.mxu0  ;;  %3092 = vmatmul.mubr.bf16.gmra.mxu1 %v942_v27  ;;  %v913_v29 = vmul.f32 1.050701, %v875_v22 }
 0x190   :  { %v800_v33 = vmul.f32 1.6732632, %v2803_v28  ;;  %3490 = vpow2.f32 %v711_v30  ;;  %v653_v34 = vmin.f32 %v4082_v31, 0.0  ;;  %3095 = vmatprep.mubr.msk.bf16.mxu1 %vm3870_vm0, %v3869_v37  ;;  %vm843_vm8 = vcmp.gt.f32.partialorder %v4082_v31, 0.0 }
 0x191   :  { %v3485_v35 = vpop.eup %3484  ;;  %v571_v36 = vpop.f32.mrf.mxu0 }
 0x192   :  { %v876_v39 = vsel %vm838_vm3, %v4050_v40, %v800_v33  ;;  %v2804_v41 = vadd.f32 -1.0, %v3485_v35  ;;  %v713_v19 = vmul.f32 1.442695, %v653_v34  ;;  %v4092_v42 = vadd.f32 %v3953_v0, %v571_v36 }
 0x193   :  { %v914_v8 = vmul.f32 1.050701, %v876_v39  ;;  %v573_v43 = vpop.f32.mrf.mxu0 }
 0x194   :  { %v801_v45 = vmul.f32 1.6732632, %v2804_v41  ;;  %3492 = vpow2.f32 %v713_v19  ;;  %v654_v46 = vmin.f32 %v4092_v42, 0.0  ;;  %vm844_vm9 = vcmp.gt.f32.partialorder %v4092_v42, 0.0 }
 0x195   :  { %v3487_v47 = vpop.eup %3486  ;;  %v576_v49 = vpop.f32.mrf.mxu0  ;;  %v943_v50 = vpack.c.bf16 %v914_v8, %v913_v29 }
 0x196   :  { %v2805_v32 = vadd.f32 -1.0, %v3487_v47  ;;  %v715_v52 = vmul.f32 1.442695, %v654_v46  ;;  %v4096_v53 = vadd.f32 %v3953_v0, %v576_v49  ;;  %v877_v54 = vsel %vm839_vm4, %v4054_v51, %v801_v45 }
 0x197   :  { %v578_v40 = vpop.f32.mrf.mxu0  ;;  %3096 = vmatmul.mubr.bf16.gmra.mxu1 %v943_v50  ;;  %v915_v1 = vmul.f32 1.050701, %v877_v54 }
 0x198   :  { %v802_v55 = vmul.f32 1.6732632, %v2805_v32  ;;  %3494 = vpow2.f32 %v715_v52  ;;  %v655_v56 = vmin.f32 %v4096_v53, 0.0  ;;  %3099 = vmatprep.mubr.msk.bf16.mxu1 %vm3870_vm0, %v3869_v37  ;;  %vm845_vm10 = vcmp.gt.f32.partialorder %v4096_v53, 0.0 }
 0x199   :  { %v3489_v38 = vpop.eup %3488  ;;  %v579_v58 = vpop.f32.mrf.mxu0 }
 0x19a   :  { %v878_v59 = vsel %vm840_vm5, %v4064_v61, %v802_v55  ;;  %v2806_v62 = vadd.f32 -1.0, %v3489_v38  ;;  %v717_v44 = vmul.f32 1.442695, %v655_v56  ;;  %v4106_v63 = vadd.f32 %v3953_v0, %v579_v58 }
 0x19b   :  { %v916_v51 = vmul.f32 1.050701, %v878_v59  ;;  %v581_v2 = vpop.f32.mrf.mxu0 }
 0x19c   :  { %v803_v3 = vmul.f32 1.6732632, %v2806_v62  ;;  %3496 = vpow2.f32 %v717_v44  ;;  %v656_v48 = vmin.f32 %v4106_v63, 0.0  ;;  %vm846_vm11 = vcmp.gt.f32.partialorder %v4106_v63, 0.0 }
 0x19d   :  { %v3491_v4 = vpop.eup %3490  ;;  %v584_v6 = vpop.f32.mrf.mxu0  ;;  %v944_v7 = vpack.c.bf16 %v916_v51, %v915_v1 }
 0x19e   :  { %v2807_v57 = vadd.f32 -1.0, %v3491_v4  ;;  %v719_v10 = vmul.f32 1.442695, %v656_v48  ;;  %v4110_v11 = vadd.f32 %v3953_v0, %v584_v6  ;;  %v879_v12 = vsel %vm841_vm6, %v4068_v9, %v803_v3 }
 0x19f   :  { %v586_v61 = vpop.f32.mrf.mxu0  ;;  %3100 = vmatmul.mubr.bf16.gmra.mxu1 %v944_v7  ;;  %v917_v23 = vmul.f32 1.050701, %v879_v12  ;;  %v3439_v7 = vld [vmem:[#allocation7 + $0x40] sm:$0xff]  }
 0x1a0   :  { %v804_v13 = vmul.f32 1.6732632, %v2807_v57  ;;  %3498 = vpow2.f32 %v719_v10  ;;  %v657_v14 = vmin.f32 %v4110_v11, 0.0  ;;  %3103 = vmatprep.mubr.msk.bf16.mxu1 %vm3870_vm0, %v3869_v37  ;;  %3154 = vmatpush3.bf16.msra.mxu1 %v3439_v7  ;;  %vm847_vm12 = vcmp.gt.f32.partialorder %v4110_v11, 0.0 }
 0x1a1   :  { %v3493_v15 = vpop.eup %3492  ;;  %v587_v60 = vpop.f32.mrf.mxu0  ;;  %3323 = vmatprep.subr.bf16.mxu1 %v3869_v37 }
 0x1a2   :  { %v880_v18 = vsel %vm842_vm7, %v4078_v17, %v804_v13  ;;  %v2808_v20 = vadd.f32 -1.0, %v3493_v15  ;;  %v721_v5 = vmul.f32 1.442695, %v657_v14  ;;  %v4120_v21 = vadd.f32 %v3953_v0, %v587_v60 }
 0x1a3   :  { %v918_v9 = vmul.f32 1.050701, %v880_v18  ;;  %v589_v24 = vpop.f32.mrf.mxu0 }
 0x1a4   :  { %v805_v25 = vmul.f32 1.6732632, %v2808_v20  ;;  %3500 = vpow2.f32 %v721_v5  ;;  %v658_v26 = vmin.f32 %v4120_v21, 0.0  ;;  %vm848_vm13 = vcmp.gt.f32.partialorder %v4120_v21, 0.0 }
 0x1a5   :  { %v3495_v27 = vpop.eup %3494  ;;  %v592_v28 = vpop.f32.mrf.mxu0  ;;  %v945_v30 = vpack.c.bf16 %v918_v9, %v917_v23 }
 0x1a6   :  { %v2809_v16 = vadd.f32 -1.0, %v3495_v27  ;;  %v723_v22 = vmul.f32 1.442695, %v658_v26  ;;  %v4124_v33 = vadd.f32 %v3953_v0, %v592_v28  ;;  %v881_v34 = vsel %vm843_vm8, %v4082_v31, %v805_v25 }
 0x1a7   :  { %v594_v17 = vpop.f32.mrf.mxu0  ;;  %3104 = vmatmul.mubr.bf16.gmra.mxu1 %v945_v30  ;;  %v919_v45 = vmul.f32 1.050701, %v881_v34 }
 0x1a8   :  { %v806_v35 = vmul.f32 1.6732632, %v2809_v16  ;;  %3502 = vpow2.f32 %v723_v22  ;;  %v659_v36 = vmin.f32 %v4124_v33, 0.0  ;;  %3107 = vmatprep.mubr.msk.bf16.mxu1 %vm3870_vm0, %v3869_v37  ;;  %vm849_vm14 = vcmp.gt.f32.partialorder %v4124_v33, 0.0 }
 0x1a9   :  { %v3497_v39 = vpop.eup %3496  ;;  %v595_v41 = vpop.f32.mrf.mxu0 }
 0x1aa   :  { %v882_v19 = vsel %vm844_vm9, %v4092_v42, %v806_v35  ;;  %v2810_v29 = vadd.f32 -1.0, %v3497_v39  ;;  %v725_v8 = vmul.f32 1.442695, %v659_v36  ;;  %v4134_v43 = vadd.f32 %v3953_v0, %v595_v41 }
 0x1ab   :  { %v920_v31 = vmul.f32 1.050701, %v882_v19  ;;  %v597_v46 = vpop.f32.mrf.mxu0 }
 0x1ac   :  { %v807_v47 = vmul.f32 1.6732632, %v2810_v29  ;;  %3504 = vpow2.f32 %v725_v8  ;;  %v660_v49 = vmin.f32 %v4134_v43, 0.0  ;;  %vm850_vm15 = vcmp.gt.f32.partialorder %v4134_v43, 0.0 }
 0x1ad   :  { %v3499_v50 = vpop.eup %3498  ;;  %v600_v32 = vpop.f32.mrf.mxu0  ;;  %v946_v52 = vpack.c.bf16 %v920_v31, %v919_v45 }
 0x1ae   :  { %v2811_v40 = vadd.f32 -1.0, %v3499_v50  ;;  %v727_v54 = vmul.f32 1.442695, %v660_v49  ;;  %v4138_v55 = vadd.f32 %v3953_v0, %v600_v32  ;;  %v883_v56 = vsel %vm845_vm10, %v4096_v53, %v807_v47 }
 0x1af   :  { %v602_v42 = vpop.f32.mrf.mxu0  ;;  %3108 = vmatmul.mubr.bf16.gmra.mxu1 %v946_v52  ;;  %v921_v3 = vmul.f32 1.050701, %v883_v56 }
 0x1b0   :  { %v808_v38 = vmul.f32 1.6732632, %v2811_v40  ;;  %3506 = vpow2.f32 %v727_v54  ;;  %v661_v58 = vmin.f32 %v4138_v55, 0.0  ;;  %3111 = vmatprep.mubr.msk.bf16.mxu1 %vm3870_vm0, %v3869_v37  ;;  %vm851_vm1 = vcmp.gt.f32.partialorder %v4138_v55, 0.0 }
 0x1b1   :  { %v3501_v59 = vpop.eup %3500  ;;  %v603_v62 = vpop.f32.mrf.mxu0 }
 0x1b2   :  { %v884_v44 = vsel %vm846_vm11, %v4106_v63, %v808_v38  ;;  %v2812_v1 = vadd.f32 -1.0, %v3501_v59  ;;  %v729_v51 = vmul.f32 1.442695, %v661_v58  ;;  %v4148_v2 = vadd.f32 %v3953_v0, %v603_v62 }
 0x1b3   :  { %v922_v53 = vmul.f32 1.050701, %v884_v44  ;;  %v605_v48 = vpop.f32.mrf.mxu0 }
 0x1b4   :  { %v809_v4 = vmul.f32 1.6732632, %v2812_v1  ;;  %3508 = vpow2.f32 %v729_v51  ;;  %v662_v6 = vmin.f32 %v4148_v2, 0.0  ;;  %vm852_vm2 = vcmp.gt.f32.partialorder %v4148_v2, 0.0 }
 0x1b5   :  { %v3503_v57 = vpop.eup %3502  ;;  %v608_v10 = vpop.f32.mrf.mxu0  ;;  %v947_v61 = vpack.c.bf16 %v922_v53, %v921_v3 }
 0x1b6   :  { %v2813_v12 = vadd.f32 -1.0, %v3503_v57  ;;  %v731_v13 = vmul.f32 1.442695, %v662_v6  ;;  %v4152_v63 = vadd.f32 %v3953_v0, %v608_v10  ;;  %v885_v15 = vsel %vm847_vm12, %v4110_v11, %v809_v4 }
 0x1b7   :  { %v610_v14 = vpop.f32.mrf.mxu0  ;;  %3112 = vmatmul.mubr.bf16.gmra.mxu1 %v947_v61  ;;  %v923_v26 = vmul.f32 1.050701, %v885_v15 }
 0x1b8   :  { %v810_v60 = vmul.f32 1.6732632, %v2813_v12  ;;  %3510 = vpow2.f32 %v731_v13  ;;  %v663_v18 = vmin.f32 %v4152_v63, 0.0  ;;  %3115 = vmatprep.mubr.msk.bf16.mxu1 %vm3870_vm0, %v3869_v37  ;;  %vm853_vm3 = vcmp.gt.f32.partialorder %v4152_v63, 0.0 }
 0x1b9   :  { %v3505_v20 = vpop.eup %3504  ;;  %v611_v5 = vpop.f32.mrf.mxu0 }
 0x1ba   :  { %v886_v23 = vsel %vm848_vm13, %v4120_v21, %v810_v60  ;;  %v2814_v9 = vadd.f32 -1.0, %v3505_v20  ;;  %v733_v24 = vmul.f32 1.442695, %v663_v18  ;;  %v4163_v25 = vadd.f32 %v3953_v0, %v611_v5 }
 0x1bb   :  { %v924_v11 = vmul.f32 1.050701, %v886_v23  ;;  %v613_v27 = vpop.f32.mrf.mxu0 }
 0x1bc   :  { %v811_v28 = vmul.f32 1.6732632, %v2814_v9  ;;  %3512 = vpow2.f32 %v733_v24  ;;  %v664_v30 = vmin.f32 %v4163_v25, 0.0  ;;  %vm854_vm4 = vcmp.gt.f32.partialorder %v4163_v25, 0.0 }
 0x1bd   :  { %v3507_v16 = vpop.eup %3506  ;;  %v616_v22 = vpop.f32.mrf.mxu0  ;;  %v948_v17 = vpack.c.bf16 %v924_v11, %v923_v26 }
 0x1be   :  { %v2815_v34 = vadd.f32 -1.0, %v3507_v16  ;;  %v735_v35 = vmul.f32 1.442695, %v664_v30  ;;  %v4167_v36 = vadd.f32 %v3953_v0, %v616_v22  ;;  %v887_v39 = vsel %vm849_vm14, %v4124_v33, %v811_v28 }
 0x1bf   :  { %v618_v21 = vpop.f32.mrf.mxu0  ;;  %3116 = vmatmul.mubr.bf16.gmra.mxu1 %v948_v17  ;;  %v925_v49 = vmul.f32 1.050701, %v887_v39 }
 0x1c0   :  { %v812_v41 = vmul.f32 1.6732632, %v2815_v34  ;;  %3514 = vpow2.f32 %v735_v35  ;;  %v665_v19 = vmin.f32 %v4167_v36, 0.0  ;;  %3119 = vmatprep.mubr.msk.bf16.mxu1 %vm3870_vm0, %v3869_v37  ;;  %vm855_vm5 = vcmp.gt.f32.partialorder %v4167_v36, 0.0 }
 0x1c1   :  { %v3509_v29 = vpop.eup %3508  ;;  %v619_v8 = vpop.f32.mrf.mxu0 }
 0x1c2   :  { %v888_v45 = vsel %vm850_vm15, %v4134_v43, %v812_v41  ;;  %v2816_v31 = vadd.f32 -1.0, %v3509_v29  ;;  %v737_v46 = vmul.f32 1.442695, %v665_v19  ;;  %v620_v47 = vadd.f32 %v3953_v0, %v619_v8  ;;  %v4202_v8 = vld [vmem:[%s4894_s4] ss:$0 sm:$0xff] }
 0x1c3   :  { %v926_v50 = vmul.f32 1.050701, %v888_v45  ;;  %v621_v33 = vpop.f32.mrf.mxu0 }
 0x1c4   :  { %v813_v32 = vmul.f32 1.6732632, %v2816_v31  ;;  %3516 = vpow2.f32 %v737_v46  ;;  %v666_v52 = vmin.f32 %v620_v47, 0.0  ;;  %vm856_vm6 = vcmp.gt.f32.partialorder %v620_v47, 0.0 }
 0x1c5   :  { %v3511_v40 = vpop.eup %3510  ;;  %v624_v54 = vpop.f32.mrf.mxu0  ;;  %v949_v42 = vpack.c.bf16 %v926_v50, %v925_v49 }
 0x1c6   :  { %v2817_v56 = vadd.f32 -1.0, %v3511_v40  ;;  %v739_v38 = vmul.f32 1.442695, %v666_v52  ;;  %v625_v58 = vadd.f32 %v3953_v0, %v624_v54  ;;  %v889_v59 = vsel %vm851_vm1, %v4138_v55, %v813_v32 }
 0x1c7   :  { %v626_v43 = vpop.f32.mrf.mxu0  ;;  %3120 = vmatmul.mubr.bf16.gmra.mxu1 %v949_v42  ;;  %v927_v6 = vmul.f32 1.050701, %v889_v59 }
 0x1c8   :  { %v814_v62 = vmul.f32 1.6732632, %v2817_v56  ;;  %3518 = vpow2.f32 %v739_v38  ;;  %v667_v44 = vmin.f32 %v625_v58, 0.0  ;;  %3123 = vmatprep.mubr.msk.bf16.mxu1 %vm3870_vm0, %v3869_v37  ;;  %vm857_vm7 = vcmp.gt.f32.partialorder %v625_v58, 0.0 }
 0x1c9   :  { %v3513_v1 = vpop.eup %3512  ;;  %v627_v51 = vpop.f32.mrf.mxu0 }
 0x1ca   :  { %v890_v3 = vsel %vm852_vm2, %v4148_v2, %v814_v62  ;;  %v2818_v53 = vadd.f32 -1.0, %v3513_v1  ;;  %v741_v48 = vmul.f32 1.442695, %v667_v44  ;;  %v628_v4 = vadd.f32 %v3953_v0, %v627_v51 }
 0x1cb   :  { %v928_v7 = vmul.f32 1.050701, %v890_v3  ;;  %v629_v57 = vpop.f32.mrf.mxu0 }
 0x1cc   :  { %v815_v55 = vmul.f32 1.6732632, %v2818_v53  ;;  %3520 = vpow2.f32 %v741_v48  ;;  %v668_v10 = vmin.f32 %v628_v4, 0.0  ;;  %vm858_vm8 = vcmp.gt.f32.partialorder %v628_v4, 0.0 }
 0x1cd   :  { %v3515_v61 = vpop.eup %3514  ;;  %v950_v12 = vpack.c.bf16 %v928_v7, %v927_v6 }
 0x1ce   :  { %v2819_v13 = vadd.f32 -1.0, %v3515_v61  ;;  %v743_v14 = vmul.f32 1.442695, %v668_v10  ;;  %v891_v15 = vsel %vm853_vm3, %v4152_v63, %v815_v55 }
 0x1cf   :  { %3124 = vmatmul.mubr.bf16.gmra.mxu1 %v950_v12  ;;  %v929_v20 = vmul.f32 1.050701, %v891_v15  ;;  %v3440_v15 = vld [vmem:[#allocation8 + $0x38] sm:$0xff]  }
 0x1d0   :  { %v816_v2 = vmul.f32 1.6732632, %v2819_v13  ;;  %3522 = vpow2.f32 %v743_v14  ;;  %3127 = vmatprep.mubr.msk.bf16.mxu1 %vm3870_vm0, %v3869_v37  ;;  %3232 = vmatpush3.bf16.msra.mxu0 %v3440_v15 }
 0x1d1   :  { %v3517_v0 = vpop.eup %3516  ;;  %3233 = vmatprep.subr.bf16.mxu0 %v3869_v37 }
 0x1d2   :  { %v892_v60 = vsel %vm854_vm4, %v4163_v25, %v816_v2  ;;  %v2820_v18 = vadd.f32 -1.0, %v3517_v0 }
 0x1d3   :  { %v930_v5 = vmul.f32 1.050701, %v892_v60 }
 0x1d4   :  { %v817_v23 = vmul.f32 1.6732632, %v2820_v18 }
 0x1d5   :  { %v3519_v9 = vpop.eup %3518  ;;  %v951_v24 = vpack.c.bf16 %v930_v5, %v929_v20 }
 0x1d6   :  { %v2821_v26 = vadd.f32 -1.0, %v3519_v9  ;;  %v893_v63 = vsel %vm855_vm5, %v4167_v36, %v817_v23 }
 0x1d7   :  { %3128 = vmatmul.mubr.bf16.gmra.mxu1 %v951_v24  ;;  %v931_v30 = vmul.f32 1.050701, %v893_v63 }
 0x1d8   :  { %v818_v11 = vmul.f32 1.6732632, %v2821_v26  ;;  %3131 = vmatprep.mubr.msk.bf16.mxu1 %vm3870_vm0, %v3869_v37 }
 0x1d9   :  { %v3521_v27 = vpop.eup %3520 }
 0x1da   :  { %v894_v28 = vsel %vm856_vm6, %v620_v47, %v818_v11  ;;  %v2822_v25 = vadd.f32 -1.0, %v3521_v27 }
 0x1db   :  { %v932_v16 = vmul.f32 1.050701, %v894_v28 }
 0x1dc   :  { %v819_v22 = vmul.f32 1.6732632, %v2822_v25 }
 0x1dd   :  { %v3523_v17 = vpop.eup %3522  ;;  %v952_v34 = vpack.c.bf16 %v932_v16, %v931_v30 }
 0x1de   :  { %v2823_v35 = vadd.f32 -1.0, %v3523_v17  ;;  %v895_v21 = vsel %vm857_vm7, %v625_v58, %v819_v22 }
 0x1df   :  { %3132 = vmatmul.mubr.bf16.gmra.mxu1 %v952_v34  ;;  %v933_v41 = vmul.f32 1.050701, %v895_v21 }
 0x1e0   :  { %v820_v39 = vmul.f32 1.6732632, %v2823_v35  ;;  %3135 = vmatprep.mubr.msk.bf16.mxu1 %vm3870_vm0, %v3869_v37 }
 0x1e2   :  { %v896_v36 = vsel %vm858_vm8, %v628_v4, %v820_v39 }
 0x1e3   :  { %v934_v19 = vmul.f32 1.050701, %v896_v36 }
 0x1e5   :  { %v953_v29 = vpack.c.bf16 %v934_v19, %v933_v41 }
 0x1e7   :  { %3136 = vmatmul.mubr.bf16.gmra.mxu1 %v953_v29 }
 0x1e8   :  { %3155 = vmatprep.mubr.msk.bf16.mxu1 %vm3870_vm0, %v3869_v37 }
 0x217   :  { %v1059_v45 = vpop.f32.mrf.mxu1 }
 0x218   :  { %v1060_v31 = vadd.f32 %v4202_v8, %v1059_v45 }
 0x219   :  { %v3065_v46 = vpop.f32.mrf.mxu1 }
 0x21a   :  { %v1210_v47 = vmin.f32 %v1060_v31, 0.0  ;;  %vm1400_vm9 = vcmp.gt.f32.partialorder %v1060_v31, 0.0 }
 0x21b   :  { %v1062_v49 = vpop.f32.mrf.mxu1 }
 0x21c   :  { %v1248_v50 = vmul.f32 1.442695, %v1210_v47  ;;  %v1063_v33 = vadd.f32 %v4202_v8, %v1062_v49 }
 0x21d   :  { %v3066_v32 = vpop.f32.mrf.mxu1 }
 0x21e   :  { %3524 = vpow2.f32 %v1248_v50  ;;  %v1211_v52 = vmin.f32 %v1063_v33, 0.0  ;;  %vm1401_vm10 = vcmp.gt.f32.partialorder %v1063_v33, 0.0 }
 0x21f   :  { %v1067_v40 = vpop.f32.mrf.mxu1 }
 0x220   :  { %v1250_v54 = vmul.f32 1.442695, %v1211_v52  ;;  %v1068_v42 = vadd.f32 %v4202_v8, %v1067_v40 }
 0x221   :  { %v3069_v56 = vpop.f32.mrf.mxu1 }
 0x222   :  { %3526 = vpow2.f32 %v1250_v54  ;;  %v1212_v38 = vmin.f32 %v1068_v42, 0.0  ;;  %vm1402_vm11 = vcmp.gt.f32.partialorder %v1068_v42, 0.0 }
 0x223   :  { %v1070_v58 = vpop.f32.mrf.mxu1 }
 0x224   :  { %v1252_v43 = vmul.f32 1.442695, %v1212_v38  ;;  %v4208_v59 = vadd.f32 %v4202_v8, %v1070_v58 }
 0x225   :  { %v3070_v62 = vpop.f32.mrf.mxu1 }
 0x226   :  { %3528 = vpow2.f32 %v1252_v43  ;;  %v1213_v44 = vmin.f32 %v4208_v59, 0.0  ;;  %vm1403_vm12 = vcmp.gt.f32.partialorder %v4208_v59, 0.0  ;;  %v3441_v43 = vld [vmem:[#allocation8 + $0x30] sm:$0xff]  }
 0x227   :  { %v1075_v1 = vpop.f32.mrf.mxu1  ;;  %3234 = vmatpush3.bf16.msra.mxu0 %v3441_v43 }
 0x228   :  { %v1254_v51 = vmul.f32 1.442695, %v1213_v44  ;;  %v4212_v3 = vadd.f32 %v4202_v8, %v1075_v1  ;;  %3235 = vmatprep.subr.bf16.mxu0 %v3869_v37 }
 0x229   :  { %v3073_v53 = vpop.f32.mrf.mxu1 }
 0x22a   :  { %3530 = vpow2.f32 %v1254_v51  ;;  %v1214_v48 = vmin.f32 %v4212_v3, 0.0  ;;  %vm1404_vm13 = vcmp.gt.f32.partialorder %v4212_v3, 0.0 }
 0x22b   :  { %v3525_v4 = vpop.eup %3524  ;;  %v1078_v6 = vpop.f32.mrf.mxu1 }
 0x22c   :  { %v2833_v7 = vadd.f32 -1.0, %v3525_v4  ;;  %v1256_v57 = vmul.f32 1.442695, %v1214_v48  ;;  %v4216_v55 = vadd.f32 %v4202_v8, %v1078_v6 }
 0x22d   :  { %v3074_v10 = vpop.f32.mrf.mxu1 }
 0x22e   :  { %v1362_v61 = vmul.f32 1.6732632, %v2833_v7  ;;  %3532 = vpow2.f32 %v1256_v57  ;;  %v1215_v12 = vmin.f32 %v4216_v55, 0.0  ;;  %vm1405_vm14 = vcmp.gt.f32.partialorder %v4216_v55, 0.0 }
 0x22f   :  { %v3527_v13 = vpop.eup %3526  ;;  %v1083_v14 = vpop.f32.mrf.mxu1 }
 0x230   :  { %v2834_v2 = vadd.f32 -1.0, %v3527_v13  ;;  %v1258_v0 = vmul.f32 1.442695, %v1215_v12  ;;  %v4220_v60 = vadd.f32 %v4202_v8, %v1083_v14  ;;  %v1438_v20 = vsel %vm1400_vm9, %v1060_v31, %v1362_v61 }
 0x231   :  { %v3077_v18 = vpop.f32.mrf.mxu1  ;;  %v1476_v28 = vmul.f32 1.050701, %v1438_v20  ;;  %v3442_v20 = vld [vmem:[#allocation8 + $0x28] sm:$0xff]  }
 0x232   :  { %v1363_v5 = vmul.f32 1.6732632, %v2834_v2  ;;  %3534 = vpow2.f32 %v1258_v0  ;;  %v1216_v23 = vmin.f32 %v4220_v60, 0.0  ;;  %vm1406_vm15 = vcmp.gt.f32.partialorder %v4220_v60, 0.0  ;;  %3236 = vmatpush3.bf16.msra.mxu0 %v3442_v20 }
 0x233   :  { %v3529_v9 = vpop.eup %3528  ;;  %v1086_v24 = vpop.f32.mrf.mxu1  ;;  %3237 = vmatprep.subr.bf16.mxu0 %v3869_v37 }
 0x234   :  { %v1439_v26 = vsel %vm1401_vm10, %v1063_v33, %v1363_v5  ;;  %v2835_v63 = vadd.f32 -1.0, %v3529_v9  ;;  %v1260_v11 = vmul.f32 1.442695, %v1216_v23  ;;  %v4225_v27 = vadd.f32 %v4202_v8, %v1086_v24  ;;  %v3443_v24 = vld [vmem:[#allocation8 + $0x20] sm:$0xff]  }
 0x235   :  { %v1477_v25 = vmul.f32 1.050701, %v1439_v26  ;;  %v3078_v30 = vpop.f32.mrf.mxu1 }
 0x236   :  { %v1364_v16 = vmul.f32 1.6732632, %v2835_v63  ;;  %3536 = vpow2.f32 %v1260_v11  ;;  %v1217_v22 = vmin.f32 %v4225_v27, 0.0  ;;  %vm1407_vm1 = vcmp.gt.f32.partialorder %v4225_v27, 0.0  ;;  %3238 = vmatpush3.bf16.msra.mxu0 %v3443_v24 }
 0x237   :  { %v3531_v17 = vpop.eup %3530  ;;  %v1514_v34 = vpack.c.bf16 %v1477_v25, %v1476_v28  ;;  %v1091_v35 = vpop.f32.mrf.mxu1  ;;  %3239 = vmatprep.subr.bf16.mxu0 %v3869_v37 }
 0x238   :  { %v2836_v21 = vadd.f32 -1.0, %v3531_v17  ;;  %v1262_v39 = vmul.f32 1.442695, %v1217_v22  ;;  %v4229_v36 = vadd.f32 %v4202_v8, %v1091_v35  ;;  %v1440_v19 = vsel %vm1402_vm11, %v1068_v42, %v1364_v16 }
 0x239   :  { %v3081_v41 = vpop.f32.mrf.mxu1  ;;  %3156 = vmatmul.mubr.bf16.vlgmr.msra.gmra.mxu1 %v1514_v34  ;;  %v1478_v32 = vmul.f32 1.050701, %v1440_v19 }
 0x23a   :  { %v1365_v29 = vmul.f32 1.6732632, %v2836_v21  ;;  %3538 = vpow2.f32 %v1262_v39  ;;  %v1218_v45 = vmin.f32 %v4229_v36, 0.0  ;;  %3159 = vmatprep.mubr.msk.bf16.mxu1 %vm3870_vm0, %v3869_v37  ;;  %3331 = vmatpush3.bf16.msra.mxu1 %v3440_v15  ;;  %v3444_v21 = vld [vmem:[#allocation8 + $0x18] sm:$0xff]   ;;  %vm1408_vm2 = vcmp.gt.f32.partialorder %v4229_v36, 0.0 }
 0x23b   :  { %v3533_v31 = vpop.eup %3532  ;;  %v1094_v46 = vpop.f32.mrf.mxu1  ;;  %3324 = vmatprep.subr.bf16.mxu1 %v3869_v37  ;;  %3240 = vmatpush3.bf16.msra.mxu0 %v3444_v21 }
 0x23c   :  { %v1441_v47 = vsel %vm1403_vm12, %v4208_v59, %v1365_v29  ;;  %v2837_v49 = vadd.f32 -1.0, %v3533_v31  ;;  %v1264_v50 = vmul.f32 1.442695, %v1218_v45  ;;  %v4238_v33 = vadd.f32 %v4202_v8, %v1094_v46  ;;  %3241 = vmatprep.subr.bf16.mxu0 %v3869_v37 }
 0x23d   :  { %v1479_v52 = vmul.f32 1.050701, %v1441_v47  ;;  %v3082_v40 = vpop.f32.mrf.mxu1 }
 0x23e   :  { %v1366_v54 = vmul.f32 1.6732632, %v2837_v49  ;;  %3540 = vpow2.f32 %v1264_v50  ;;  %v1219_v42 = vmin.f32 %v4238_v33, 0.0  ;;  %3332 = vmatpush3.bf16.msra.mxu1 %v3441_v43  ;;  %v3445_v49 = vld [vmem:[#allocation8 + $0x10] sm:$0xff]   ;;  %vm1409_vm3 = vcmp.gt.f32.partialorder %v4238_v33, 0.0 }
 0x23f   :  { %v3535_v56 = vpop.eup %3534  ;;  %v1099_v38 = vpop.f32.mrf.mxu1  ;;  %v1515_v58 = vpack.c.bf16 %v1479_v52, %v1478_v32  ;;  %3325 = vmatprep.subr.bf16.mxu1 %v3869_v37  ;;  %3242 = vmatpush3.bf16.msra.mxu0 %v3445_v49 }
 0x240   :  { %v2838_v62 = vadd.f32 -1.0, %v3535_v56  ;;  %v1266_v44 = vmul.f32 1.442695, %v1219_v42  ;;  %v4242_v59 = vadd.f32 %v4202_v8, %v1099_v38  ;;  %v1442_v51 = vsel %vm1404_vm13, %v4212_v3, %v1366_v54  ;;  %3243 = vmatprep.subr.bf16.mxu0 %v3869_v37 }
 0x241   :  { %v3085_v1 = vpop.f32.mrf.mxu1  ;;  %3160 = vmatmul.mubr.bf16.gmra.mxu1 %v1515_v58  ;;  %v1480_v61 = vmul.f32 1.050701, %v1442_v51 }
 0x242   :  { %v1367_v53 = vmul.f32 1.6732632, %v2838_v62  ;;  %3542 = vpow2.f32 %v1266_v44  ;;  %v1220_v48 = vmin.f32 %v4242_v59, 0.0  ;;  %3163 = vmatprep.mubr.msk.bf16.mxu1 %vm3870_vm0, %v3869_v37  ;;  %3333 = vmatpush3.bf16.msra.mxu1 %v3442_v20  ;;  %vm1410_vm4 = vcmp.gt.f32.partialorder %v4242_v59, 0.0 }
 0x243   :  { %v3537_v4 = vpop.eup %3536  ;;  %v1102_v6 = vpop.f32.mrf.mxu1  ;;  %3326 = vmatprep.subr.bf16.mxu1 %v3869_v37 }
 0x244   :  { %v1443_v7 = vsel %vm1405_vm14, %v4216_v55, %v1367_v53  ;;  %v2839_v57 = vadd.f32 -1.0, %v3537_v4  ;;  %v1268_v10 = vmul.f32 1.442695, %v1220_v48  ;;  %v4253_v3 = vadd.f32 %v4202_v8, %v1102_v6 }
 0x245   :  { %v1481_v12 = vmul.f32 1.050701, %v1443_v7  ;;  %v3086_v13 = vpop.f32.mrf.mxu1 }
 0x246   :  { %v1368_v14 = vmul.f32 1.6732632, %v2839_v57  ;;  %3544 = vpow2.f32 %v1268_v10  ;;  %v1221_v15 = vmin.f32 %v4253_v3, 0.0  ;;  %3334 = vmatpush3.bf16.msra.mxu1 %v3443_v24  ;;  %vm1411_vm5 = vcmp.gt.f32.partialorder %v4253_v3, 0.0 }
 0x247   :  { %v3539_v2 = vpop.eup %3538  ;;  %v1107_v0 = vpop.f32.mrf.mxu1  ;;  %v1516_v18 = vpack.c.bf16 %v1481_v12, %v1480_v61  ;;  %3327 = vmatprep.subr.bf16.mxu1 %v3869_v37 }
 0x248   :  { %v2840_v5 = vadd.f32 -1.0, %v3539_v2  ;;  %v1270_v55 = vmul.f32 1.442695, %v1221_v15  ;;  %v4258_v23 = vadd.f32 %v4202_v8, %v1107_v0  ;;  %v1444_v26 = vsel %vm1406_vm15, %v4220_v60, %v1368_v14 }
 0x249   :  { %v3089_v9 = vpop.f32.mrf.mxu1  ;;  %3164 = vmatmul.mubr.bf16.gmra.mxu1 %v1516_v18  ;;  %v1482_v17 = vmul.f32 1.050701, %v1444_v26 }
 0x24a   :  { %v1369_v63 = vmul.f32 1.6732632, %v2840_v5  ;;  %3546 = vpow2.f32 %v1270_v55  ;;  %v1222_v11 = vmin.f32 %v4258_v23, 0.0  ;;  %3167 = vmatprep.mubr.msk.bf16.mxu1 %vm3870_vm0, %v3869_v37  ;;  %3335 = vmatpush3.bf16.msra.mxu1 %v3444_v21  ;;  %vm1412_vm6 = vcmp.gt.f32.partialorder %v4258_v23, 0.0 }
 0x24b   :  { %v3541_v28 = vpop.eup %3540  ;;  %v1110_v25 = vpop.f32.mrf.mxu1  ;;  %3328 = vmatprep.subr.bf16.mxu1 %v3869_v37 }
 0x24c   :  { %v1445_v30 = vsel %vm1407_vm1, %v4225_v27, %v1369_v63  ;;  %v2841_v16 = vadd.f32 -1.0, %v3541_v28  ;;  %v1272_v22 = vmul.f32 1.442695, %v1222_v11  ;;  %v4269_v60 = vadd.f32 %v4202_v8, %v1110_v25 }
 0x24d   :  { %v1483_v34 = vmul.f32 1.050701, %v1445_v30  ;;  %v3090_v35 = vpop.f32.mrf.mxu1 }
 0x24e   :  { %v1370_v39 = vmul.f32 1.6732632, %v2841_v16  ;;  %3548 = vpow2.f32 %v1272_v22  ;;  %v1223_v41 = vmin.f32 %v4269_v60, 0.0  ;;  %3336 = vmatpush3.bf16.msra.mxu1 %v3445_v49  ;;  %vm1413_vm7 = vcmp.gt.f32.partialorder %v4269_v60, 0.0 }
 0x24f   :  { %v3543_v19 = vpop.eup %3542  ;;  %v1115_v27 = vpop.f32.mrf.mxu1  ;;  %v1517_v29 = vpack.c.bf16 %v1483_v34, %v1482_v17  ;;  %3329 = vmatprep.subr.bf16.mxu1 %v3869_v37 }
 0x250   :  { %v2842_v45 = vadd.f32 -1.0, %v3543_v19  ;;  %v1274_v31 = vmul.f32 1.442695, %v1223_v41  ;;  %v4275_v46 = vadd.f32 %v4202_v8, %v1115_v27  ;;  %v1446_v50 = vsel %vm1408_vm2, %v4229_v36, %v1370_v39 }
 0x251   :  { %v3093_v47 = vpop.f32.mrf.mxu1  ;;  %3168 = vmatmul.mubr.bf16.gmra.mxu1 %v1517_v29  ;;  %v1484_v58 = vmul.f32 1.050701, %v1446_v50 }
 0x252   :  { %v1371_v32 = vmul.f32 1.6732632, %v2842_v45  ;;  %3550 = vpow2.f32 %v1274_v31  ;;  %v1224_v52 = vmin.f32 %v4275_v46, 0.0  ;;  %3171 = vmatprep.mubr.msk.bf16.mxu1 %vm3870_vm0, %v3869_v37  ;;  %vm1414_vm8 = vcmp.gt.f32.partialorder %v4275_v46, 0.0 }
 0x253   :  { %v3545_v40 = vpop.eup %3544  ;;  %v1118_v54 = vpop.f32.mrf.mxu1 }
 0x254   :  { %v1447_v42 = vsel %vm1409_vm3, %v4238_v33, %v1371_v32  ;;  %v2843_v56 = vadd.f32 -1.0, %v3545_v40  ;;  %v1276_v38 = vmul.f32 1.442695, %v1224_v52  ;;  %v4287_v36 = vadd.f32 %v4202_v8, %v1118_v54 }
 0x255   :  { %v1485_v43 = vmul.f32 1.050701, %v1447_v42  ;;  %v3094_v62 = vpop.f32.mrf.mxu1 }
 0x256   :  { %v1372_v44 = vmul.f32 1.6732632, %v2843_v56  ;;  %3552 = vpow2.f32 %v1276_v38  ;;  %v1225_v1 = vmin.f32 %v4287_v36, 0.0  ;;  %vm1415_vm9 = vcmp.gt.f32.partialorder %v4287_v36, 0.0 }
 0x257   :  { %v3547_v51 = vpop.eup %3546  ;;  %v1123_v53 = vpop.f32.mrf.mxu1  ;;  %v1518_v33 = vpack.c.bf16 %v1485_v43, %v1484_v58 }
 0x258   :  { %v2844_v48 = vadd.f32 -1.0, %v3547_v51  ;;  %v1278_v4 = vmul.f32 1.442695, %v1225_v1  ;;  %v4293_v6 = vadd.f32 %v4202_v8, %v1123_v53  ;;  %v1448_v57 = vsel %vm1410_vm4, %v4242_v59, %v1372_v44 }
 0x259   :  { %v3097_v7 = vpop.f32.mrf.mxu1  ;;  %3172 = vmatmul.mubr.bf16.gmra.mxu1 %v1518_v33  ;;  %v1486_v18 = vmul.f32 1.050701, %v1448_v57 }
 0x25a   :  { %v1373_v10 = vmul.f32 1.6732632, %v2844_v48  ;;  %3554 = vpow2.f32 %v1278_v4  ;;  %v1226_v61 = vmin.f32 %v4293_v6, 0.0  ;;  %3175 = vmatprep.mubr.msk.bf16.mxu1 %vm3870_vm0, %v3869_v37  ;;  %vm1416_vm10 = vcmp.gt.f32.partialorder %v4293_v6, 0.0 }
 0x25b   :  { %v3549_v12 = vpop.eup %3548  ;;  %v1126_v13 = vpop.f32.mrf.mxu1 }
 0x25c   :  { %v1449_v14 = vsel %vm1411_vm5, %v4253_v3, %v1373_v10  ;;  %v2845_v15 = vadd.f32 -1.0, %v3549_v12  ;;  %v1280_v2 = vmul.f32 1.442695, %v1226_v61  ;;  %v4304_v0 = vadd.f32 %v4202_v8, %v1126_v13 }
 0x25d   :  { %v1487_v59 = vmul.f32 1.050701, %v1449_v14  ;;  %v3098_v20 = vpop.f32.mrf.mxu1 }
 0x25e   :  { %v1374_v5 = vmul.f32 1.6732632, %v2845_v15  ;;  %3556 = vpow2.f32 %v1280_v2  ;;  %v1227_v55 = vmin.f32 %v4304_v0, 0.0  ;;  %vm1417_vm11 = vcmp.gt.f32.partialorder %v4304_v0, 0.0 }
 0x25f   :  { %v3551_v9 = vpop.eup %3550  ;;  %v1131_v24 = vpop.f32.mrf.mxu1  ;;  %v1519_v26 = vpack.c.bf16 %v1487_v59, %v1486_v18 }
 0x260   :  { %v2846_v63 = vadd.f32 -1.0, %v3551_v9  ;;  %v1282_v11 = vmul.f32 1.442695, %v1227_v55  ;;  %v4308_v28 = vadd.f32 %v4202_v8, %v1131_v24  ;;  %v1450_v25 = vsel %vm1412_vm6, %v4258_v23, %v1374_v5 }
 0x261   :  { %v3101_v3 = vpop.f32.mrf.mxu1  ;;  %3176 = vmatmul.mubr.bf16.gmra.mxu1 %v1519_v26  ;;  %v1488_v41 = vmul.f32 1.050701, %v1450_v25 }
 0x262   :  { %v1375_v30 = vmul.f32 1.6732632, %v2846_v63  ;;  %3558 = vpow2.f32 %v1282_v11  ;;  %v1228_v16 = vmin.f32 %v4308_v28, 0.0  ;;  %3179 = vmatprep.mubr.msk.bf16.mxu1 %vm3870_vm0, %v3869_v37  ;;  %vm1418_vm12 = vcmp.gt.f32.partialorder %v4308_v28, 0.0 }
 0x263   :  { %v3553_v22 = vpop.eup %3552  ;;  %v1134_v17 = vpop.f32.mrf.mxu1 }
 0x264   :  { %v1451_v34 = vsel %vm1413_vm7, %v4269_v60, %v1375_v30  ;;  %v2847_v35 = vadd.f32 -1.0, %v3553_v22  ;;  %v1284_v21 = vmul.f32 1.442695, %v1228_v16  ;;  %v4318_v39 = vadd.f32 %v4202_v8, %v1134_v17 }
 0x265   :  { %v1489_v23 = vmul.f32 1.050701, %v1451_v34  ;;  %v3102_v19 = vpop.f32.mrf.mxu1 }
 0x266   :  { %v1376_v27 = vmul.f32 1.6732632, %v2847_v35  ;;  %3560 = vpow2.f32 %v1284_v21  ;;  %v1229_v29 = vmin.f32 %v4318_v39, 0.0  ;;  %vm1419_vm13 = vcmp.gt.f32.partialorder %v4318_v39, 0.0 }
 0x267   :  { %v3555_v45 = vpop.eup %3554  ;;  %v1139_v31 = vpop.f32.mrf.mxu1  ;;  %v1520_v47 = vpack.c.bf16 %v1489_v23, %v1488_v41 }
 0x268   :  { %v2848_v49 = vadd.f32 -1.0, %v3555_v45  ;;  %v1286_v50 = vmul.f32 1.442695, %v1229_v29  ;;  %v4322_v32 = vadd.f32 %v4202_v8, %v1139_v31  ;;  %v1452_v52 = vsel %vm1414_vm8, %v4275_v46, %v1376_v27 }
 0x269   :  { %v3105_v60 = vpop.f32.mrf.mxu1  ;;  %3180 = vmatmul.mubr.bf16.gmra.mxu1 %v1520_v47  ;;  %v1490_v44 = vmul.f32 1.050701, %v1452_v52 }
 0x26a   :  { %v1377_v40 = vmul.f32 1.6732632, %v2848_v49  ;;  %3562 = vpow2.f32 %v1286_v50  ;;  %v1230_v54 = vmin.f32 %v4322_v32, 0.0  ;;  %3183 = vmatprep.mubr.msk.bf16.mxu1 %vm3870_vm0, %v3869_v37  ;;  %vm1420_vm14 = vcmp.gt.f32.partialorder %v4322_v32, 0.0 }
 0x26b   :  { %v3557_v42 = vpop.eup %3556  ;;  %v1142_v56 = vpop.f32.mrf.mxu1 }
 0x26c   :  { %v1453_v38 = vsel %vm1415_vm9, %v4287_v36, %v1377_v40  ;;  %v2849_v58 = vadd.f32 -1.0, %v3557_v42  ;;  %v1288_v43 = vmul.f32 1.442695, %v1230_v54  ;;  %v4332_v62 = vadd.f32 %v4202_v8, %v1142_v56 }
 0x26d   :  { %v1491_v46 = vmul.f32 1.050701, %v1453_v38  ;;  %v3106_v1 = vpop.f32.mrf.mxu1 }
 0x26e   :  { %v1378_v51 = vmul.f32 1.6732632, %v2849_v58  ;;  %3564 = vpow2.f32 %v1288_v43  ;;  %v1231_v53 = vmin.f32 %v4332_v62, 0.0  ;;  %vm1421_vm15 = vcmp.gt.f32.partialorder %v4332_v62, 0.0 }
 0x26f   :  { %v3559_v33 = vpop.eup %3558  ;;  %v1147_v48 = vpop.f32.mrf.mxu1  ;;  %v1521_v4 = vpack.c.bf16 %v1491_v46, %v1490_v44 }
 0x270   :  { %v2850_v7 = vadd.f32 -1.0, %v3559_v33  ;;  %v1290_v57 = vmul.f32 1.442695, %v1231_v53  ;;  %v4336_v10 = vadd.f32 %v4202_v8, %v1147_v48  ;;  %v1454_v61 = vsel %vm1416_vm10, %v4293_v6, %v1378_v51 }
 0x271   :  { %v3109_v36 = vpop.f32.mrf.mxu1  ;;  %3184 = vmatmul.mubr.bf16.gmra.mxu1 %v1521_v4  ;;  %v1492_v5 = vmul.f32 1.050701, %v1454_v61 }
 0x272   :  { %v1379_v12 = vmul.f32 1.6732632, %v2850_v7  ;;  %3566 = vpow2.f32 %v1290_v57  ;;  %v1232_v13 = vmin.f32 %v4336_v10, 0.0  ;;  %3187 = vmatprep.mubr.msk.bf16.mxu1 %vm3870_vm0, %v3869_v37  ;;  %vm1422_vm1 = vcmp.gt.f32.partialorder %v4336_v10, 0.0 }
 0x273   :  { %v3561_v14 = vpop.eup %3560  ;;  %v1150_v15 = vpop.f32.mrf.mxu1 }
 0x274   :  { %v1455_v2 = vsel %vm1417_vm11, %v4304_v0, %v1379_v12  ;;  %v2851_v18 = vadd.f32 -1.0, %v3561_v14  ;;  %v1292_v59 = vmul.f32 1.442695, %v1232_v13  ;;  %v4346_v20 = vadd.f32 %v4202_v8, %v1150_v15 }
 0x275   :  { %v1493_v6 = vmul.f32 1.050701, %v1455_v2  ;;  %v3110_v55 = vpop.f32.mrf.mxu1 }
 0x276   :  { %v1380_v9 = vmul.f32 1.6732632, %v2851_v18  ;;  %3568 = vpow2.f32 %v1292_v59  ;;  %v1233_v24 = vmin.f32 %v4346_v20, 0.0  ;;  %vm1423_vm2 = vcmp.gt.f32.partialorder %v4346_v20, 0.0 }
 0x277   :  { %v3563_v26 = vpop.eup %3562  ;;  %v1155_v63 = vpop.f32.mrf.mxu1  ;;  %v1522_v11 = vpack.c.bf16 %v1493_v6, %v1492_v5 }
 0x278   :  { %v2852_v3 = vadd.f32 -1.0, %v3563_v26  ;;  %v1294_v25 = vmul.f32 1.442695, %v1233_v24  ;;  %v4350_v30 = vadd.f32 %v4202_v8, %v1155_v63  ;;  %v1456_v16 = vsel %vm1418_vm12, %v4308_v28, %v1380_v9 }
 0x279   :  { %v3113_v0 = vpop.f32.mrf.mxu1  ;;  %3188 = vmatmul.mubr.bf16.gmra.mxu1 %v1522_v11  ;;  %v1494_v27 = vmul.f32 1.050701, %v1456_v16 }
 0x27a   :  { %v1381_v22 = vmul.f32 1.6732632, %v2852_v3  ;;  %3570 = vpow2.f32 %v1294_v25  ;;  %v1234_v17 = vmin.f32 %v4350_v30, 0.0  ;;  %3191 = vmatprep.mubr.msk.bf16.mxu1 %vm3870_vm0, %v3869_v37  ;;  %vm1424_vm3 = vcmp.gt.f32.partialorder %v4350_v30, 0.0 }
 0x27b   :  { %v3565_v34 = vpop.eup %3564  ;;  %v1158_v35 = vpop.f32.mrf.mxu1 }
 0x27c   :  { %v1457_v21 = vsel %vm1419_vm13, %v4318_v39, %v1381_v22  ;;  %v2853_v41 = vadd.f32 -1.0, %v3565_v34  ;;  %v1296_v23 = vmul.f32 1.442695, %v1234_v17  ;;  %v4360_v19 = vadd.f32 %v4202_v8, %v1158_v35 }
 0x27d   :  { %v1495_v28 = vmul.f32 1.050701, %v1457_v21  ;;  %v3114_v29 = vpop.f32.mrf.mxu1  ;;  %v3446_v21 = vld [vmem:[#allocation8 + $0x8] sm:$0xff]  }
 0x27e   :  { %v1382_v45 = vmul.f32 1.6732632, %v2853_v41  ;;  %3572 = vpow2.f32 %v1296_v23  ;;  %v1235_v31 = vmin.f32 %v4360_v19, 0.0  ;;  %vm1425_vm4 = vcmp.gt.f32.partialorder %v4360_v19, 0.0  ;;  %3244 = vmatpush3.bf16.msra.mxu0 %v3446_v21  ;;  %3337 = vmatpush3.bf16.msra.mxu1 %v3446_v21 }
 0x27f   :  { %v3567_v47 = vpop.eup %3566  ;;  %v1523_v49 = vpack.c.bf16 %v1495_v28, %v1494_v27  ;;  %v1163_v50 = vpop.f32.mrf.mxu1  ;;  %3245 = vmatprep.subr.bf16.mxu0 %v3869_v37  ;;  %3330 = vmatprep.subr.bf16.mxu1 %v3869_v37 }
 0x280   :  { %v2854_v60 = vadd.f32 -1.0, %v3567_v47  ;;  %v1298_v52 = vmul.f32 1.442695, %v1235_v31  ;;  %v4364_v40 = vadd.f32 %v4202_v8, %v1163_v50  ;;  %v1458_v54 = vsel %vm1420_vm14, %v4322_v32, %v1382_v45 }
 0x281   :  { %v3117_v39 = vpop.f32.mrf.mxu1  ;;  %3192 = vmatmul.mubr.bf16.gmra.mxu1 %v1523_v49  ;;  %v1496_v51 = vmul.f32 1.050701, %v1458_v54 }
 0x282   :  { %v1383_v42 = vmul.f32 1.6732632, %v2854_v60  ;;  %3574 = vpow2.f32 %v1298_v52  ;;  %v1236_v56 = vmin.f32 %v4364_v40, 0.0  ;;  %3195 = vmatprep.mubr.msk.bf16.mxu1 %vm3870_vm0, %v3869_v37  ;;  %v3447_v60 = vld [vmem:[#allocation8] sm:$0xff]   ;;  %vm1426_vm5 = vcmp.gt.f32.partialorder %v4364_v40, 0.0 }
 0x283   :  { %v3569_v38 = vpop.eup %3568  ;;  %v1166_v58 = vpop.f32.mrf.mxu1  ;;  %3246 = vmatpush3.bf16.msra.mxu0 %v3447_v60  ;;  %3338 = vmatpush3.bf16.msra.mxu1 %v3447_v60 }
 0x284   :  { %v1459_v43 = vsel %vm1421_vm15, %v4332_v62, %v1383_v42  ;;  %v2855_v44 = vadd.f32 -1.0, %v3569_v38  ;;  %v1300_v46 = vmul.f32 1.442695, %v1236_v56  ;;  %v4374_v1 = vadd.f32 %v4202_v8, %v1166_v58 }
 0x285   :  { %v1497_v32 = vmul.f32 1.050701, %v1459_v43  ;;  %v3118_v53 = vpop.f32.mrf.mxu1 }
 0x286   :  { %v1384_v33 = vmul.f32 1.6732632, %v2855_v44  ;;  %3576 = vpow2.f32 %v1300_v46  ;;  %v1237_v48 = vmin.f32 %v4374_v1, 0.0  ;;  %vm1427_vm6 = vcmp.gt.f32.partialorder %v4374_v1, 0.0 }
 0x287   :  { %v3571_v4 = vpop.eup %3570  ;;  %v1524_v7 = vpack.c.bf16 %v1497_v32, %v1496_v51  ;;  %v1171_v57 = vpop.f32.mrf.mxu1 }
 0x288   :  { %v2856_v36 = vadd.f32 -1.0, %v3571_v4  ;;  %v1302_v61 = vmul.f32 1.442695, %v1237_v48  ;;  %v4378_v12 = vadd.f32 %v4202_v8, %v1171_v57  ;;  %v1460_v13 = vsel %vm1422_vm1, %v4336_v10, %v1384_v33 }
 0x289   :  { %v3121_v62 = vpop.f32.mrf.mxu1  ;;  %3196 = vmatmul.mubr.bf16.gmra.mxu1 %v1524_v7  ;;  %v1498_v9 = vmul.f32 1.050701, %v1460_v13 }
 0x28a   :  { %v1385_v14 = vmul.f32 1.6732632, %v2856_v36  ;;  %3578 = vpow2.f32 %v1302_v61  ;;  %v1238_v15 = vmin.f32 %v4378_v12, 0.0  ;;  %3199 = vmatprep.mubr.msk.bf16.mxu1 %vm3870_vm0, %v3869_v37  ;;  %vm1428_vm7 = vcmp.gt.f32.partialorder %v4378_v12, 0.0 }
 0x28b   :  { %v3573_v2 = vpop.eup %3572  ;;  %v1174_v18 = vpop.f32.mrf.mxu1 }
 0x28c   :  { %v1461_v59 = vsel %vm1423_vm2, %v4346_v20, %v1385_v14  ;;  %v2857_v5 = vadd.f32 -1.0, %v3573_v2  ;;  %v1304_v6 = vmul.f32 1.442695, %v1238_v15  ;;  %v4388_v55 = vadd.f32 %v4202_v8, %v1174_v18 }
 0x28d   :  { %v1499_v10 = vmul.f32 1.050701, %v1461_v59  ;;  %v3122_v24 = vpop.f32.mrf.mxu1 }
 0x28e   :  { %v1386_v26 = vmul.f32 1.6732632, %v2857_v5  ;;  %3580 = vpow2.f32 %v1304_v6  ;;  %v1239_v63 = vmin.f32 %v4388_v55, 0.0  ;;  %vm1429_vm8 = vcmp.gt.f32.partialorder %v4388_v55, 0.0 }
 0x28f   :  { %v3575_v11 = vpop.eup %3574  ;;  %v1525_v3 = vpack.c.bf16 %v1499_v10, %v1498_v9  ;;  %v1179_v25 = vpop.f32.mrf.mxu1 }
 0x290   :  { %v2858_v0 = vadd.f32 -1.0, %v3575_v11  ;;  %v1306_v16 = vmul.f32 1.442695, %v1239_v63  ;;  %v4392_v22 = vadd.f32 %v4202_v8, %v1179_v25  ;;  %v1462_v17 = vsel %vm1424_vm3, %v4350_v30, %v1386_v26 }
 0x291   :  { %v3125_v20 = vpop.f32.mrf.mxu1  ;;  %3200 = vmatmul.mubr.bf16.gmra.mxu1 %v1525_v3  ;;  %v1500_v30 = vmul.f32 1.050701, %v1462_v17 }
 0x292   :  { %v1387_v34 = vmul.f32 1.6732632, %v2858_v0  ;;  %3582 = vpow2.f32 %v1306_v16  ;;  %v1240_v35 = vmin.f32 %v4392_v22, 0.0  ;;  %3203 = vmatprep.mubr.msk.bf16.mxu1 %vm3870_vm0, %v3869_v37  ;;  %vm1430_vm9 = vcmp.gt.f32.partialorder %v4392_v22, 0.0 }
 0x293   :  { %v3577_v41 = vpop.eup %3576  ;;  %v1182_v23 = vpop.f32.mrf.mxu1 }
 0x294   :  { %v1463_v27 = vsel %vm1425_vm4, %v4360_v19, %v1387_v34  ;;  %v2859_v28 = vadd.f32 -1.0, %v3577_v41  ;;  %v1308_v29 = vmul.f32 1.442695, %v1240_v35  ;;  %v4402_v45 = vadd.f32 %v4202_v8, %v1182_v23 }
 0x295   :  { %v1501_v31 = vmul.f32 1.050701, %v1463_v27  ;;  %v3126_v47 = vpop.f32.mrf.mxu1 }
 0x296   :  { %v1388_v49 = vmul.f32 1.6732632, %v2859_v28  ;;  %3584 = vpow2.f32 %v1308_v29  ;;  %v1241_v50 = vmin.f32 %v4402_v45, 0.0  ;;  %vm1431_vm10 = vcmp.gt.f32.partialorder %v4402_v45, 0.0 }
 0x297   :  { %v3579_v19 = vpop.eup %3578  ;;  %v1526_v52 = vpack.c.bf16 %v1501_v31, %v1500_v30  ;;  %v1187_v39 = vpop.f32.mrf.mxu1 }
 0x298   :  { %v2860_v54 = vadd.f32 -1.0, %v3579_v19  ;;  %v1310_v42 = vmul.f32 1.442695, %v1241_v50  ;;  %v4408_v56 = vadd.f32 %v4202_v8, %v1187_v39  ;;  %v1464_v58 = vsel %vm1426_vm5, %v4364_v40, %v1388_v49 }
 0x299   :  { %v3129_v38 = vpop.f32.mrf.mxu1  ;;  %3204 = vmatmul.mubr.bf16.gmra.mxu1 %v1526_v52  ;;  %v1502_v4 = vmul.f32 1.050701, %v1464_v58 }
 0x29a   :  { %v1389_v43 = vmul.f32 1.6732632, %v2860_v54  ;;  %3586 = vpow2.f32 %v1310_v42  ;;  %v1242_v44 = vmin.f32 %v4408_v56, 0.0  ;;  %3207 = vmatprep.mubr.msk.bf16.mxu1 %vm3870_vm0, %v3869_v37  ;;  %vm1432_vm11 = vcmp.gt.f32.partialorder %v4408_v56, 0.0 }
 0x29b   :  { %v3581_v46 = vpop.eup %3580  ;;  %v1190_v51 = vpop.f32.mrf.mxu1 }
 0x29c   :  { %v1465_v32 = vsel %vm1427_vm6, %v4374_v1, %v1389_v43  ;;  %v2861_v53 = vadd.f32 -1.0, %v3581_v46  ;;  %v1312_v33 = vmul.f32 1.442695, %v1242_v44  ;;  %v4418_v48 = vadd.f32 %v4202_v8, %v1190_v51 }
 0x29d   :  { %v1503_v40 = vmul.f32 1.050701, %v1465_v32  ;;  %v3130_v7 = vpop.f32.mrf.mxu1 }
 0x29e   :  { %v1390_v57 = vmul.f32 1.6732632, %v2861_v53  ;;  %3588 = vpow2.f32 %v1312_v33  ;;  %v1243_v36 = vmin.f32 %v4418_v48, 0.0  ;;  %vm1433_vm12 = vcmp.gt.f32.partialorder %v4418_v48, 0.0 }
 0x29f   :  { %v3583_v61 = vpop.eup %3582  ;;  %v1527_v62 = vpack.c.bf16 %v1503_v40, %v1502_v4  ;;  %v1195_v13 = vpop.f32.mrf.mxu1 }
 0x2a0   :  { %v2862_v14 = vadd.f32 -1.0, %v3583_v61  ;;  %v1314_v15 = vmul.f32 1.442695, %v1243_v36  ;;  %v4422_v2 = vadd.f32 %v4202_v8, %v1195_v13  ;;  %v1466_v18 = vsel %vm1428_vm7, %v4378_v12, %v1390_v57 }
 0x2a1   :  { %v3133_v1 = vpop.f32.mrf.mxu1  ;;  %3208 = vmatmul.mubr.bf16.gmra.mxu1 %v1527_v62  ;;  %v1504_v11 = vmul.f32 1.050701, %v1466_v18 }
 0x2a2   :  { %v1391_v59 = vmul.f32 1.6732632, %v2862_v14  ;;  %3590 = vpow2.f32 %v1314_v15  ;;  %v1244_v5 = vmin.f32 %v4422_v2, 0.0  ;;  %3211 = vmatprep.mubr.msk.bf16.mxu1 %vm3870_vm0, %v3869_v37  ;;  %vm1434_vm13 = vcmp.gt.f32.partialorder %v4422_v2, 0.0 }
 0x2a3   :  { %v3585_v6 = vpop.eup %3584  ;;  %v1198_v9 = vpop.f32.mrf.mxu1 }
 0x2a4   :  { %v1467_v10 = vsel %vm1429_vm8, %v4388_v55, %v1391_v59  ;;  %v2863_v24 = vadd.f32 -1.0, %v3585_v6  ;;  %v1316_v26 = vmul.f32 1.442695, %v1244_v5  ;;  %v1199_v63 = vadd.f32 %v4202_v8, %v1198_v9  ;;  %v4457_v9 = vld [vmem:[%s4894_s4 + $0x1] ss:$0 sm:$0xff] }
 0x2a5   :  { %v1505_v3 = vmul.f32 1.050701, %v1467_v10  ;;  %v3134_v12 = vpop.f32.mrf.mxu1 }
 0x2a6   :  { %v1392_v25 = vmul.f32 1.6732632, %v2863_v24  ;;  %3592 = vpow2.f32 %v1316_v26  ;;  %v1245_v0 = vmin.f32 %v1199_v63, 0.0  ;;  %vm1435_vm14 = vcmp.gt.f32.partialorder %v1199_v63, 0.0 }
 0x2a7   :  { %v3587_v16 = vpop.eup %3586  ;;  %v1528_v20 = vpack.c.bf16 %v1505_v3, %v1504_v11  ;;  %v1203_v17 = vpop.f32.mrf.mxu1 }
 0x2a8   :  { %v2864_v34 = vadd.f32 -1.0, %v3587_v16  ;;  %v1318_v35 = vmul.f32 1.442695, %v1245_v0  ;;  %v1204_v21 = vadd.f32 %v4202_v8, %v1203_v17  ;;  %v1468_v41 = vsel %vm1430_vm9, %v4392_v22, %v1392_v25 }
 0x2a9   :  { %v3137_v55 = vpop.f32.mrf.mxu1  ;;  %3212 = vmatmul.mubr.bf16.gmra.mxu1 %v1528_v20  ;;  %v1506_v50 = vmul.f32 1.050701, %v1468_v41 }
 0x2aa   :  { %v1393_v23 = vmul.f32 1.6732632, %v2864_v34  ;;  %3594 = vpow2.f32 %v1318_v35  ;;  %v1246_v27 = vmin.f32 %v1204_v21, 0.0  ;;  %3215 = vmatprep.mubr.msk.bf16.mxu1 %vm3870_vm0, %v3869_v37  ;;  %vm1436_vm15 = vcmp.gt.f32.partialorder %v1204_v21, 0.0 }
 0x2ab   :  { %v3589_v28 = vpop.eup %3588  ;;  %v1206_v29 = vpop.f32.mrf.mxu1 }
 0x2ac   :  { %v1469_v30 = vsel %vm1431_vm10, %v4402_v45, %v1393_v23  ;;  %v2865_v31 = vadd.f32 -1.0, %v3589_v28  ;;  %v1320_v47 = vmul.f32 1.442695, %v1246_v27  ;;  %v1207_v49 = vadd.f32 %v4202_v8, %v1206_v29 }
 0x2ad   :  { %v1507_v60 = vmul.f32 1.050701, %v1469_v30  ;;  %v3138_v19 = vpop.f32.mrf.mxu1 }
 0x2ae   :  { %v1394_v22 = vmul.f32 1.6732632, %v2865_v31  ;;  %3596 = vpow2.f32 %v1320_v47  ;;  %v1247_v52 = vmin.f32 %v1207_v49, 0.0  ;;  %vm1437_vm1 = vcmp.gt.f32.partialorder %v1207_v49, 0.0 }
 0x2af   :  { %v3591_v39 = vpop.eup %3590  ;;  %v1529_v54 = vpack.c.bf16 %v1507_v60, %v1506_v50 }
 0x2b0   :  { %v2866_v42 = vadd.f32 -1.0, %v3591_v39  ;;  %v1322_v38 = vmul.f32 1.442695, %v1247_v52  ;;  %v1470_v58 = vsel %vm1432_vm11, %v4408_v56, %v1394_v22 }
 0x2b1   :  { %3216 = vmatmul.mubr.bf16.gmra.mxu1 %v1529_v54  ;;  %v1508_v46 = vmul.f32 1.050701, %v1470_v58 }
 0x2b2   :  { %v1395_v45 = vmul.f32 1.6732632, %v2866_v42  ;;  %3598 = vpow2.f32 %v1322_v38  ;;  %3219 = vmatprep.mubr.msk.bf16.mxu1 %vm3870_vm0, %v3869_v37 }
 0x2b3   :  { %v3593_v8 = vpop.eup %3592 }
 0x2b4   :  { %v1471_v43 = vsel %vm1433_vm12, %v4418_v48, %v1395_v45  ;;  %v2867_v44 = vadd.f32 -1.0, %v3593_v8 }
 0x2b5   :  { %v1509_v51 = vmul.f32 1.050701, %v1471_v43 }
 0x2b6   :  { %v1396_v32 = vmul.f32 1.6732632, %v2867_v44 }
 0x2b7   :  { %v3595_v53 = vpop.eup %3594  ;;  %v1530_v33 = vpack.c.bf16 %v1509_v51, %v1508_v46 }
 0x2b8   :  { %v2868_v4 = vadd.f32 -1.0, %v3595_v53  ;;  %v1472_v56 = vsel %vm1434_vm13, %v4422_v2, %v1396_v32 }
 0x2b9   :  { %3220 = vmatmul.mubr.bf16.gmra.mxu1 %v1530_v33  ;;  %v1510_v36 = vmul.f32 1.050701, %v1472_v56 }
 0x2ba   :  { %v1397_v40 = vmul.f32 1.6732632, %v2868_v4  ;;  %3223 = vmatprep.mubr.msk.bf16.mxu1 %vm3870_vm0, %v3869_v37 }
 0x2bb   :  { %v3597_v7 = vpop.eup %3596 }
 0x2bc   :  { %v1473_v57 = vsel %vm1435_vm14, %v1199_v63, %v1397_v40  ;;  %v2869_v48 = vadd.f32 -1.0, %v3597_v7 }
 0x2bd   :  { %v1511_v61 = vmul.f32 1.050701, %v1473_v57 }
 0x2be   :  { %v1398_v62 = vmul.f32 1.6732632, %v2869_v48 }
 0x2bf   :  { %v3599_v13 = vpop.eup %3598  ;;  %v1531_v14 = vpack.c.bf16 %v1511_v61, %v1510_v36 }
 0x2c0   :  { %v2870_v15 = vadd.f32 -1.0, %v3599_v13  ;;  %v1474_v1 = vsel %vm1436_vm15, %v1204_v21, %v1398_v62 }
 0x2c1   :  { %3224 = vmatmul.mubr.bf16.gmra.mxu1 %v1531_v14  ;;  %v1512_v59 = vmul.f32 1.050701, %v1474_v1 }
 0x2c2   :  { %v1399_v18 = vmul.f32 1.6732632, %v2870_v15  ;;  %3227 = vmatprep.mubr.msk.bf16.mxu1 %vm3870_vm0, %v3869_v37 }
 0x2c4   :  { %v1475_v2 = vsel %vm1437_vm1, %v1207_v49, %v1399_v18 }
 0x2c5   :  { %v1513_v5 = vmul.f32 1.050701, %v1475_v2 }
 0x2c7   :  { %v1532_v6 = vpack.c.bf16 %v1513_v5, %v1512_v59 }
 0x2c9   :  { %3228 = vmatmul.mubr.bf16.gmra.mxu1 %v1532_v6 }
 0x2ca   :  { %3315 = vmatprep.mubr.msk.bf16.mxu1 %vm3870_vm0, %v3869_v37 }
 0x2f9   :  { %v1640_v10 = vpop.f32.mrf.mxu1 }
 0x2fa   :  { %v1641_v24 = vadd.f32 %v4457_v9, %v1640_v10 }
 0x2fb   :  { %v3157_v26 = vpop.f32.mrf.mxu1 }
 0x2fc   :  { %v1791_v63 = vmin.f32 %v1641_v24, 0.0  ;;  %vm1981_vm2 = vcmp.gt.f32.partialorder %v1641_v24, 0.0 }
 0x2fd   :  { %v1643_v11 = vpop.f32.mrf.mxu1 }
 0x2fe   :  { %v1829_v3 = vmul.f32 1.442695, %v1791_v63  ;;  %v1644_v12 = vadd.f32 %v4457_v9, %v1643_v11 }
 0x2ff   :  { %v3158_v25 = vpop.f32.mrf.mxu1 }
 0x300   :  { %3600 = vpow2.f32 %v1829_v3  ;;  %v1792_v0 = vmin.f32 %v1644_v12, 0.0  ;;  %vm1982_vm3 = vcmp.gt.f32.partialorder %v1644_v12, 0.0 }
 0x301   :  { %v1648_v16 = vpop.f32.mrf.mxu1 }
 0x302   :  { %v1831_v20 = vmul.f32 1.442695, %v1792_v0  ;;  %v1649_v17 = vadd.f32 %v4457_v9, %v1648_v16 }
 0x303   :  { %v3161_v34 = vpop.f32.mrf.mxu1 }
 0x304   :  { %3602 = vpow2.f32 %v1831_v20  ;;  %v1793_v35 = vmin.f32 %v1649_v17, 0.0  ;;  %vm1983_vm4 = vcmp.gt.f32.partialorder %v1649_v17, 0.0 }
 0x305   :  { %v1651_v21 = vpop.f32.mrf.mxu1 }
 0x306   :  { %v1833_v55 = vmul.f32 1.442695, %v1793_v35  ;;  %v1652_v41 = vadd.f32 %v4457_v9, %v1651_v21 }
 0x307   :  { %v3162_v23 = vpop.f32.mrf.mxu1 }
 0x308   :  { %3604 = vpow2.f32 %v1833_v55  ;;  %v1794_v27 = vmin.f32 %v1652_v41, 0.0  ;;  %vm1984_vm5 = vcmp.gt.f32.partialorder %v1652_v41, 0.0 }
 0x309   :  { %v1656_v28 = vpop.f32.mrf.mxu1 }
 0x30a   :  { %v1835_v29 = vmul.f32 1.442695, %v1794_v27  ;;  %v4464_v30 = vadd.f32 %v4457_v9, %v1656_v28 }
 0x30b   :  { %v3165_v31 = vpop.f32.mrf.mxu1 }
 0x30c   :  { %3606 = vpow2.f32 %v1835_v29  ;;  %v1795_v47 = vmin.f32 %v4464_v30, 0.0  ;;  %vm1985_vm6 = vcmp.gt.f32.partialorder %v4464_v30, 0.0 }
 0x30d   :  { %v3601_v49 = vpop.eup %3600  ;;  %v1659_v50 = vpop.f32.mrf.mxu1 }
 0x30e   :  { %v2881_v60 = vadd.f32 -1.0, %v3601_v49  ;;  %v1837_v19 = vmul.f32 1.442695, %v1795_v47  ;;  %v4468_v22 = vadd.f32 %v4457_v9, %v1659_v50 }
 0x30f   :  { %v3166_v52 = vpop.f32.mrf.mxu1 }
 0x310   :  { %v1943_v39 = vmul.f32 1.6732632, %v2881_v60  ;;  %3608 = vpow2.f32 %v1837_v19  ;;  %v1796_v54 = vmin.f32 %v4468_v22, 0.0  ;;  %vm1986_vm7 = vcmp.gt.f32.partialorder %v4468_v22, 0.0 }
 0x311   :  { %v3603_v42 = vpop.eup %3602  ;;  %v1664_v38 = vpop.f32.mrf.mxu1 }
 0x312   :  { %v2882_v58 = vadd.f32 -1.0, %v3603_v42  ;;  %v1839_v45 = vmul.f32 1.442695, %v1796_v54  ;;  %v4472_v8 = vadd.f32 %v4457_v9, %v1664_v38  ;;  %v2019_v44 = vsel %vm1981_vm2, %v1641_v24, %v1943_v39 }
 0x313   :  { %v3169_v43 = vpop.f32.mrf.mxu1  ;;  %v2057_v7 = vmul.f32 1.050701, %v2019_v44 }
 0x314   :  { %v1944_v46 = vmul.f32 1.6732632, %v2882_v58  ;;  %3610 = vpow2.f32 %v1839_v45  ;;  %v1797_v51 = vmin.f32 %v4472_v8, 0.0  ;;  %vm1987_vm8 = vcmp.gt.f32.partialorder %v4472_v8, 0.0 }
 0x315   :  { %v3605_v32 = vpop.eup %3604  ;;  %v1667_v53 = vpop.f32.mrf.mxu1 }
 0x316   :  { %v2020_v33 = vsel %vm1982_vm3, %v1644_v12, %v1944_v46  ;;  %v2883_v4 = vadd.f32 -1.0, %v3605_v32  ;;  %v1841_v56 = vmul.f32 1.442695, %v1797_v51  ;;  %v4476_v40 = vadd.f32 %v4457_v9, %v1667_v53 }
 0x317   :  { %v2058_v57 = vmul.f32 1.050701, %v2020_v33  ;;  %v3170_v48 = vpop.f32.mrf.mxu1 }
 0x318   :  { %v1945_v36 = vmul.f32 1.6732632, %v2883_v4  ;;  %3612 = vpow2.f32 %v1841_v56  ;;  %v1798_v61 = vmin.f32 %v4476_v40, 0.0  ;;  %vm1988_vm9 = vcmp.gt.f32.partialorder %v4476_v40, 0.0 }
 0x319   :  { %v3607_v62 = vpop.eup %3606  ;;  %v2095_v13 = vpack.c.bf16 %v2058_v57, %v2057_v7  ;;  %v1672_v14 = vpop.f32.mrf.mxu1 }
 0x31a   :  { %v2884_v15 = vadd.f32 -1.0, %v3607_v62  ;;  %v1843_v1 = vmul.f32 1.442695, %v1798_v61  ;;  %v4480_v18 = vadd.f32 %v4457_v9, %v1672_v14  ;;  %v2021_v59 = vsel %vm1983_vm4, %v1649_v17, %v1945_v36 }
 0x31b   :  { %v3173_v2 = vpop.f32.mrf.mxu1  ;;  %3248 = vmatmul.mubr.bf16.vlgmr.msra.gmra.mxu0 %v2095_v13  ;;  %v2059_v12 = vmul.f32 1.050701, %v2021_v59 }
 0x31c   :  { %v1946_v5 = vmul.f32 1.6732632, %v2884_v15  ;;  %3614 = vpow2.f32 %v1843_v1  ;;  %v1799_v6 = vmin.f32 %v4480_v18, 0.0  ;;  %3251 = vmatprep.mubr.msk.bf16.mxu0 %vm3870_vm0, %v3869_v37  ;;  %vm1989_vm10 = vcmp.gt.f32.partialorder %v4480_v18, 0.0 }
 0x31d   :  { %v3609_v10 = vpop.eup %3608  ;;  %v1675_v24 = vpop.f32.mrf.mxu1 }
 0x31e   :  { %v2022_v26 = vsel %vm1984_vm5, %v1652_v41, %v1946_v5  ;;  %v2885_v63 = vadd.f32 -1.0, %v3609_v10  ;;  %v1845_v11 = vmul.f32 1.442695, %v1799_v6  ;;  %v4486_v3 = vadd.f32 %v4457_v9, %v1675_v24 }
 0x31f   :  { %v2060_v25 = vmul.f32 1.050701, %v2022_v26  ;;  %v3174_v0 = vpop.f32.mrf.mxu1 }
 0x320   :  { %v1947_v16 = vmul.f32 1.6732632, %v2885_v63  ;;  %3616 = vpow2.f32 %v1845_v11  ;;  %v1800_v20 = vmin.f32 %v4486_v3, 0.0  ;;  %vm1990_vm11 = vcmp.gt.f32.partialorder %v4486_v3, 0.0 }
 0x321   :  { %v3611_v17 = vpop.eup %3610  ;;  %v1680_v34 = vpop.f32.mrf.mxu1  ;;  %v2096_v35 = vpack.c.bf16 %v2060_v25, %v2059_v12 }
 0x322   :  { %v2886_v21 = vadd.f32 -1.0, %v3611_v17  ;;  %v1847_v55 = vmul.f32 1.442695, %v1800_v20  ;;  %v4490_v23 = vadd.f32 %v4457_v9, %v1680_v34  ;;  %v2023_v27 = vsel %vm1985_vm6, %v4464_v30, %v1947_v16 }
 0x323   :  { %v3177_v41 = vpop.f32.mrf.mxu1  ;;  %3252 = vmatmul.mubr.bf16.gmra.mxu0 %v2096_v35  ;;  %v2061_v52 = vmul.f32 1.050701, %v2023_v27 }
 0x324   :  { %v1948_v28 = vmul.f32 1.6732632, %v2886_v21  ;;  %3618 = vpow2.f32 %v1847_v55  ;;  %v1801_v29 = vmin.f32 %v4490_v23, 0.0  ;;  %3255 = vmatprep.mubr.msk.bf16.mxu0 %vm3870_vm0, %v3869_v37  ;;  %vm1991_vm12 = vcmp.gt.f32.partialorder %v4490_v23, 0.0 }
 0x325   :  { %v3613_v31 = vpop.eup %3612  ;;  %v1683_v47 = vpop.f32.mrf.mxu1 }
 0x326   :  { %v2024_v49 = vsel %vm1986_vm7, %v4468_v22, %v1948_v28  ;;  %v2887_v50 = vadd.f32 -1.0, %v3613_v31  ;;  %v1849_v60 = vmul.f32 1.442695, %v1801_v29  ;;  %v4500_v19 = vadd.f32 %v4457_v9, %v1683_v47 }
 0x327   :  { %v2062_v30 = vmul.f32 1.050701, %v2024_v49  ;;  %v3178_v39 = vpop.f32.mrf.mxu1 }
 0x328   :  { %v1949_v54 = vmul.f32 1.6732632, %v2887_v50  ;;  %3620 = vpow2.f32 %v1849_v60  ;;  %v1802_v42 = vmin.f32 %v4500_v19, 0.0  ;;  %vm1992_vm13 = vcmp.gt.f32.partialorder %v4500_v19, 0.0 }
 0x329   :  { %v3615_v38 = vpop.eup %3614  ;;  %v1688_v58 = vpop.f32.mrf.mxu1  ;;  %v2097_v45 = vpack.c.bf16 %v2062_v30, %v2061_v52 }
 0x32a   :  { %v2888_v43 = vadd.f32 -1.0, %v3615_v38  ;;  %v1851_v44 = vmul.f32 1.442695, %v1802_v42  ;;  %v4504_v46 = vadd.f32 %v4457_v9, %v1688_v58  ;;  %v2025_v51 = vsel %vm1987_vm8, %v4472_v8, %v1949_v54 }
 0x32b   :  { %v3181_v22 = vpop.f32.mrf.mxu1  ;;  %3256 = vmatmul.mubr.bf16.gmra.mxu0 %v2097_v45  ;;  %v2063_v36 = vmul.f32 1.050701, %v2025_v51 }
 0x32c   :  { %v1950_v32 = vmul.f32 1.6732632, %v2888_v43  ;;  %3622 = vpow2.f32 %v1851_v44  ;;  %v1803_v53 = vmin.f32 %v4504_v46, 0.0  ;;  %3259 = vmatprep.mubr.msk.bf16.mxu0 %vm3870_vm0, %v3869_v37  ;;  %vm1993_vm14 = vcmp.gt.f32.partialorder %v4504_v46, 0.0 }
 0x32d   :  { %v3617_v33 = vpop.eup %3616  ;;  %v1691_v4 = vpop.f32.mrf.mxu1 }
 0x32e   :  { %v2026_v56 = vsel %vm1988_vm9, %v4476_v40, %v1950_v32  ;;  %v2889_v7 = vadd.f32 -1.0, %v3617_v33  ;;  %v1853_v57 = vmul.f32 1.442695, %v1803_v53  ;;  %v4514_v48 = vadd.f32 %v4457_v9, %v1691_v4 }
 0x32f   :  { %v2064_v8 = vmul.f32 1.050701, %v2026_v56  ;;  %v3182_v61 = vpop.f32.mrf.mxu1 }
 0x330   :  { %v1951_v62 = vmul.f32 1.6732632, %v2889_v7  ;;  %3624 = vpow2.f32 %v1853_v57  ;;  %v1804_v13 = vmin.f32 %v4514_v48, 0.0  ;;  %vm1994_vm15 = vcmp.gt.f32.partialorder %v4514_v48, 0.0 }
 0x331   :  { %v3619_v14 = vpop.eup %3618  ;;  %v1696_v15 = vpop.f32.mrf.mxu1  ;;  %v2098_v1 = vpack.c.bf16 %v2064_v8, %v2063_v36 }
 0x332   :  { %v2890_v2 = vadd.f32 -1.0, %v3619_v14  ;;  %v1855_v59 = vmul.f32 1.442695, %v1804_v13  ;;  %v4518_v5 = vadd.f32 %v4457_v9, %v1696_v15  ;;  %v2027_v6 = vsel %vm1989_vm10, %v4480_v18, %v1951_v62 }
 0x333   :  { %v3185_v40 = vpop.f32.mrf.mxu1  ;;  %3260 = vmatmul.mubr.bf16.gmra.mxu0 %v2098_v1  ;;  %v2065_v16 = vmul.f32 1.050701, %v2027_v6 }
 0x334   :  { %v1952_v10 = vmul.f32 1.6732632, %v2890_v2  ;;  %3626 = vpow2.f32 %v1855_v59  ;;  %v1805_v24 = vmin.f32 %v4518_v5, 0.0  ;;  %3263 = vmatprep.mubr.msk.bf16.mxu0 %vm3870_vm0, %v3869_v37  ;;  %vm1995_vm1 = vcmp.gt.f32.partialorder %v4518_v5, 0.0 }
 0x335   :  { %v3621_v26 = vpop.eup %3620  ;;  %v1699_v63 = vpop.f32.mrf.mxu1 }
 0x336   :  { %v2028_v11 = vsel %vm1990_vm11, %v4486_v3, %v1952_v10  ;;  %v2891_v12 = vadd.f32 -1.0, %v3621_v26  ;;  %v1857_v25 = vmul.f32 1.442695, %v1805_v24  ;;  %v4528_v0 = vadd.f32 %v4457_v9, %v1699_v63 }
 0x337   :  { %v2066_v18 = vmul.f32 1.050701, %v2028_v11  ;;  %v3186_v20 = vpop.f32.mrf.mxu1 }
 0x338   :  { %v1953_v17 = vmul.f32 1.6732632, %v2891_v12  ;;  %3628 = vpow2.f32 %v1857_v25  ;;  %v1806_v34 = vmin.f32 %v4528_v0, 0.0  ;;  %vm1996_vm2 = vcmp.gt.f32.partialorder %v4528_v0, 0.0 }
 0x339   :  { %v3623_v35 = vpop.eup %3622  ;;  %v1704_v21 = vpop.f32.mrf.mxu1  ;;  %v2099_v55 = vpack.c.bf16 %v2066_v18, %v2065_v16 }
 0x33a   :  { %v2892_v41 = vadd.f32 -1.0, %v3623_v35  ;;  %v1859_v27 = vmul.f32 1.442695, %v1806_v34  ;;  %v4532_v28 = vadd.f32 %v4457_v9, %v1704_v21  ;;  %v2029_v29 = vsel %vm1991_vm12, %v4490_v23, %v1953_v17 }
 0x33b   :  { %v3189_v3 = vpop.f32.mrf.mxu1  ;;  %3264 = vmatmul.mubr.bf16.gmra.mxu0 %v2099_v55  ;;  %v2067_v54 = vmul.f32 1.050701, %v2029_v29 }
 0x33c   :  { %v1954_v31 = vmul.f32 1.6732632, %v2892_v41  ;;  %3630 = vpow2.f32 %v1859_v27  ;;  %v1807_v47 = vmin.f32 %v4532_v28, 0.0  ;;  %3267 = vmatprep.mubr.msk.bf16.mxu0 %vm3870_vm0, %v3869_v37  ;;  %vm1997_vm3 = vcmp.gt.f32.partialorder %v4532_v28, 0.0 }
 0x33d   :  { %v3625_v49 = vpop.eup %3624  ;;  %v1707_v50 = vpop.f32.mrf.mxu1 }
 0x33e   :  { %v2030_v60 = vsel %vm1992_vm13, %v4500_v19, %v1954_v31  ;;  %v2893_v52 = vadd.f32 -1.0, %v3625_v49  ;;  %v1861_v30 = vmul.f32 1.442695, %v1807_v47  ;;  %v4542_v39 = vadd.f32 %v4457_v9, %v1707_v50 }
 0x33f   :  { %v2068_v23 = vmul.f32 1.050701, %v2030_v60  ;;  %v3190_v42 = vpop.f32.mrf.mxu1 }
 0x340   :  { %v1955_v38 = vmul.f32 1.6732632, %v2893_v52  ;;  %3632 = vpow2.f32 %v1861_v30  ;;  %v1808_v58 = vmin.f32 %v4542_v39, 0.0  ;;  %vm1998_vm4 = vcmp.gt.f32.partialorder %v4542_v39, 0.0 }
 0x341   :  { %v3627_v45 = vpop.eup %3626  ;;  %v1712_v43 = vpop.f32.mrf.mxu1  ;;  %v2100_v44 = vpack.c.bf16 %v2068_v23, %v2067_v54 }
 0x342   :  { %v2894_v22 = vadd.f32 -1.0, %v3627_v45  ;;  %v1863_v51 = vmul.f32 1.442695, %v1808_v58  ;;  %v4546_v32 = vadd.f32 %v4457_v9, %v1712_v43  ;;  %v2031_v53 = vsel %vm1993_vm14, %v4504_v46, %v1955_v38 }
 0x343   :  { %v3193_v19 = vpop.f32.mrf.mxu1  ;;  %3268 = vmatmul.mubr.bf16.gmra.mxu0 %v2100_v44  ;;  %v2069_v62 = vmul.f32 1.050701, %v2031_v53 }
 0x344   :  { %v1956_v33 = vmul.f32 1.6732632, %v2894_v22  ;;  %3634 = vpow2.f32 %v1863_v51  ;;  %v1809_v4 = vmin.f32 %v4546_v32, 0.0  ;;  %3271 = vmatprep.mubr.msk.bf16.mxu0 %vm3870_vm0, %v3869_v37  ;;  %vm1999_vm5 = vcmp.gt.f32.partialorder %v4546_v32, 0.0 }
 0x345   :  { %v3629_v56 = vpop.eup %3628  ;;  %v1715_v7 = vpop.f32.mrf.mxu1 }
 0x346   :  { %v2032_v57 = vsel %vm1994_vm15, %v4514_v48, %v1956_v33  ;;  %v2895_v36 = vadd.f32 -1.0, %v3629_v56  ;;  %v1865_v8 = vmul.f32 1.442695, %v1809_v4  ;;  %v4556_v61 = vadd.f32 %v4457_v9, %v1715_v7 }
 0x347   :  { %v2070_v46 = vmul.f32 1.050701, %v2032_v57  ;;  %v3194_v13 = vpop.f32.mrf.mxu1 }
 0x348   :  { %v1957_v14 = vmul.f32 1.6732632, %v2895_v36  ;;  %3636 = vpow2.f32 %v1865_v8  ;;  %v1810_v15 = vmin.f32 %v4556_v61, 0.0  ;;  %vm2000_vm6 = vcmp.gt.f32.partialorder %v4556_v61, 0.0 }
 0x349   :  { %v3631_v1 = vpop.eup %3630  ;;  %v1720_v2 = vpop.f32.mrf.mxu1  ;;  %v2101_v59 = vpack.c.bf16 %v2070_v46, %v2069_v62 }
 0x34a   :  { %v2896_v40 = vadd.f32 -1.0, %v3631_v1  ;;  %v1867_v6 = vmul.f32 1.442695, %v1810_v15  ;;  %v4560_v10 = vadd.f32 %v4457_v9, %v1720_v2  ;;  %v2033_v24 = vsel %vm1995_vm1, %v4518_v5, %v1957_v14 }
 0x34b   :  { %v3197_v48 = vpop.f32.mrf.mxu1  ;;  %3272 = vmatmul.mubr.bf16.gmra.mxu0 %v2101_v59  ;;  %v2071_v17 = vmul.f32 1.050701, %v2033_v24 }
 0x34c   :  { %v1958_v26 = vmul.f32 1.6732632, %v2896_v40  ;;  %3638 = vpow2.f32 %v1867_v6  ;;  %v1811_v63 = vmin.f32 %v4560_v10, 0.0  ;;  %3275 = vmatprep.mubr.msk.bf16.mxu0 %vm3870_vm0, %v3869_v37  ;;  %vm2001_vm7 = vcmp.gt.f32.partialorder %v4560_v10, 0.0 }
 0x34d   :  { %v3633_v11 = vpop.eup %3632  ;;  %v1723_v12 = vpop.f32.mrf.mxu1 }
 0x34e   :  { %v2034_v25 = vsel %vm1996_vm2, %v4528_v0, %v1958_v26  ;;  %v2897_v16 = vadd.f32 -1.0, %v3633_v11  ;;  %v1869_v18 = vmul.f32 1.442695, %v1811_v63  ;;  %v4570_v20 = vadd.f32 %v4457_v9, %v1723_v12 }
 0x34f   :  { %v2072_v5 = vmul.f32 1.050701, %v2034_v25  ;;  %v3198_v34 = vpop.f32.mrf.mxu1 }
 0x350   :  { %v1959_v35 = vmul.f32 1.6732632, %v2897_v16  ;;  %3640 = vpow2.f32 %v1869_v18  ;;  %v1812_v21 = vmin.f32 %v4570_v20, 0.0  ;;  %vm2002_vm8 = vcmp.gt.f32.partialorder %v4570_v20, 0.0 }
 0x351   :  { %v3635_v55 = vpop.eup %3634  ;;  %v1728_v41 = vpop.f32.mrf.mxu1  ;;  %v2102_v27 = vpack.c.bf16 %v2072_v5, %v2071_v17 }
 0x352   :  { %v2898_v3 = vadd.f32 -1.0, %v3635_v55  ;;  %v1871_v29 = vmul.f32 1.442695, %v1812_v21  ;;  %v4574_v31 = vadd.f32 %v4457_v9, %v1728_v41  ;;  %v2035_v47 = vsel %vm1997_vm3, %v4532_v28, %v1959_v35 }
 0x353   :  { %v3201_v0 = vpop.f32.mrf.mxu1  ;;  %3276 = vmatmul.mubr.bf16.gmra.mxu0 %v2102_v27  ;;  %v2073_v38 = vmul.f32 1.050701, %v2035_v47 }
 0x354   :  { %v1960_v49 = vmul.f32 1.6732632, %v2898_v3  ;;  %3642 = vpow2.f32 %v1871_v29  ;;  %v1813_v50 = vmin.f32 %v4574_v31, 0.0  ;;  %3279 = vmatprep.mubr.msk.bf16.mxu0 %vm3870_vm0, %v3869_v37  ;;  %vm2003_vm9 = vcmp.gt.f32.partialorder %v4574_v31, 0.0 }
 0x355   :  { %v3637_v60 = vpop.eup %3636  ;;  %v1731_v52 = vpop.f32.mrf.mxu1 }
 0x356   :  { %v2036_v30 = vsel %vm1998_vm4, %v4542_v39, %v1960_v49  ;;  %v2899_v54 = vadd.f32 -1.0, %v3637_v60  ;;  %v1873_v23 = vmul.f32 1.442695, %v1813_v50  ;;  %v4584_v42 = vadd.f32 %v4457_v9, %v1731_v52 }
 0x357   :  { %v2074_v28 = vmul.f32 1.050701, %v2036_v30  ;;  %v3202_v58 = vpop.f32.mrf.mxu1 }
 0x358   :  { %v1961_v45 = vmul.f32 1.6732632, %v2899_v54  ;;  %3644 = vpow2.f32 %v1873_v23  ;;  %v1814_v43 = vmin.f32 %v4584_v42, 0.0  ;;  %vm2004_vm10 = vcmp.gt.f32.partialorder %v4584_v42, 0.0 }
 0x359   :  { %v3639_v44 = vpop.eup %3638  ;;  %v1736_v22 = vpop.f32.mrf.mxu1  ;;  %v2103_v51 = vpack.c.bf16 %v2074_v28, %v2073_v38 }
 0x35a   :  { %v2900_v19 = vadd.f32 -1.0, %v3639_v44  ;;  %v1875_v53 = vmul.f32 1.442695, %v1814_v43  ;;  %v4588_v33 = vadd.f32 %v4457_v9, %v1736_v22  ;;  %v2037_v4 = vsel %vm1999_vm5, %v4546_v32, %v1961_v45 }
 0x35b   :  { %v3205_v39 = vpop.f32.mrf.mxu1  ;;  %3280 = vmatmul.mubr.bf16.gmra.mxu0 %v2103_v51  ;;  %v2075_v14 = vmul.f32 1.050701, %v2037_v4 }
 0x35c   :  { %v1962_v56 = vmul.f32 1.6732632, %v2900_v19  ;;  %3646 = vpow2.f32 %v1875_v53  ;;  %v1815_v7 = vmin.f32 %v4588_v33, 0.0  ;;  %3283 = vmatprep.mubr.msk.bf16.mxu0 %vm3870_vm0, %v3869_v37  ;;  %vm2005_vm11 = vcmp.gt.f32.partialorder %v4588_v33, 0.0 }
 0x35d   :  { %v3641_v57 = vpop.eup %3640  ;;  %v1739_v36 = vpop.f32.mrf.mxu1 }
 0x35e   :  { %v2038_v8 = vsel %vm2000_vm6, %v4556_v61, %v1962_v56  ;;  %v2901_v62 = vadd.f32 -1.0, %v3641_v57  ;;  %v1877_v46 = vmul.f32 1.442695, %v1815_v7  ;;  %v4598_v13 = vadd.f32 %v4457_v9, %v1739_v36 }
 0x35f   :  { %v2076_v32 = vmul.f32 1.050701, %v2038_v8  ;;  %v3206_v15 = vpop.f32.mrf.mxu1 }
 0x360   :  { %v1963_v1 = vmul.f32 1.6732632, %v2901_v62  ;;  %3648 = vpow2.f32 %v1877_v46  ;;  %v1816_v2 = vmin.f32 %v4598_v13, 0.0  ;;  %vm2006_vm12 = vcmp.gt.f32.partialorder %v4598_v13, 0.0 }
 0x361   :  { %v3643_v59 = vpop.eup %3642  ;;  %v2104_v40 = vpack.c.bf16 %v2076_v32, %v2075_v14  ;;  %v1744_v6 = vpop.f32.mrf.mxu1 }
 0x362   :  { %v2902_v48 = vadd.f32 -1.0, %v3643_v59  ;;  %v1879_v24 = vmul.f32 1.442695, %v1816_v2  ;;  %v4602_v26 = vadd.f32 %v4457_v9, %v1744_v6  ;;  %v2039_v63 = vsel %vm2001_vm7, %v4560_v10, %v1963_v1 }
 0x363   :  { %v3209_v61 = vpop.f32.mrf.mxu1  ;;  %3284 = vmatmul.mubr.bf16.gmra.mxu0 %v2104_v40  ;;  %v2077_v35 = vmul.f32 1.050701, %v2039_v63 }
 0x364   :  { %v1964_v11 = vmul.f32 1.6732632, %v2902_v48  ;;  %3650 = vpow2.f32 %v1879_v24  ;;  %v1817_v12 = vmin.f32 %v4602_v26, 0.0  ;;  %3287 = vmatprep.mubr.msk.bf16.mxu0 %vm3870_vm0, %v3869_v37  ;;  %vm2007_vm13 = vcmp.gt.f32.partialorder %v4602_v26, 0.0 }
 0x365   :  { %v3645_v25 = vpop.eup %3644  ;;  %v1747_v16 = vpop.f32.mrf.mxu1 }
 0x366   :  { %v2040_v18 = vsel %vm2002_vm8, %v4570_v20, %v1964_v11  ;;  %v2903_v17 = vadd.f32 -1.0, %v3645_v25  ;;  %v1881_v5 = vmul.f32 1.442695, %v1817_v12  ;;  %v4612_v34 = vadd.f32 %v4457_v9, %v1747_v16 }
 0x367   :  { %v2078_v10 = vmul.f32 1.050701, %v2040_v18  ;;  %v3210_v21 = vpop.f32.mrf.mxu1 }
 0x368   :  { %v1965_v55 = vmul.f32 1.6732632, %v2903_v17  ;;  %3652 = vpow2.f32 %v1881_v5  ;;  %v1818_v41 = vmin.f32 %v4612_v34, 0.0  ;;  %vm2008_vm14 = vcmp.gt.f32.partialorder %v4612_v34, 0.0 }
 0x369   :  { %v3647_v27 = vpop.eup %3646  ;;  %v2105_v3 = vpack.c.bf16 %v2078_v10, %v2077_v35  ;;  %v1752_v29 = vpop.f32.mrf.mxu1 }
 0x36a   :  { %v2904_v0 = vadd.f32 -1.0, %v3647_v27  ;;  %v1883_v47 = vmul.f32 1.442695, %v1818_v41  ;;  %v4616_v49 = vadd.f32 %v4457_v9, %v1752_v29  ;;  %v2041_v50 = vsel %vm2003_vm9, %v4574_v31, %v1965_v55 }
 0x36b   :  { %v3213_v20 = vpop.f32.mrf.mxu1  ;;  %3288 = vmatmul.mubr.bf16.gmra.mxu0 %v2105_v3  ;;  %v2079_v45 = vmul.f32 1.050701, %v2041_v50 }
 0x36c   :  { %v1966_v60 = vmul.f32 1.6732632, %v2904_v0  ;;  %3654 = vpow2.f32 %v1883_v47  ;;  %v1819_v52 = vmin.f32 %v4616_v49, 0.0  ;;  %3291 = vmatprep.mubr.msk.bf16.mxu0 %vm3870_vm0, %v3869_v37  ;;  %vm2009_vm15 = vcmp.gt.f32.partialorder %v4616_v49, 0.0 }
 0x36d   :  { %v3649_v30 = vpop.eup %3648  ;;  %v1755_v54 = vpop.f32.mrf.mxu1 }
 0x36e   :  { %v2042_v23 = vsel %vm2004_vm10, %v4584_v42, %v1966_v60  ;;  %v2905_v38 = vadd.f32 -1.0, %v3649_v30  ;;  %v1885_v28 = vmul.f32 1.442695, %v1819_v52  ;;  %v4626_v58 = vadd.f32 %v4457_v9, %v1755_v54 }
 0x36f   :  { %v2080_v31 = vmul.f32 1.050701, %v2042_v23  ;;  %v3214_v43 = vpop.f32.mrf.mxu1 }
 0x370   :  { %v1967_v44 = vmul.f32 1.6732632, %v2905_v38  ;;  %3656 = vpow2.f32 %v1885_v28  ;;  %v1820_v22 = vmin.f32 %v4626_v58, 0.0  ;;  %vm2010_vm1 = vcmp.gt.f32.partialorder %v4626_v58, 0.0 }
 0x371   :  { %v3651_v51 = vpop.eup %3650  ;;  %v2106_v19 = vpack.c.bf16 %v2080_v31, %v2079_v45  ;;  %v1760_v53 = vpop.f32.mrf.mxu1 }
 0x372   :  { %v2906_v39 = vadd.f32 -1.0, %v3651_v51  ;;  %v1887_v4 = vmul.f32 1.442695, %v1820_v22  ;;  %v4630_v56 = vadd.f32 %v4457_v9, %v1760_v53  ;;  %v2043_v7 = vsel %vm2005_vm11, %v4588_v33, %v1967_v44 }
 0x373   :  { %v3217_v42 = vpop.f32.mrf.mxu1  ;;  %3292 = vmatmul.mubr.bf16.gmra.mxu0 %v2106_v19  ;;  %v2081_v1 = vmul.f32 1.050701, %v2043_v7 }
 0x374   :  { %v1968_v57 = vmul.f32 1.6732632, %v2906_v39  ;;  %3658 = vpow2.f32 %v1887_v4  ;;  %v1821_v36 = vmin.f32 %v4630_v56, 0.0  ;;  %3295 = vmatprep.mubr.msk.bf16.mxu0 %vm3870_vm0, %v3869_v37  ;;  %vm2011_vm2 = vcmp.gt.f32.partialorder %v4630_v56, 0.0 }
 0x375   :  { %v3653_v8 = vpop.eup %3652  ;;  %v1763_v62 = vpop.f32.mrf.mxu1 }
 0x376   :  { %v2044_v46 = vsel %vm2006_vm12, %v4598_v13, %v1968_v57  ;;  %v2907_v14 = vadd.f32 -1.0, %v3653_v8  ;;  %v1889_v32 = vmul.f32 1.442695, %v1821_v36  ;;  %v4640_v15 = vadd.f32 %v4457_v9, %v1763_v62 }
 0x377   :  { %v2082_v33 = vmul.f32 1.050701, %v2044_v46  ;;  %v3218_v2 = vpop.f32.mrf.mxu1 }
 0x378   :  { %v1969_v59 = vmul.f32 1.6732632, %v2907_v14  ;;  %3660 = vpow2.f32 %v1889_v32  ;;  %v1822_v40 = vmin.f32 %v4640_v15, 0.0  ;;  %vm2012_vm3 = vcmp.gt.f32.partialorder %v4640_v15, 0.0 }
 0x379   :  { %v3655_v6 = vpop.eup %3654  ;;  %v2107_v48 = vpack.c.bf16 %v2082_v33, %v2081_v1  ;;  %v1768_v24 = vpop.f32.mrf.mxu1 }
 0x37a   :  { %v2908_v61 = vadd.f32 -1.0, %v3655_v6  ;;  %v1891_v63 = vmul.f32 1.442695, %v1822_v40  ;;  %v4644_v11 = vadd.f32 %v4457_v9, %v1768_v24  ;;  %v2045_v12 = vsel %vm2007_vm13, %v4602_v26, %v1969_v59 }
 0x37b   :  { %v3221_v13 = vpop.f32.mrf.mxu1  ;;  %3296 = vmatmul.mubr.bf16.gmra.mxu0 %v2107_v48  ;;  %v2083_v55 = vmul.f32 1.050701, %v2045_v12 }
 0x37c   :  { %v1970_v25 = vmul.f32 1.6732632, %v2908_v61  ;;  %3662 = vpow2.f32 %v1891_v63  ;;  %v1823_v16 = vmin.f32 %v4644_v11, 0.0  ;;  %3299 = vmatprep.mubr.msk.bf16.mxu0 %vm3870_vm0, %v3869_v37  ;;  %vm2013_vm4 = vcmp.gt.f32.partialorder %v4644_v11, 0.0 }
 0x37d   :  { %v3657_v18 = vpop.eup %3656  ;;  %v1771_v17 = vpop.f32.mrf.mxu1 }
 0x37e   :  { %v2046_v5 = vsel %vm2008_vm14, %v4612_v34, %v1970_v25  ;;  %v2909_v35 = vadd.f32 -1.0, %v3657_v18  ;;  %v1893_v10 = vmul.f32 1.442695, %v1823_v16  ;;  %v4654_v21 = vadd.f32 %v4457_v9, %v1771_v17 }
 0x37f   :  { %v2084_v26 = vmul.f32 1.050701, %v2046_v5  ;;  %v3222_v41 = vpop.f32.mrf.mxu1 }
 0x380   :  { %v1971_v27 = vmul.f32 1.6732632, %v2909_v35  ;;  %3664 = vpow2.f32 %v1893_v10  ;;  %v1824_v3 = vmin.f32 %v4654_v21, 0.0  ;;  %vm2014_vm5 = vcmp.gt.f32.partialorder %v4654_v21, 0.0 }
 0x381   :  { %v3659_v29 = vpop.eup %3658  ;;  %v2108_v0 = vpack.c.bf16 %v2084_v26, %v2083_v55  ;;  %v1776_v47 = vpop.f32.mrf.mxu1 }
 0x382   :  { %v2910_v20 = vadd.f32 -1.0, %v3659_v29  ;;  %v1895_v50 = vmul.f32 1.442695, %v1824_v3  ;;  %v4658_v60 = vadd.f32 %v4457_v9, %v1776_v47  ;;  %v2047_v52 = vsel %vm2009_vm15, %v4616_v49, %v1971_v27 }
 0x383   :  { %v3225_v34 = vpop.f32.mrf.mxu1  ;;  %3300 = vmatmul.mubr.bf16.gmra.mxu0 %v2108_v0  ;;  %v2085_v44 = vmul.f32 1.050701, %v2047_v52 }
 0x384   :  { %v1972_v30 = vmul.f32 1.6732632, %v2910_v20  ;;  %3666 = vpow2.f32 %v1895_v50  ;;  %v1825_v54 = vmin.f32 %v4658_v60, 0.0  ;;  %3303 = vmatprep.mubr.msk.bf16.mxu0 %vm3870_vm0, %v3869_v37  ;;  %vm2015_vm6 = vcmp.gt.f32.partialorder %v4658_v60, 0.0 }
 0x385   :  { %v3661_v23 = vpop.eup %3660  ;;  %v1779_v38 = vpop.f32.mrf.mxu1 }
 0x386   :  { %v2048_v28 = vsel %vm2010_vm1, %v4626_v58, %v1972_v30  ;;  %v2911_v45 = vadd.f32 -1.0, %v3661_v23  ;;  %v1897_v31 = vmul.f32 1.442695, %v1825_v54  ;;  %v1780_v43 = vadd.f32 %v4457_v9, %v1779_v38  ;;  %v4689_v38 = vld [vmem:[%s4896_s6] ss:$0 sm:$0xff]  ;;  %s3871_s6 = smov [#allocation10]  }
 0x387   :  { %v2086_v22 = vmul.f32 1.050701, %v2048_v28  ;;  %v3226_v49 = vpop.f32.mrf.mxu1  ;;  %s2717_s27 = sshll.u32 %s3871_s6, 4  ;;  %s2718_s27 = int_to_ptr.vmem [resolvable:$true] %s2717_s27 }
 0x388   :  { %v1973_v51 = vmul.f32 1.6732632, %v2911_v45  ;;  %3668 = vpow2.f32 %v1897_v31  ;;  %v1826_v19 = vmin.f32 %v1780_v43, 0.0  ;;  %vm2016_vm7 = vcmp.gt.f32.partialorder %v1780_v43, 0.0  ;;  %s3832_s28 = scalar_lea.vmem %s2718_s27, 4864  ;;  %p3837_p7 = scmp.lt.s32.totalorder %s2718_s27, %s2718_s27 }
 0x389   :  { %v3663_v53 = vpop.eup %3662  ;;  %v2109_v39 = vpack.c.bf16 %v2086_v22, %v2085_v44  ;;  %v1784_v4 = vpop.f32.mrf.mxu1  ;;  %p3833_p6 = scmp.ne.s32.totalorder %s2718_s27, %s3832_s28  ;;  %p3838_p8 = scmp.lt.s32.totalorder %s3832_s28, %s3832_s28 }
 0x38a   :  { %v2912_v42 = vadd.f32 -1.0, %v3663_v53  ;;  %v1899_v7 = vmul.f32 1.442695, %v1826_v19  ;;  %v1785_v57 = vadd.f32 %v4457_v9, %v1784_v4  ;;  %v2049_v36 = vsel %vm2011_vm2, %v4630_v56, %v1973_v51 }
 0x38b   :  { %v3229_v58 = vpop.f32.mrf.mxu1  ;;  %3304 = vmatmul.mubr.bf16.gmra.mxu0 %v2109_v39  ;;  %v2087_v59 = vmul.f32 1.050701, %v2049_v36  ;;  %p3839_p9 = por %p3838_p8, %p3837_p7 }
 0x38c   :  { %v1974_v8 = vmul.f32 1.6732632, %v2912_v42  ;;  %3670 = vpow2.f32 %v1899_v7  ;;  %v1827_v62 = vmin.f32 %v1785_v57, 0.0  ;;  %3307 = vmatprep.mubr.msk.bf16.mxu0 %vm3870_vm0, %v3869_v37  ;;  %vm2017_vm8 = vcmp.gt.f32.partialorder %v1785_v57, 0.0 }
 0x38d   :  { %v3665_v46 = vpop.eup %3664  ;;  %v1787_v14 = vpop.f32.mrf.mxu1  ;;  %p3840_p10 = pnand %p3839_p9, %p3833_p6 }
 0x38e   :  { %v2050_v32 = vsel %vm2012_vm3, %v4640_v15, %v1974_v8  ;;  %v2913_v1 = vadd.f32 -1.0, %v3665_v46  ;;  %v1901_v33 = vmul.f32 1.442695, %v1827_v62  ;;  %v1788_v2 = vadd.f32 %v4457_v9, %v1787_v14 }
 0x38f   :  { %v2088_v40 = vmul.f32 1.050701, %v2050_v32  ;;  %v3230_v6 = vpop.f32.mrf.mxu1 }
 0x390   :  { %v1975_v56 = vmul.f32 1.6732632, %v2913_v1  ;;  %3672 = vpow2.f32 %v1901_v33  ;;  %v1828_v48 = vmin.f32 %v1788_v2, 0.0  ;;  %vm2018_vm9 = vcmp.gt.f32.partialorder %v1788_v2, 0.0 }
 0x391   :  { %v3667_v24 = vpop.eup %3666  ;;  %v2110_v61 = vpack.c.bf16 %v2088_v40, %v2087_v59 }
 0x392   :  { %v2914_v63 = vadd.f32 -1.0, %v3667_v24  ;;  %v1903_v13 = vmul.f32 1.442695, %v1828_v48  ;;  %v2051_v12 = vsel %vm2013_vm4, %v4644_v11, %v1975_v56 }
 0x393   :  { %3308 = vmatmul.mubr.bf16.gmra.mxu0 %v2110_v61  ;;  %v2089_v18 = vmul.f32 1.050701, %v2051_v12 }
 0x394   :  { %v1976_v15 = vmul.f32 1.6732632, %v2914_v63  ;;  %3674 = vpow2.f32 %v1903_v13  ;;  %3311 = vmatprep.mubr.msk.bf16.mxu0 %vm3870_vm0, %v3869_v37 }
 0x395   :  { %v3669_v9 = vpop.eup %3668 }
 0x396   :  { %v2052_v25 = vsel %vm2014_vm5, %v4654_v21, %v1976_v15  ;;  %v2915_v16 = vadd.f32 -1.0, %v3669_v9 }
 0x397   :  { %v2090_v17 = vmul.f32 1.050701, %v2052_v25 }
 0x398   :  { %v1977_v5 = vmul.f32 1.6732632, %v2915_v16 }
 0x399   :  { %v3671_v35 = vpop.eup %3670  ;;  %v2111_v10 = vpack.c.bf16 %v2090_v17, %v2089_v18 }
 0x39a   :  { %v2916_v55 = vadd.f32 -1.0, %v3671_v35  ;;  %v2053_v11 = vsel %vm2015_vm6, %v4658_v60, %v1977_v5 }
 0x39b   :  { %3312 = vmatmul.mubr.bf16.gmra.mxu0 %v2111_v10  ;;  %v2091_v29 = vmul.f32 1.050701, %v2053_v11 }
 0x39c   :  { %v1978_v26 = vmul.f32 1.6732632, %v2916_v55 }
 0x39d   :  { %v3673_v41 = vpop.eup %3672 }
 0x39e   :  { %v2054_v27 = vsel %vm2016_vm7, %v1780_v43, %v1978_v26  ;;  %v2917_v3 = vadd.f32 -1.0, %v3673_v41 }
 0x39f   :  { %v2092_v0 = vmul.f32 1.050701, %v2054_v27 }
 0x3a0   :  { %v1979_v21 = vmul.f32 1.6732632, %v2917_v3 }
 0x3a1   :  { %v3675_v47 = vpop.eup %3674  ;;  %v2112_v20 = vpack.c.bf16 %v2092_v0, %v2091_v29 }
 0x3a2   :  { %v2918_v50 = vadd.f32 -1.0, %v3675_v47  ;;  %v2055_v34 = vsel %vm2017_vm8, %v1785_v57, %v1979_v21 }
 0x3a3   :  { %3316 = vmatmul.mubr.bf16.vlgmr.msra.gmra.mxu1 %v2112_v20  ;;  %v2093_v30 = vmul.f32 1.050701, %v2055_v34 }
 0x3a4   :  { %v1980_v52 = vmul.f32 1.6732632, %v2918_v50  ;;  %3319 = vmatprep.mubr.msk.bf16.mxu1 %vm3870_vm0, %v3869_v37 }
 0x3a6   :  { %v2056_v60 = vsel %vm2018_vm9, %v1788_v2, %v1980_v52 }
 0x3a7   :  { %v2094_v54 = vmul.f32 1.050701, %v2056_v60 }
 0x3a9   :  { %v2113_v23 = vpack.c.bf16 %v2094_v54, %v2093_v30 }
 0x3ab   :  { %3320 = vmatmul.mubr.bf16.gmra.mxu1 %v2113_v23 }
 0x3db   :  { %v2219_v28 = vpop.f32.mrf.mxu0 }
 0x3dc   :  { %v2220_v45 = vadd.f32 %v4689_v38, %v2219_v28 }
 0x3dd   :  { %v3249_v31 = vpop.f32.mrf.mxu0 }
 0x3de   :  { %v2370_v43 = vmin.f32 %v2220_v45, 0.0  ;;  %vm2560_vm0 = vcmp.gt.f32.partialorder %v2220_v45, 0.0 }
 0x3df   :  { %v2222_v44 = vpop.f32.mrf.mxu0 }
 0x3e0   :  { %v2408_v22 = vmul.f32 1.442695, %v2370_v43  ;;  %v2223_v37 = vadd.f32 %v4689_v38, %v2222_v44 }
 0x3e1   :  { %v3250_v49 = vpop.f32.mrf.mxu0 }
 0x3e2   :  { %3676 = vpow2.f32 %v2408_v22  ;;  %v2371_v51 = vmin.f32 %v2223_v37, 0.0  ;;  %vm2561_vm10 = vcmp.gt.f32.partialorder %v2223_v37, 0.0 }
 0x3e3   :  { %v2227_v19 = vpop.f32.mrf.mxu0 }
 0x3e4   :  { %v2410_v53 = vmul.f32 1.442695, %v2371_v51  ;;  %v2228_v39 = vadd.f32 %v4689_v38, %v2227_v19 }
 0x3e5   :  { %v3253_v4 = vpop.f32.mrf.mxu0 }
 0x3e6   :  { %3678 = vpow2.f32 %v2410_v53  ;;  %v2372_v42 = vmin.f32 %v2228_v39, 0.0  ;;  %vm2562_vm11 = vcmp.gt.f32.partialorder %v2228_v39, 0.0 }
 0x3e7   :  { %v2230_v7 = vpop.f32.mrf.mxu0 }
 0x3e8   :  { %v2412_v57 = vmul.f32 1.442695, %v2372_v42  ;;  %v2231_v58 = vadd.f32 %v4689_v38, %v2230_v7 }
 0x3e9   :  { %v3254_v36 = vpop.f32.mrf.mxu0 }
 0x3ea   :  { %3680 = vpow2.f32 %v2412_v57  ;;  %v2373_v8 = vmin.f32 %v2231_v58, 0.0  ;;  %vm2563_vm12 = vcmp.gt.f32.partialorder %v2231_v58, 0.0 }
 0x3eb   :  { %v2235_v62 = vpop.f32.mrf.mxu0 }
 0x3ec   :  { %v2414_v46 = vmul.f32 1.442695, %v2373_v8  ;;  %v4696_v14 = vadd.f32 %v4689_v38, %v2235_v62 }
 0x3ed   :  { %v3257_v32 = vpop.f32.mrf.mxu0 }
 0x3ee   :  { %3682 = vpow2.f32 %v2414_v46  ;;  %v2374_v1 = vmin.f32 %v4696_v14, 0.0  ;;  %vm2564_vm13 = vcmp.gt.f32.partialorder %v4696_v14, 0.0 }
 0x3ef   :  { %v3677_v33 = vpop.eup %3676  ;;  %v2238_v2 = vpop.f32.mrf.mxu0 }
 0x3f0   :  { %v2928_v59 = vadd.f32 -1.0, %v3677_v33  ;;  %v2416_v40 = vmul.f32 1.442695, %v2374_v1  ;;  %v4700_v6 = vadd.f32 %v4689_v38, %v2238_v2 }
 0x3f1   :  { %v3258_v56 = vpop.f32.mrf.mxu0 }
 0x3f2   :  { %v2522_v48 = vmul.f32 1.6732632, %v2928_v59  ;;  %3684 = vpow2.f32 %v2416_v40  ;;  %v2375_v24 = vmin.f32 %v4700_v6, 0.0  ;;  %vm2565_vm14 = vcmp.gt.f32.partialorder %v4700_v6, 0.0 }
 0x3f3   :  { %v3679_v61 = vpop.eup %3678  ;;  %v2243_v63 = vpop.f32.mrf.mxu0 }
 0x3f4   :  { %v2598_v13 = vsel %vm2560_vm0, %v2220_v45, %v2522_v48  ;;  %v2929_v12 = vadd.f32 -1.0, %v3679_v61  ;;  %v2418_v15 = vmul.f32 1.442695, %v2375_v24  ;;  %v4704_v9 = vadd.f32 %v4689_v38, %v2243_v63 }
 0x3f5   :  { %v2636_v25 = vmul.f32 1.050701, %v2598_v13  ;;  %v3261_v16 = vpop.f32.mrf.mxu0 }
 0x3f6   :  { %v2523_v18 = vmul.f32 1.6732632, %v2929_v12  ;;  %3686 = vpow2.f32 %v2418_v15  ;;  %v2376_v17 = vmin.f32 %v4704_v9, 0.0  ;;  %vm2566_vm15 = vcmp.gt.f32.partialorder %v4704_v9, 0.0 }
 0x3f7   :  { %v3681_v5 = vpop.eup %3680  ;;  %2674 = vst [vmem:[#allocation10] sm:$0xff] %v2636_v25  ;;  %v2246_v35 = vpop.f32.mrf.mxu0 }
 0x3f8   :  { %v2599_v10 = vsel %vm2561_vm10, %v2223_v37, %v2523_v18  ;;  %v2930_v55 = vadd.f32 -1.0, %v3681_v5  ;;  %v2420_v11 = vmul.f32 1.442695, %v2376_v17  ;;  %v4708_v26 = vadd.f32 %v4689_v38, %v2246_v35 }
 0x3f9   :  { %v2637_v41 = vmul.f32 1.050701, %v2599_v10  ;;  %v3262_v27 = vpop.f32.mrf.mxu0 }
 0x3fa   :  { %v2524_v3 = vmul.f32 1.6732632, %v2930_v55  ;;  %3688 = vpow2.f32 %v2420_v11  ;;  %v2377_v29 = vmin.f32 %v4708_v26, 0.0  ;;  %vm2567_vm1 = vcmp.gt.f32.partialorder %v4708_v26, 0.0 }
 0x3fb   :  { %v3683_v0 = vpop.eup %3682  ;;  %2675 = vst [vmem:[#allocation10 + $0x8] sm:$0xff] %v2637_v41  ;;  %v2251_v21 = vpop.f32.mrf.mxu0 }
 0x3fc   :  { %v2600_v47 = vsel %vm2562_vm11, %v2228_v39, %v2524_v3  ;;  %v2931_v20 = vadd.f32 -1.0, %v3683_v0  ;;  %v2422_v50 = vmul.f32 1.442695, %v2377_v29  ;;  %v4712_v34 = vadd.f32 %v4689_v38, %v2251_v21 }
 0x3fd   :  { %v2638_v52 = vmul.f32 1.050701, %v2600_v47  ;;  %v3265_v60 = vpop.f32.mrf.mxu0 }
 0x3fe   :  { %v2525_v30 = vmul.f32 1.6732632, %v2931_v20  ;;  %3690 = vpow2.f32 %v2422_v50  ;;  %v2378_v54 = vmin.f32 %v4712_v34, 0.0  ;;  %vm2568_vm2 = vcmp.gt.f32.partialorder %v4712_v34, 0.0 }
 0x3ff   :  { %v3685_v23 = vpop.eup %3684  ;;  %2676 = vst [vmem:[#allocation10 + $0x10] sm:$0xff] %v2638_v52  ;;  %v2254_v28 = vpop.f32.mrf.mxu0 }
 0x400   :  { %v2601_v45 = vsel %vm2563_vm12, %v2231_v58, %v2525_v30  ;;  %v2932_v31 = vadd.f32 -1.0, %v3685_v23  ;;  %v2424_v43 = vmul.f32 1.442695, %v2378_v54  ;;  %v4716_v44 = vadd.f32 %v4689_v38, %v2254_v28 }
 0x401   :  { %v2639_v22 = vmul.f32 1.050701, %v2601_v45  ;;  %v3266_v37 = vpop.f32.mrf.mxu0 }
 0x402   :  { %v2526_v49 = vmul.f32 1.6732632, %v2932_v31  ;;  %3692 = vpow2.f32 %v2424_v43  ;;  %v2379_v51 = vmin.f32 %v4716_v44, 0.0  ;;  %vm2569_vm3 = vcmp.gt.f32.partialorder %v4716_v44, 0.0 }
 0x403   :  { %v3687_v19 = vpop.eup %3686  ;;  %2677 = vst [vmem:[#allocation10 + $0x18] sm:$0xff] %v2639_v22  ;;  %v2259_v53 = vpop.f32.mrf.mxu0 }
 0x404   :  { %v2602_v39 = vsel %vm2564_vm13, %v4696_v14, %v2526_v49  ;;  %v2933_v4 = vadd.f32 -1.0, %v3687_v19  ;;  %v2426_v42 = vmul.f32 1.442695, %v2379_v51  ;;  %v4722_v7 = vadd.f32 %v4689_v38, %v2259_v53 }
 0x405   :  { %v2640_v57 = vmul.f32 1.050701, %v2602_v39  ;;  %v3269_v58 = vpop.f32.mrf.mxu0 }
 0x406   :  { %v2527_v36 = vmul.f32 1.6732632, %v2933_v4  ;;  %3694 = vpow2.f32 %v2426_v42  ;;  %v2380_v8 = vmin.f32 %v4722_v7, 0.0  ;;  %vm2570_vm4 = vcmp.gt.f32.partialorder %v4722_v7, 0.0 }
 0x407   :  { %v3689_v62 = vpop.eup %3688  ;;  %2678 = vst [vmem:[#allocation10 + $0x20] sm:$0xff] %v2640_v57  ;;  %v2262_v46 = vpop.f32.mrf.mxu0 }
 0x408   :  { %v2603_v32 = vsel %vm2565_vm14, %v4700_v6, %v2527_v36  ;;  %v2934_v1 = vadd.f32 -1.0, %v3689_v62  ;;  %v2428_v14 = vmul.f32 1.442695, %v2380_v8  ;;  %v4728_v33 = vadd.f32 %v4689_v38, %v2262_v46 }
 0x409   :  { %v2641_v2 = vmul.f32 1.050701, %v2603_v32  ;;  %v3270_v59 = vpop.f32.mrf.mxu0 }
 0x40a   :  { %v2528_v40 = vmul.f32 1.6732632, %v2934_v1  ;;  %3696 = vpow2.f32 %v2428_v14  ;;  %v2381_v56 = vmin.f32 %v4728_v33, 0.0  ;;  %vm2571_vm5 = vcmp.gt.f32.partialorder %v4728_v33, 0.0 }
 0x40b   :  { %v3691_v48 = vpop.eup %3690  ;;  %2679 = vst [vmem:[#allocation10 + $0x28] sm:$0xff] %v2641_v2  ;;  %v2267_v24 = vpop.f32.mrf.mxu0 }
 0x40c   :  { %v2604_v61 = vsel %vm2566_vm15, %v4704_v9, %v2528_v40  ;;  %v2935_v63 = vadd.f32 -1.0, %v3691_v48  ;;  %v2430_v6 = vmul.f32 1.442695, %v2381_v56  ;;  %v4734_v13 = vadd.f32 %v4689_v38, %v2267_v24 }
 0x40d   :  { %v2642_v12 = vmul.f32 1.050701, %v2604_v61  ;;  %v3273_v15 = vpop.f32.mrf.mxu0 }
 0x40e   :  { %v2529_v25 = vmul.f32 1.6732632, %v2935_v63  ;;  %3698 = vpow2.f32 %v2430_v6  ;;  %v2382_v16 = vmin.f32 %v4734_v13, 0.0  ;;  %vm2572_vm6 = vcmp.gt.f32.partialorder %v4734_v13, 0.0 }
 0x40f   :  { %v3693_v18 = vpop.eup %3692  ;;  %2680 = vst [vmem:[#allocation10 + $0x30] sm:$0xff] %v2642_v12  ;;  %v2270_v17 = vpop.f32.mrf.mxu0 }
 0x410   :  { %v2605_v5 = vsel %vm2567_vm1, %v4708_v26, %v2529_v25  ;;  %v2936_v35 = vadd.f32 -1.0, %v3693_v18  ;;  %v2432_v9 = vmul.f32 1.442695, %v2382_v16  ;;  %v4740_v10 = vadd.f32 %v4689_v38, %v2270_v17 }
 0x411   :  { %v2643_v55 = vmul.f32 1.050701, %v2605_v5  ;;  %v3274_v11 = vpop.f32.mrf.mxu0 }
 0x412   :  { %v2530_v41 = vmul.f32 1.6732632, %v2936_v35  ;;  %3700 = vpow2.f32 %v2432_v9  ;;  %v2383_v27 = vmin.f32 %v4740_v10, 0.0  ;;  %vm2573_vm7 = vcmp.gt.f32.partialorder %v4740_v10, 0.0 }
 0x413   :  { %v3695_v3 = vpop.eup %3694  ;;  %2681 = vst [vmem:[#allocation10 + $0x38] sm:$0xff] %v2643_v55  ;;  %v2275_v29 = vpop.f32.mrf.mxu0 }
 0x414   :  { %v2606_v0 = vsel %vm2568_vm2, %v4712_v34, %v2530_v41  ;;  %v2937_v21 = vadd.f32 -1.0, %v3695_v3  ;;  %v2434_v26 = vmul.f32 1.442695, %v2383_v27  ;;  %v4746_v47 = vadd.f32 %v4689_v38, %v2275_v29 }
 0x415   :  { %v2644_v20 = vmul.f32 1.050701, %v2606_v0  ;;  %v3277_v50 = vpop.f32.mrf.mxu0 }
 0x416   :  { %v2531_v52 = vmul.f32 1.6732632, %v2937_v21  ;;  %3702 = vpow2.f32 %v2434_v26  ;;  %v2384_v60 = vmin.f32 %v4746_v47, 0.0  ;;  %vm2574_vm8 = vcmp.gt.f32.partialorder %v4746_v47, 0.0 }
 0x417   :  { %v3697_v30 = vpop.eup %3696  ;;  %2682 = vst [vmem:[#allocation10 + $0x40] sm:$0xff] %v2644_v20  ;;  %v2278_v54 = vpop.f32.mrf.mxu0 }
 0x418   :  { %v2607_v23 = vsel %vm2569_vm3, %v4716_v44, %v2531_v52  ;;  %v2938_v28 = vadd.f32 -1.0, %v3697_v30  ;;  %v2436_v34 = vmul.f32 1.442695, %v2384_v60  ;;  %v4752_v45 = vadd.f32 %v4689_v38, %v2278_v54 }
 0x419   :  { %v2645_v31 = vmul.f32 1.050701, %v2607_v23  ;;  %v3278_v43 = vpop.f32.mrf.mxu0 }
 0x41a   :  { %v2532_v22 = vmul.f32 1.6732632, %v2938_v28  ;;  %3704 = vpow2.f32 %v2436_v34  ;;  %v2385_v37 = vmin.f32 %v4752_v45, 0.0  ;;  %vm2575_vm9 = vcmp.gt.f32.partialorder %v4752_v45, 0.0 }
 0x41b   :  { %v3699_v49 = vpop.eup %3698  ;;  %2683 = vst [vmem:[#allocation10 + $0x48] sm:$0xff] %v2645_v31  ;;  %v2283_v51 = vpop.f32.mrf.mxu0 }
 0x41c   :  { %v2608_v19 = vsel %vm2570_vm4, %v4722_v7, %v2532_v22  ;;  %v2939_v53 = vadd.f32 -1.0, %v3699_v49  ;;  %v2438_v44 = vmul.f32 1.442695, %v2385_v37  ;;  %v4758_v39 = vadd.f32 %v4689_v38, %v2283_v51 }
 0x41d   :  { %v2646_v4 = vmul.f32 1.050701, %v2608_v19  ;;  %v3281_v42 = vpop.f32.mrf.mxu0 }
 0x41e   :  { %v2533_v57 = vmul.f32 1.6732632, %v2939_v53  ;;  %3706 = vpow2.f32 %v2438_v44  ;;  %v2386_v58 = vmin.f32 %v4758_v39, 0.0  ;;  %vm2576_vm0 = vcmp.gt.f32.partialorder %v4758_v39, 0.0 }
 0x41f   :  { %v3701_v36 = vpop.eup %3700  ;;  %2684 = vst [vmem:[#allocation10 + $0x50] sm:$0xff] %v2646_v4  ;;  %v2286_v8 = vpop.f32.mrf.mxu0 }
 0x420   :  { %v2609_v62 = vsel %vm2571_vm5, %v4728_v33, %v2533_v57  ;;  %v2940_v46 = vadd.f32 -1.0, %v3701_v36  ;;  %v2440_v7 = vmul.f32 1.442695, %v2386_v58  ;;  %v4764_v32 = vadd.f32 %v4689_v38, %v2286_v8 }
 0x421   :  { %v2647_v1 = vmul.f32 1.050701, %v2609_v62  ;;  %v3282_v14 = vpop.f32.mrf.mxu0 }
 0x422   :  { %v2534_v2 = vmul.f32 1.6732632, %v2940_v46  ;;  %3708 = vpow2.f32 %v2440_v7  ;;  %v2387_v59 = vmin.f32 %v4764_v32, 0.0  ;;  %vm2577_vm10 = vcmp.gt.f32.partialorder %v4764_v32, 0.0 }
 0x423   :  { %v3703_v40 = vpop.eup %3702  ;;  %2685 = vst [vmem:[#allocation10 + $0x58] sm:$0xff] %v2647_v1  ;;  %v2291_v56 = vpop.f32.mrf.mxu0 }
 0x424   :  { %v2610_v48 = vsel %vm2572_vm6, %v4734_v13, %v2534_v2  ;;  %v2941_v24 = vadd.f32 -1.0, %v3703_v40  ;;  %v2442_v33 = vmul.f32 1.442695, %v2387_v59  ;;  %v4770_v61 = vadd.f32 %v4689_v38, %v2291_v56 }
 0x425   :  { %v2648_v63 = vmul.f32 1.050701, %v2610_v48  ;;  %v3285_v6 = vpop.f32.mrf.mxu0 }
 0x426   :  { %v2535_v12 = vmul.f32 1.6732632, %v2941_v24  ;;  %3710 = vpow2.f32 %v2442_v33  ;;  %v2388_v15 = vmin.f32 %v4770_v61, 0.0  ;;  %vm2578_vm11 = vcmp.gt.f32.partialorder %v4770_v61, 0.0 }
 0x427   :  { %v3705_v25 = vpop.eup %3704  ;;  %2686 = vst [vmem:[#allocation10 + $0x60] sm:$0xff] %v2648_v63  ;;  %v2294_v16 = vpop.f32.mrf.mxu0 }
 0x428   :  { %v2611_v18 = vsel %vm2573_vm7, %v4740_v10, %v2535_v12  ;;  %v2942_v17 = vadd.f32 -1.0, %v3705_v25  ;;  %v2444_v13 = vmul.f32 1.442695, %v2388_v15  ;;  %v4776_v5 = vadd.f32 %v4689_v38, %v2294_v16 }
 0x429   :  { %v2649_v35 = vmul.f32 1.050701, %v2611_v18  ;;  %v3286_v9 = vpop.f32.mrf.mxu0 }
 0x42a   :  { %v2536_v55 = vmul.f32 1.6732632, %v2942_v17  ;;  %3712 = vpow2.f32 %v2444_v13  ;;  %v2389_v11 = vmin.f32 %v4776_v5, 0.0  ;;  %vm2579_vm12 = vcmp.gt.f32.partialorder %v4776_v5, 0.0 }
 0x42b   :  { %v3707_v41 = vpop.eup %3706  ;;  %2687 = vst [vmem:[#allocation10 + $0x68] sm:$0xff] %v2649_v35  ;;  %v2299_v27 = vpop.f32.mrf.mxu0 }
 0x42c   :  { %v2612_v3 = vsel %vm2574_vm8, %v4746_v47, %v2536_v55  ;;  %v2943_v29 = vadd.f32 -1.0, %v3707_v41  ;;  %v2446_v10 = vmul.f32 1.442695, %v2389_v11  ;;  %v4782_v0 = vadd.f32 %v4689_v38, %v2299_v27 }
 0x42d   :  { %v2650_v21 = vmul.f32 1.050701, %v2612_v3  ;;  %v3289_v26 = vpop.f32.mrf.mxu0 }
 0x42e   :  { %v2537_v20 = vmul.f32 1.6732632, %v2943_v29  ;;  %3714 = vpow2.f32 %v2446_v10  ;;  %v2390_v50 = vmin.f32 %v4782_v0, 0.0  ;;  %vm2580_vm13 = vcmp.gt.f32.partialorder %v4782_v0, 0.0 }
 0x42f   :  { %v3709_v52 = vpop.eup %3708  ;;  %2688 = vst [vmem:[#allocation10 + $0x70] sm:$0xff] %v2650_v21  ;;  %v2302_v60 = vpop.f32.mrf.mxu0 }
 0x430   :  { %v2613_v30 = vsel %vm2575_vm9, %v4752_v45, %v2537_v20  ;;  %v2944_v54 = vadd.f32 -1.0, %v3709_v52  ;;  %v2448_v47 = vmul.f32 1.442695, %v2390_v50  ;;  %v4788_v23 = vadd.f32 %v4689_v38, %v2302_v60 }
 0x431   :  { %v2651_v28 = vmul.f32 1.050701, %v2613_v30  ;;  %v3290_v34 = vpop.f32.mrf.mxu0 }
 0x432   :  { %v2538_v31 = vmul.f32 1.6732632, %v2944_v54  ;;  %3716 = vpow2.f32 %v2448_v47  ;;  %v2391_v43 = vmin.f32 %v4788_v23, 0.0  ;;  %vm2581_vm14 = vcmp.gt.f32.partialorder %v4788_v23, 0.0 }
 0x433   :  { %v3711_v22 = vpop.eup %3710  ;;  %2689 = vst [vmem:[#allocation10 + $0x78] sm:$0xff] %v2651_v28  ;;  %v2307_v37 = vpop.f32.mrf.mxu0 }
 0x434   :  { %v2614_v49 = vsel %vm2576_vm0, %v4758_v39, %v2538_v31  ;;  %v2945_v51 = vadd.f32 -1.0, %v3711_v22  ;;  %v2450_v45 = vmul.f32 1.442695, %v2391_v43  ;;  %v4794_v19 = vadd.f32 %v4689_v38, %v2307_v37 }
 0x435   :  { %v2652_v53 = vmul.f32 1.050701, %v2614_v49  ;;  %v3293_v44 = vpop.f32.mrf.mxu0 }
 0x436   :  { %v2539_v4 = vmul.f32 1.6732632, %v2945_v51  ;;  %3718 = vpow2.f32 %v2450_v45  ;;  %v2392_v42 = vmin.f32 %v4794_v19, 0.0  ;;  %vm2582_vm15 = vcmp.gt.f32.partialorder %v4794_v19, 0.0 }
 0x437   :  { %v3713_v57 = vpop.eup %3712  ;;  %2690 = vst [vmem:[#allocation10 + $0x80] sm:$0xff] %v2652_v53  ;;  %v2310_v58 = vpop.f32.mrf.mxu0 }
 0x438   :  { %v2615_v36 = vsel %vm2577_vm10, %v4764_v32, %v2539_v4  ;;  %v2946_v8 = vadd.f32 -1.0, %v3713_v57  ;;  %v2452_v39 = vmul.f32 1.442695, %v2392_v42  ;;  %v4800_v62 = vadd.f32 %v4689_v38, %v2310_v58 }
 0x439   :  { %v2653_v46 = vmul.f32 1.050701, %v2615_v36  ;;  %v3294_v7 = vpop.f32.mrf.mxu0 }
 0x43a   :  { %v2540_v1 = vmul.f32 1.6732632, %v2946_v8  ;;  %3720 = vpow2.f32 %v2452_v39  ;;  %v2393_v14 = vmin.f32 %v4800_v62, 0.0  ;;  %vm2583_vm1 = vcmp.gt.f32.partialorder %v4800_v62, 0.0 }
 0x43b   :  { %v3715_v2 = vpop.eup %3714  ;;  %2691 = vst [vmem:[#allocation10 + $0x88] sm:$0xff] %v2653_v46  ;;  %v2315_v59 = vpop.f32.mrf.mxu0 }
 0x43c   :  { %v2616_v40 = vsel %vm2578_vm11, %v4770_v61, %v2540_v1  ;;  %v2947_v56 = vadd.f32 -1.0, %v3715_v2  ;;  %v2454_v32 = vmul.f32 1.442695, %v2393_v14  ;;  %v4806_v48 = vadd.f32 %v4689_v38, %v2315_v59 }
 0x43d   :  { %v2654_v24 = vmul.f32 1.050701, %v2616_v40  ;;  %v3297_v33 = vpop.f32.mrf.mxu0 }
 0x43e   :  { %v2541_v63 = vmul.f32 1.6732632, %v2947_v56  ;;  %3722 = vpow2.f32 %v2454_v32  ;;  %v2394_v6 = vmin.f32 %v4806_v48, 0.0  ;;  %vm2584_vm2 = vcmp.gt.f32.partialorder %v4806_v48, 0.0 }
 0x43f   :  { %v3717_v12 = vpop.eup %3716  ;;  %2692 = vst [vmem:[#allocation10 + $0x90] sm:$0xff] %v2654_v24  ;;  %v2318_v15 = vpop.f32.mrf.mxu0 }
 0x440   :  { %v2617_v25 = vsel %vm2579_vm12, %v4776_v5, %v2541_v63  ;;  %v2948_v16 = vadd.f32 -1.0, %v3717_v12  ;;  %v2456_v61 = vmul.f32 1.442695, %v2394_v6  ;;  %v4812_v18 = vadd.f32 %v4689_v38, %v2318_v15 }
 0x441   :  { %v2655_v17 = vmul.f32 1.050701, %v2617_v25  ;;  %v3298_v13 = vpop.f32.mrf.mxu0 }
 0x442   :  { %v2542_v35 = vmul.f32 1.6732632, %v2948_v16  ;;  %3724 = vpow2.f32 %v2456_v61  ;;  %v2395_v9 = vmin.f32 %v4812_v18, 0.0  ;;  %vm2585_vm3 = vcmp.gt.f32.partialorder %v4812_v18, 0.0 }
 0x443   :  { %v3719_v55 = vpop.eup %3718  ;;  %2693 = vst [vmem:[#allocation10 + $0x98] sm:$0xff] %v2655_v17  ;;  %v2323_v11 = vpop.f32.mrf.mxu0 }
 0x444   :  { %v2618_v41 = vsel %vm2580_vm13, %v4782_v0, %v2542_v35  ;;  %v2949_v27 = vadd.f32 -1.0, %v3719_v55  ;;  %v2458_v5 = vmul.f32 1.442695, %v2395_v9  ;;  %v4818_v3 = vadd.f32 %v4689_v38, %v2323_v11 }
 0x445   :  { %v2656_v29 = vmul.f32 1.050701, %v2618_v41  ;;  %v3301_v10 = vpop.f32.mrf.mxu0 }
 0x446   :  { %v2543_v21 = vmul.f32 1.6732632, %v2949_v27  ;;  %3726 = vpow2.f32 %v2458_v5  ;;  %v2396_v26 = vmin.f32 %v4818_v3, 0.0  ;;  %vm2586_vm4 = vcmp.gt.f32.partialorder %v4818_v3, 0.0 }
 0x447   :  { %v3721_v20 = vpop.eup %3720  ;;  %2694 = vst [vmem:[#allocation10 + $0xa0] sm:$0xff] %v2656_v29  ;;  %v2326_v50 = vpop.f32.mrf.mxu0 }
 0x448   :  { %v2619_v52 = vsel %vm2581_vm14, %v4788_v23, %v2543_v21  ;;  %v2950_v60 = vadd.f32 -1.0, %v3721_v20  ;;  %v2460_v0 = vmul.f32 1.442695, %v2396_v26  ;;  %v4824_v30 = vadd.f32 %v4689_v38, %v2326_v50 }
 0x449   :  { %v2657_v54 = vmul.f32 1.050701, %v2619_v52  ;;  %v3302_v47 = vpop.f32.mrf.mxu0 }
 0x44a   :  { %v2544_v28 = vmul.f32 1.6732632, %v2950_v60  ;;  %3728 = vpow2.f32 %v2460_v0  ;;  %v2397_v34 = vmin.f32 %v4824_v30, 0.0  ;;  %vm2587_vm5 = vcmp.gt.f32.partialorder %v4824_v30, 0.0 }
 0x44b   :  { %v3723_v31 = vpop.eup %3722  ;;  %2695 = vst [vmem:[#allocation10 + $0xa8] sm:$0xff] %v2657_v54  ;;  %v2331_v43 = vpop.f32.mrf.mxu0 }
 0x44c   :  { %v2620_v22 = vsel %vm2582_vm15, %v4794_v19, %v2544_v28  ;;  %v2951_v37 = vadd.f32 -1.0, %v3723_v31  ;;  %v2462_v23 = vmul.f32 1.442695, %v2397_v34  ;;  %v4830_v49 = vadd.f32 %v4689_v38, %v2331_v43 }
 0x44d   :  { %v2658_v51 = vmul.f32 1.050701, %v2620_v22  ;;  %v3305_v45 = vpop.f32.mrf.mxu0 }
 0x44e   :  { %v2545_v53 = vmul.f32 1.6732632, %v2951_v37  ;;  %3730 = vpow2.f32 %v2462_v23  ;;  %v2398_v44 = vmin.f32 %v4830_v49, 0.0  ;;  %vm2588_vm6 = vcmp.gt.f32.partialorder %v4830_v49, 0.0 }
 0x44f   :  { %v3725_v4 = vpop.eup %3724  ;;  %2696 = vst [vmem:[#allocation10 + $0xb0] sm:$0xff] %v2658_v51  ;;  %v2334_v42 = vpop.f32.mrf.mxu0 }
 0x450   :  { %v2621_v57 = vsel %vm2583_vm1, %v4800_v62, %v2545_v53  ;;  %v2952_v58 = vadd.f32 -1.0, %v3725_v4  ;;  %v2464_v19 = vmul.f32 1.442695, %v2398_v44  ;;  %v4836_v36 = vadd.f32 %v4689_v38, %v2334_v42 }
 0x451   :  { %v2659_v8 = vmul.f32 1.050701, %v2621_v57  ;;  %v3306_v39 = vpop.f32.mrf.mxu0 }
 0x452   :  { %v2546_v46 = vmul.f32 1.6732632, %v2952_v58  ;;  %3732 = vpow2.f32 %v2464_v19  ;;  %v2399_v7 = vmin.f32 %v4836_v36, 0.0  ;;  %vm2589_vm7 = vcmp.gt.f32.partialorder %v4836_v36, 0.0 }
 0x453   :  { %v3727_v1 = vpop.eup %3726  ;;  %2697 = vst [vmem:[#allocation10 + $0xb8] sm:$0xff] %v2659_v8  ;;  %v2339_v14 = vpop.f32.mrf.mxu0 }
 0x454   :  { %v2622_v2 = vsel %vm2584_vm2, %v4806_v48, %v2546_v46  ;;  %v2953_v59 = vadd.f32 -1.0, %v3727_v1  ;;  %v2466_v62 = vmul.f32 1.442695, %v2399_v7  ;;  %v4842_v40 = vadd.f32 %v4689_v38, %v2339_v14 }
 0x455   :  { %v2660_v56 = vmul.f32 1.050701, %v2622_v2  ;;  %v3309_v32 = vpop.f32.mrf.mxu0 }
 0x456   :  { %v2547_v24 = vmul.f32 1.6732632, %v2953_v59  ;;  %3734 = vpow2.f32 %v2466_v62  ;;  %v2400_v33 = vmin.f32 %v4842_v40, 0.0  ;;  %vm2590_vm8 = vcmp.gt.f32.partialorder %v4842_v40, 0.0 }
 0x457   :  { %v3729_v63 = vpop.eup %3728  ;;  %2698 = vst [vmem:[#allocation10 + $0xc0] sm:$0xff] %v2660_v56  ;;  %v2342_v6 = vpop.f32.mrf.mxu0 }
 0x458   :  { %v2623_v12 = vsel %vm2585_vm3, %v4812_v18, %v2547_v24  ;;  %v2954_v15 = vadd.f32 -1.0, %v3729_v63  ;;  %v2468_v48 = vmul.f32 1.442695, %v2400_v33  ;;  %v4848_v25 = vadd.f32 %v4689_v38, %v2342_v6 }
 0x459   :  { %v2661_v16 = vmul.f32 1.050701, %v2623_v12  ;;  %v3310_v61 = vpop.f32.mrf.mxu0 }
 0x45a   :  { %v2548_v17 = vmul.f32 1.6732632, %v2954_v15  ;;  %3736 = vpow2.f32 %v2468_v48  ;;  %v2401_v13 = vmin.f32 %v4848_v25, 0.0  ;;  %vm2591_vm9 = vcmp.gt.f32.partialorder %v4848_v25, 0.0 }
 0x45b   :  { %v3731_v35 = vpop.eup %3730  ;;  %2699 = vst [vmem:[#allocation10 + $0xc8] sm:$0xff] %v2661_v16  ;;  %v2347_v9 = vpop.f32.mrf.mxu0 }
 0x45c   :  { %v2624_v55 = vsel %vm2586_vm4, %v4818_v3, %v2548_v17  ;;  %v2955_v11 = vadd.f32 -1.0, %v3731_v35  ;;  %v2470_v18 = vmul.f32 1.442695, %v2401_v13  ;;  %v4854_v41 = vadd.f32 %v4689_v38, %v2347_v9 }
 0x45d   :  { %v2662_v27 = vmul.f32 1.050701, %v2624_v55  ;;  %v3313_v5 = vpop.f32.mrf.mxu0 }
 0x45e   :  { %v2549_v29 = vmul.f32 1.6732632, %v2955_v11  ;;  %3738 = vpow2.f32 %v2470_v18  ;;  %v2402_v10 = vmin.f32 %v4854_v41, 0.0  ;;  %vm2592_vm0 = vcmp.gt.f32.partialorder %v4854_v41, 0.0 }
 0x45f   :  { %v3733_v21 = vpop.eup %3732  ;;  %2700 = vst [vmem:[#allocation10 + $0xd0] sm:$0xff] %v2662_v27  ;;  %v2350_v26 = vpop.f32.mrf.mxu0 }
 0x460   :  { %v2625_v20 = vsel %vm2587_vm5, %v4824_v30, %v2549_v29  ;;  %v2956_v50 = vadd.f32 -1.0, %v3733_v21  ;;  %v2472_v3 = vmul.f32 1.442695, %v2402_v10  ;;  %v4860_v52 = vadd.f32 %v4689_v38, %v2350_v26 }
 0x461   :  { %v2663_v60 = vmul.f32 1.050701, %v2625_v20  ;;  %v3314_v0 = vpop.f32.mrf.mxu0 }
 0x462   :  { %v2550_v54 = vmul.f32 1.6732632, %v2956_v50  ;;  %3740 = vpow2.f32 %v2472_v3  ;;  %v2403_v47 = vmin.f32 %v4860_v52, 0.0  ;;  %vm2593_vm10 = vcmp.gt.f32.partialorder %v4860_v52, 0.0 }
 0x463   :  { %v3735_v28 = vpop.eup %3734  ;;  %2701 = vst [vmem:[#allocation10 + $0xd8] sm:$0xff] %v2663_v60  ;;  %v2355_v34 = vpop.f32.mrf.mxu1 }
 0x464   :  { %v2626_v31 = vsel %vm2588_vm6, %v4830_v49, %v2550_v54  ;;  %v2957_v43 = vadd.f32 -1.0, %v3735_v28  ;;  %v2474_v30 = vmul.f32 1.442695, %v2403_v47  ;;  %v4866_v22 = vadd.f32 %v4689_v38, %v2355_v34 }
 0x465   :  { %v2664_v37 = vmul.f32 1.050701, %v2626_v31  ;;  %v3317_v23 = vpop.f32.mrf.mxu1 }
 0x466   :  { %v2551_v51 = vmul.f32 1.6732632, %v2957_v43  ;;  %3742 = vpow2.f32 %v2474_v30  ;;  %v2404_v45 = vmin.f32 %v4866_v22, 0.0  ;;  %vm2594_vm11 = vcmp.gt.f32.partialorder %v4866_v22, 0.0 }
 0x467   :  { %v3737_v53 = vpop.eup %3736  ;;  %2702 = vst [vmem:[#allocation10 + $0xe0] sm:$0xff] %v2664_v37  ;;  %v2358_v44 = vpop.f32.mrf.mxu1 }
 0x468   :  { %v2627_v4 = vsel %vm2589_vm7, %v4836_v36, %v2551_v51  ;;  %v2958_v42 = vadd.f32 -1.0, %v3737_v53  ;;  %v2476_v49 = vmul.f32 1.442695, %v2404_v45  ;;  %v2359_v57 = vadd.f32 %v4689_v38, %v2358_v44 }
 0x469   :  { %v2665_v58 = vmul.f32 1.050701, %v2627_v4  ;;  %v3318_v19 = vpop.f32.mrf.mxu1 }
 0x46a   :  { %v2552_v8 = vmul.f32 1.6732632, %v2958_v42  ;;  %3744 = vpow2.f32 %v2476_v49  ;;  %v2405_v39 = vmin.f32 %v2359_v57, 0.0  ;;  %vm2595_vm12 = vcmp.gt.f32.partialorder %v2359_v57, 0.0 }
 0x46b   :  { %v3739_v46 = vpop.eup %3738  ;;  %2703 = vst [vmem:[#allocation10 + $0xe8] sm:$0xff] %v2665_v58  ;;  %v2363_v7 = vpop.f32.mrf.mxu1 }
 0x46c   :  { %v2628_v1 = vsel %vm2590_vm8, %v4842_v40, %v2552_v8  ;;  %v2959_v14 = vadd.f32 -1.0, %v3739_v46  ;;  %v2478_v2 = vmul.f32 1.442695, %v2405_v39  ;;  %v2364_v36 = vadd.f32 %v4689_v38, %v2363_v7 }
 0x46d   :  { %v2666_v59 = vmul.f32 1.050701, %v2628_v1  ;;  %v3321_v62 = vpop.f32.mrf.mxu1 }
 0x46e   :  { %v2553_v56 = vmul.f32 1.6732632, %v2959_v14  ;;  %3746 = vpow2.f32 %v2478_v2  ;;  %v2406_v32 = vmin.f32 %v2364_v36, 0.0  ;;  %vm2596_vm13 = vcmp.gt.f32.partialorder %v2364_v36, 0.0 }
 0x46f   :  { %v3741_v24 = vpop.eup %3740  ;;  %2704 = vst [vmem:[#allocation10 + $0xf0] sm:$0xff] %v2666_v59  ;;  %v2366_v33 = vpop.f32.mrf.mxu1 }
 0x470   :  { %v2629_v63 = vsel %vm2591_vm9, %v4848_v25, %v2553_v56  ;;  %v2960_v6 = vadd.f32 -1.0, %v3741_v24  ;;  %v2480_v12 = vmul.f32 1.442695, %v2406_v32  ;;  %v2367_v40 = vadd.f32 %v4689_v38, %v2366_v33 }
 0x471   :  { %v2667_v15 = vmul.f32 1.050701, %v2629_v63  ;;  %v3322_v48 = vpop.f32.mrf.mxu1 }
 0x472   :  { %v2554_v16 = vmul.f32 1.6732632, %v2960_v6  ;;  %3748 = vpow2.f32 %v2480_v12  ;;  %v2407_v61 = vmin.f32 %v2367_v40, 0.0  ;;  %vm2597_vm14 = vcmp.gt.f32.partialorder %v2367_v40, 0.0 }
 0x473   :  { %v3743_v17 = vpop.eup %3742  ;;  %2705 = vst [vmem:[#allocation10 + $0xf8] sm:$0xff] %v2667_v15 }
 0x474   :  { %v2630_v13 = vsel %vm2592_vm0, %v4854_v41, %v2554_v16  ;;  %v2961_v35 = vadd.f32 -1.0, %v3743_v17  ;;  %v2482_v9 = vmul.f32 1.442695, %v2407_v61 }
 0x475   :  { %v2668_v55 = vmul.f32 1.050701, %v2630_v13 }
 0x476   :  { %v2555_v11 = vmul.f32 1.6732632, %v2961_v35  ;;  %3750 = vpow2.f32 %v2482_v9 }
 0x477   :  { %v3745_v25 = vpop.eup %3744  ;;  %2706 = vst [vmem:[#allocation10 + $0x100] sm:$0xff] %v2668_v55 }
 0x478   :  { %v2631_v38 = vsel %vm2593_vm10, %v4860_v52, %v2555_v11  ;;  %v2962_v18 = vadd.f32 -1.0, %v3745_v25 }
 0x479   :  { %v2669_v27 = vmul.f32 1.050701, %v2631_v38 }
 0x47a   :  { %v2556_v5 = vmul.f32 1.6732632, %v2962_v18 }
 0x47b   :  { %v3747_v29 = vpop.eup %3746  ;;  %2707 = vst [vmem:[#allocation10 + $0x108] sm:$0xff] %v2669_v27 }
 0x47c   :  { %v2632_v41 = vsel %vm2594_vm11, %v4866_v22, %v2556_v5  ;;  %v2963_v10 = vadd.f32 -1.0, %v3747_v29 }
 0x47d   :  { %v2670_v21 = vmul.f32 1.050701, %v2632_v41 }
 0x47e   :  { %v2557_v26 = vmul.f32 1.6732632, %v2963_v10 }
 0x47f   :  { %v3749_v20 = vpop.eup %3748  ;;  %2708 = vst [vmem:[#allocation10 + $0x110] sm:$0xff] %v2670_v21 }
 0x480   :  { %v2633_v50 = vsel %vm2595_vm12, %v2359_v57, %v2557_v26  ;;  %v2964_v3 = vadd.f32 -1.0, %v3749_v20 }
 0x481   :  { %v2671_v60 = vmul.f32 1.050701, %v2633_v50 }
 0x482   :  { %v2558_v0 = vmul.f32 1.6732632, %v2964_v3 }
 0x483   :  { %v3751_v52 = vpop.eup %3750  ;;  %2709 = vst [vmem:[#allocation10 + $0x118] sm:$0xff] %v2671_v60 }
 0x484   :  { %v2634_v54 = vsel %vm2596_vm13, %v2364_v36, %v2558_v0  ;;  %v2965_v47 = vadd.f32 -1.0, %v3751_v52 }
 0x485   :  { %v2672_v28 = vmul.f32 1.050701, %v2634_v54 }
 0x486   :  { %v2559_v34 = vmul.f32 1.6732632, %v2965_v47 }
 0x487   :  { %2710 = vst [vmem:[#allocation10 + $0x120] sm:$0xff] %v2672_v28 }
 0x488   :  { %v2635_v31 = vsel %vm2597_vm14, %v2367_v40, %v2559_v34 }
 0x489   :  { %v2673_v43 = vmul.f32 1.050701, %v2635_v31 }
 0x48b   :  { %2711 = vst [vmem:[#allocation10 + $0x128] sm:$0xff] %v2673_v43 }
 0x48c   :  { %3843 = shalt.err (!%p3840_p10)
}
 0x48d   :  { %2723 = dma.vmem_to_hbm [thread:$0]  %s2718_s27, 4864, %s4897_s7, [#allocation4], %s3864_s11, %s3864_s11, %s3865_s12  }
 0x48e   :  { %3858 = dma.done.wait [#allocation4], 4864  }
 0x48f   :  { %3859 = vsyncadd [#allocation4], 4294962432 }
 0x490   :  { %2727 = vsyncpa [#allocation3], 1 }
 0x491   :  { %2728 = vsyncpa [#allocation6], 1 }
 0x492   :  { %2729 = vsyncpa [#allocation9], 1 }
 0x493   :  { %2730 = vsyncpa [#allocation4], 1 }

</bundles_post_ra>
